<compile_context>
chip_gen: v6e
topology: v6e:2x2x1
jax: 0.10.0
libtpu: 0.0.40
codegen_flags: <defaults>
</compile_context>

<pallas_src>
import jax
import jax.numpy as jnp
from jax.experimental import pallas as pl
from jax.experimental.pallas import tpu as pltpu


def _round_up(v, m):
    return ((v + m - 1) // m) * m


# ----------------------------------------------------------------------------
# Init-time lowering: conv / conv-transpose on a FIXED spatial grid -> exact
# dense linear map.  Pure jnp, runs once per parameter set (hoisted off the
# forward-pass critical path).
# ----------------------------------------------------------------------------
def _conv2d_matrix(w, h_in, w_in, *, stride, padding):
    """w: (Cout, Cin, k, k) -> M: (Cin*h_in*w_in, Cout*h_out*w_out) such that
    x_flat @ M reproduces nn.Conv2d (bias excluded)."""
    cout, cin, k, _ = w.shape
    h_out = (h_in + 2 * padding - k) // stride + 1
    w_out = (w_in + 2 * padding - k) // stride + 1
    # Py[oy, ky, iy] = 1 iff iy == oy*stride - padding + ky (out of range -> zero pad)
    py = (jnp.arange(h_in)[None, None, :]
          == (jnp.arange(h_out)[:, None, None] * stride - padding
              + jnp.arange(k)[None, :, None])).astype(w.dtype)
    px = (jnp.arange(w_in)[None, None, :]
          == (jnp.arange(w_out)[:, None, None] * stride - padding
              + jnp.arange(k)[None, :, None])).astype(w.dtype)
    m = jnp.einsum("ocyx,pyi,qxj->cijopq", w, py, px)
    return m.reshape(cin * h_in * w_in, cout * h_out * w_out), (cout, h_out, w_out)


def _conv_transpose2d_matrix(w, h_in, w_in, *, stride, padding, output_padding):
    """w: (Cin, Cout, k, k) (nn.ConvTranspose2d layout) -> dense matrix."""
    cin, cout, k, _ = w.shape
    h_out = (h_in - 1) * stride - 2 * padding + k + output_padding
    w_out = (w_in - 1) * stride - 2 * padding + k + output_padding
    # Py[iy, ky, oy] = 1 iff oy == iy*stride - padding + ky
    py = (jnp.arange(h_out)[None, None, :]
          == (jnp.arange(h_in)[:, None, None] * stride - padding
              + jnp.arange(k)[None, :, None])).astype(w.dtype)
    px = (jnp.arange(w_out)[None, None, :]
          == (jnp.arange(w_in)[:, None, None] * stride - padding
              + jnp.arange(k)[None, :, None])).astype(w.dtype)
    m = jnp.einsum("coyx,iyp,jxq->cijopq", w, py, px)
    return m.reshape(cin * h_in * w_in, cout * h_out * w_out), (cout, h_out, w_out)


def _bias_row(b, out_shape):
    cout, h_out, w_out = out_shape
    return jnp.repeat(b.astype(jnp.float32), h_out * w_out).reshape(1, cout * h_out * w_out)


def build_fused_params(params, h, w):
    """Pre-reshape / pre-cast all layer weights once (loop-invariant)."""
    m1, s1 = _conv2d_matrix(params["w1"], h, w, stride=2, padding=1)
    m2, s2 = _conv2d_matrix(params["w2"], s1[1], s1[2], stride=2, padding=1)
    m3, s3 = _conv_transpose2d_matrix(params["w3"], s2[1], s2[2],
                                      stride=2, padding=1, output_padding=1)
    m4, s4 = _conv_transpose2d_matrix(params["w4"], s3[1], s3[2],
                                      stride=2, padding=1, output_padding=1)
    return {
        "m1": m1.astype(jnp.bfloat16), "b1": _bias_row(params["b1"], s1),
        "m2": m2.astype(jnp.bfloat16), "b2": _bias_row(params["b2"], s2),
        "m3": m3.astype(jnp.bfloat16), "b3": _bias_row(params["b3"], s3),
        "m4": m4.astype(jnp.bfloat16), "b4": _bias_row(params["b4"], s4),
    }


# ----------------------------------------------------------------------------
# The fused Pallas kernel: encoder + decoder, all activations VMEM-resident.
# ----------------------------------------------------------------------------
def _ae_fused_kernel(x_ref, m1_ref, b1_ref, m2_ref, b2_ref, m3_ref, b3_ref,
                     m4_ref, b4_ref, dec_ref, enc_ref):
    # Cast to bf16 in-kernel (no separate XLA cast pass over HBM).
    x = x_ref[...].astype(jnp.bfloat16)
    # --- encoder ---
    h = jnp.dot(x, m1_ref[...], preferred_element_type=jnp.float32)
    h = jnp.maximum(h + b1_ref[...], 0.0)
    h = jnp.dot(h.astype(jnp.bfloat16), m2_ref[...],
                preferred_element_type=jnp.float32)
    enc = jnp.maximum(h + b2_ref[...], 0.0)
    enc_bf = enc.astype(jnp.bfloat16)
    enc_ref[...] = enc_bf.astype(enc_ref.dtype)
    # --- decoder ---
    h = jnp.dot(enc_bf, m3_ref[...], preferred_element_type=jnp.float32)
    h = jnp.maximum(h + b3_ref[...], 0.0)
    h = jnp.dot(h.astype(jnp.bfloat16), m4_ref[...],
                preferred_element_type=jnp.float32)
    h = h + b4_ref[...]
    # sigmoid: EUP exp + exact reciprocal (denominator >= 1 -> result <= 1.0)
    dec = pl.reciprocal(1.0 + jnp.exp(-h), approx=False)
    dec_ref[...] = dec.astype(dec_ref.dtype)


def _pick_tile_m(n):
    """Row (batch) tile:
      * n <= 128: one step; round rows to 16 (bf16 sublane packing).
      * n  > 128: rows/step a multiple of 128 (v5e MXU occupancy, unmasked
        stores), >= 2 grid steps so v7x's second TensorCore is used, capped at
        512 rows/step (fits comfortably under the 48 MiB VMEM limit incl. f32
        intermediates on all of v5e/v6e/v7x)."""
    if n <= 128:
        return _round_up(n, 16)
    return min(_round_up(pl.cdiv(n, 2), 128), 512)


def ae_forward(fused, x):
    n, c_in, h, w = x.shape
    d0, d1 = fused["m1"].shape
    d2 = fused["m2"].shape[1]
    d3 = fused["m3"].shape[1]
    d4 = fused["m4"].shape[1]
    assert c_in * h * w == d0

    tile_m = _pick_tile_m(n)
    grid_m = pl.cdiv(n, tile_m)           # ragged last block handled by masking
    x2 = x.reshape(n, d0)                 # contiguous NCHW flatten -> free

    rows = grid_m * tile_m
    w_elems = d0 * d1 + d1 * d2 + d2 * d3 + d3 * d4
    flops = 2 * rows * w_elems
    bytes_accessed = (n * d0 * x.dtype.itemsize + w_elems * 2
                      + (d1 + d2 + d3 + d4) * 4 + n * (d2 + d4) * 2)

    def const_spec(shape):
        # Constant index_map: weights/biases stay VMEM-resident across the grid.
        return pl.BlockSpec(shape, lambda i: (0, 0))

    dec, enc = pl.pallas_call(
        _ae_fused_kernel,
        out_shape=(jax.ShapeDtypeStruct((n, d4), jnp.bfloat16),
                   jax.ShapeDtypeStruct((n, d2), jnp.bfloat16)),
        grid_spec=pltpu.PrefetchScalarGridSpec(
            num_scalar_prefetch=0,
            grid=(grid_m,),
            in_specs=[
                pl.BlockSpec((tile_m, d0), lambda i: (i, 0)),   # x rows: tiled
                const_spec((d0, d1)), const_spec((1, d1)),
                const_spec((d1, d2)), const_spec((1, d2)),
                const_spec((d2, d3)), const_spec((1, d3)),
                const_spec((d3, d4)), const_spec((1, d4)),
            ],
            out_specs=(pl.BlockSpec((tile_m, d4), lambda i: (i, 0)),
                       pl.BlockSpec((tile_m, d2), lambda i: (i, 0))),
        ),
        compiler_params=pltpu.CompilerParams(
            dimension_semantics=("parallel",),
            vmem_limit_bytes=48 * 1024 * 1024,   # safe on v7x (64 MiB/TC) too
        ),
        cost_estimate=pl.CostEstimate(
            flops=flops, transcendentals=2 * rows * d4,   # exp + reciprocal
            bytes_accessed=bytes_accessed),
    )(x2, fused["m1"], fused["b1"], fused["m2"], fused["b2"],
      fused["m3"], fused["b3"], fused["m4"], fused["b4"])

    h_enc, w_enc = h // 4, w // 4
    c_enc = d2 // (h_enc * w_enc)
    c_dec = d4 // (h * w)
    decoded = dec.reshape(n, c_dec, h, w)
    encoded = enc.reshape(n, c_enc, h_enc, w_enc)
    return decoded, encoded


# ----------------------------------------------------------------------------
# Parameters + plain-JAX f32 reference (validation only, not the hot path)
# ----------------------------------------------------------------------------
def init_params(key):
    ks = jax.random.split(key, 8)
    scale = 0.1
    return {
        "w1": jax.random.normal(ks[0], (16, 1, 3, 3), jnp.float32) * scale,
        "b1": jax.random.normal(ks[1], (16,), jnp.float32) * scale,
        "w2": jax.random.normal(ks[2], (32, 16, 3, 3), jnp.float32) * scale,
        "b2": jax.random.normal(ks[3], (32,), jnp.float32) * scale,
        # ConvTranspose2d weights: (in_channels, out_channels, k, k)
        "w3": jax.random.normal(ks[4], (32, 16, 3, 3), jnp.float32) * scale,
        "b3": jax.random.normal(ks[5], (16,), jnp.float32) * scale,
        "w4": jax.random.normal(ks[6], (16, 1, 3, 3), jnp.float32) * scale,
        "b4": jax.random.normal(ks[7], (1,), jnp.float32) * scale,
    }


def _reference_forward(params, x):
    def conv(x, w, b, stride, padding):
        y = jax.lax.conv_general_dilated(
            x, w, (stride, stride), [(padding, padding)] * 2,
            dimension_numbers=("NCHW", "OIHW", "NCHW"))
        return y + b[None, :, None, None]

    def convT(x, w, b, stride, padding, output_padding):
        k = w.shape[2]
        w_conv = jnp.flip(w, (2, 3)).transpose(1, 0, 2, 3)
        lo, hi = k - 1 - padding, k - 1 - padding + output_padding
        y = jax.lax.conv_general_dilated(
            x, w_conv, (1, 1), [(lo, hi), (lo, hi)],
            lhs_dilation=(stride, stride),
            dimension_numbers=("NCHW", "OIHW", "NCHW"))
        return y + b[None, :, None, None]

    h1 = jax.nn.relu(conv(x, params["w1"], params["b1"], 2, 1))
    enc = jax.nn.relu(conv(h1, params["w2"], params["b2"], 2, 1))
    d1 = jax.nn.relu(convT(enc, params["w3"], params["b3"], 2, 1, 1))
    dec = jax.nn.sigmoid(convT(d1, params["w4"], params["b4"], 2, 1, 1))
    return dec, enc


if __name__ == "__main__":
    key = jax.random.PRNGKey(0)
    pkey, xkey = jax.random.split(key)
    params = init_params(pkey)

    # NCHW input, single channel (matches nn.Conv2d(1, 16, ...))
    x = jax.random.normal(xkey, (2, 1, 16, 16), jnp.float32)

    fused = build_fused_params(params, 16, 16)       # one-time weight prep
    fwd = jax.jit(ae_forward)
    decoded, encoded = fwd(fused, x)
    jax.block_until_ready((decoded, encoded))

    # shape / sanity checks
    assert decoded.shape == (2, 1, 16, 16), decoded.shape
    assert encoded.shape == (2, 32, 4, 4), encoded.shape
    assert bool(jnp.all(jnp.isfinite(decoded))) and bool(jnp.all(jnp.isfinite(encoded)))
    assert bool(jnp.all(encoded >= 0.0))                                   # ReLU range
    assert bool(jnp.all(decoded >= 0.0)) and bool(jnp.all(decoded <= 1.0 + 1e-3))

    # numerical check vs a plain-JAX f32 reference of the same module
    dec_expected, enc_expected = _reference_forward(params, x)
    assert float(jnp.max(jnp.abs(decoded.astype(jnp.float32) - dec_expected))) < 3e-2
    assert float(jnp.max(jnp.abs(encoded.astype(jnp.float32) - enc_expected))) < 3e-2

    print("KERNEL_OK")
</pallas_src>

<mosaic_0001>
module attributes {stable_mosaic.version = 11 : i64} {
  func.func @_ae_fused_kernel(%arg0: i32, %arg1: memref<16x256xf32, #tpu.memory_space<vmem>>, %arg2: memref<256x1024xbf16, #tpu.memory_space<vmem>>, %arg3: memref<1x1024xf32, #tpu.memory_space<vmem>>, %arg4: memref<1024x512xbf16, #tpu.memory_space<vmem>>, %arg5: memref<1x512xf32, #tpu.memory_space<vmem>>, %arg6: memref<512x1024xbf16, #tpu.memory_space<vmem>>, %arg7: memref<1x1024xf32, #tpu.memory_space<vmem>>, %arg8: memref<1024x256xbf16, #tpu.memory_space<vmem>>, %arg9: memref<1x256xf32, #tpu.memory_space<vmem>>, %arg10: memref<16x256xbf16, #tpu.memory_space<vmem>>, %arg11: memref<16x512xbf16, #tpu.memory_space<vmem>>) attributes {dimension_semantics = [#tpu.dimension_semantics<parallel>], iteration_bounds = array<i64: 1>, scalar_prefetch = 0 : i64, scratch_operands = 0 : i64, tpu.core_type = #tpu.core_type<tc>, window_params = [{transform_indices = @transform_0, window_bounds = array<i64: 16, 256>}, {pipeline_mode = #tpu.pipeline_mode<synchronous>, transform_indices = @transform_1, window_bounds = array<i64: 256, 1024>}, {pipeline_mode = #tpu.pipeline_mode<synchronous>, transform_indices = @transform_2, window_bounds = array<i64: 1, 1024>}, {pipeline_mode = #tpu.pipeline_mode<synchronous>, transform_indices = @transform_3, window_bounds = array<i64: 1024, 512>}, {pipeline_mode = #tpu.pipeline_mode<synchronous>, transform_indices = @transform_4, window_bounds = array<i64: 1, 512>}, {pipeline_mode = #tpu.pipeline_mode<synchronous>, transform_indices = @transform_5, window_bounds = array<i64: 512, 1024>}, {pipeline_mode = #tpu.pipeline_mode<synchronous>, transform_indices = @transform_6, window_bounds = array<i64: 1, 1024>}, {pipeline_mode = #tpu.pipeline_mode<synchronous>, transform_indices = @transform_7, window_bounds = array<i64: 1024, 256>}, {pipeline_mode = #tpu.pipeline_mode<synchronous>, transform_indices = @transform_8, window_bounds = array<i64: 1, 256>}, {transform_indices = @transform_9, window_bounds = array<i64: 16, 256>}, {transform_indices = @transform_10, window_bounds = array<i64: 16, 512>}]} {
    %c0 = arith.constant 0 : index
    %c0_0 = arith.constant 0 : index
    %0 = vector.load %arg1[%c0, %c0_0] : memref<16x256xf32, #tpu.memory_space<vmem>>, vector<16x256xf32>
    %1 = arith.truncf %0 : vector<16x256xf32> to vector<16x256xbf16>
    %c0_1 = arith.constant 0 : index
    %c0_2 = arith.constant 0 : index
    %2 = vector.load %arg2[%c0_1, %c0_2] : memref<256x1024xbf16, #tpu.memory_space<vmem>>, vector<256x1024xbf16>
    %cst = arith.constant dense<0.000000e+00> : vector<16x1024xf32>
    %3 = tpu.matmul %1, %2, %cst {dimension_numbers = #tpu.dot_dimension_numbers<[1], [0], [0], [1], [0, 0, 1, 1], [], []>} : vector<16x256xbf16>, vector<256x1024xbf16>, vector<16x1024xf32> -> vector<16x1024xf32>
    %c0_3 = arith.constant 0 : index
    %c0_4 = arith.constant 0 : index
    %4 = vector.load %arg3[%c0_3, %c0_4] : memref<1x1024xf32, #tpu.memory_space<vmem>>, vector<1x1024xf32>
    %5 = vector.broadcast %4 : vector<1x1024xf32> to vector<16x1024xf32>
    %6 = arith.addf %3, %5 : vector<16x1024xf32>
    %cst_5 = arith.constant 0.000000e+00 : f32
    %7 = vector.broadcast %cst_5 : f32 to vector<16x1024xf32>
    %8 = arith.maximumf %6, %7 : vector<16x1024xf32>
    %9 = arith.truncf %8 : vector<16x1024xf32> to vector<16x1024xbf16>
    %c0_6 = arith.constant 0 : index
    %c0_7 = arith.constant 0 : index
    %10 = vector.load %arg4[%c0_6, %c0_7] : memref<1024x512xbf16, #tpu.memory_space<vmem>>, vector<1024x512xbf16>
    %cst_8 = arith.constant dense<0.000000e+00> : vector<16x512xf32>
    %11 = tpu.matmul %9, %10, %cst_8 {dimension_numbers = #tpu.dot_dimension_numbers<[1], [0], [0], [1], [0, 0, 1, 1], [], []>} : vector<16x1024xbf16>, vector<1024x512xbf16>, vector<16x512xf32> -> vector<16x512xf32>
    %c0_9 = arith.constant 0 : index
    %c0_10 = arith.constant 0 : index
    %12 = vector.load %arg5[%c0_9, %c0_10] : memref<1x512xf32, #tpu.memory_space<vmem>>, vector<1x512xf32>
    %13 = vector.broadcast %12 : vector<1x512xf32> to vector<16x512xf32>
    %14 = arith.addf %11, %13 : vector<16x512xf32>
    %cst_11 = arith.constant 0.000000e+00 : f32
    %15 = vector.broadcast %cst_11 : f32 to vector<16x512xf32>
    %16 = arith.maximumf %14, %15 : vector<16x512xf32>
    %17 = arith.truncf %16 : vector<16x512xf32> to vector<16x512xbf16>
    %c0_12 = arith.constant 0 : index
    %c0_13 = arith.constant 0 : index
    %18 = vector.load %arg11[%c0_12, %c0_13] : memref<16x512xbf16, #tpu.memory_space<vmem>>, vector<16x512xbf16>
    tpu.vector_store %arg11[%c0_12, %c0_13], %17 {strides = array<i32>} : memref<16x512xbf16, #tpu.memory_space<vmem>>, vector<16x512xbf16>,
    %c0_14 = arith.constant 0 : index
    %c0_15 = arith.constant 0 : index
    %19 = vector.load %arg6[%c0_14, %c0_15] : memref<512x1024xbf16, #tpu.memory_space<vmem>>, vector<512x1024xbf16>
    %cst_16 = arith.constant dense<0.000000e+00> : vector<16x1024xf32>
    %20 = tpu.matmul %17, %19, %cst_16 {dimension_numbers = #tpu.dot_dimension_numbers<[1], [0], [0], [1], [0, 0, 1, 1], [], []>} : vector<16x512xbf16>, vector<512x1024xbf16>, vector<16x1024xf32> -> vector<16x1024xf32>
    %c0_17 = arith.constant 0 : index
    %c0_18 = arith.constant 0 : index
    %21 = vector.load %arg7[%c0_17, %c0_18] : memref<1x1024xf32, #tpu.memory_space<vmem>>, vector<1x1024xf32>
    %22 = vector.broadcast %21 : vector<1x1024xf32> to vector<16x1024xf32>
    %23 = arith.addf %20, %22 : vector<16x1024xf32>
    %cst_19 = arith.constant 0.000000e+00 : f32
    %24 = vector.broadcast %cst_19 : f32 to vector<16x1024xf32>
    %25 = arith.maximumf %23, %24 : vector<16x1024xf32>
    %26 = arith.truncf %25 : vector<16x1024xf32> to vector<16x1024xbf16>
    %c0_20 = arith.constant 0 : index
    %c0_21 = arith.constant 0 : index
    %27 = vector.load %arg8[%c0_20, %c0_21] : memref<1024x256xbf16, #tpu.memory_space<vmem>>, vector<1024x256xbf16>
    %cst_22 = arith.constant dense<0.000000e+00> : vector<16x256xf32>
    %28 = tpu.matmul %26, %27, %cst_22 {dimension_numbers = #tpu.dot_dimension_numbers<[1], [0], [0], [1], [0, 0, 1, 1], [], []>} : vector<16x1024xbf16>, vector<1024x256xbf16>, vector<16x256xf32> -> vector<16x256xf32>
    %c0_23 = arith.constant 0 : index
    %c0_24 = arith.constant 0 : index
    %29 = vector.load %arg9[%c0_23, %c0_24] : memref<1x256xf32, #tpu.memory_space<vmem>>, vector<1x256xf32>
    %30 = vector.broadcast %29 : vector<1x256xf32> to vector<16x256xf32>
    %31 = arith.addf %28, %30 : vector<16x256xf32>
    %cst_25 = arith.constant 0.000000e+00 : f32
    %32 = vector.broadcast %cst_25 : f32 to vector<16x256xf32>
    %33 = arith.subf %32, %31 : vector<16x256xf32>
    %34 = math.exp %33 : vector<16x256xf32>
    %cst_26 = arith.constant 1.000000e+00 : f32
    %35 = vector.broadcast %cst_26 : f32 to vector<16x256xf32>
    %36 = arith.addf %35, %34 : vector<16x256xf32>
    %37 = tpu.reciprocal %36 : vector<16x256xf32> -> vector<16x256xf32>
    %38 = arith.truncf %37 : vector<16x256xf32> to vector<16x256xbf16>
    %c0_27 = arith.constant 0 : index
    %c0_28 = arith.constant 0 : index
    %39 = vector.load %arg10[%c0_27, %c0_28] : memref<16x256xbf16, #tpu.memory_space<vmem>>, vector<16x256xbf16>
    tpu.vector_store %arg10[%c0_27, %c0_28], %38 {strides = array<i32>} : memref<16x256xbf16, #tpu.memory_space<vmem>>, vector<16x256xbf16>,
    return
  }
  func.func @transform_0(%arg0: i32) -> (i32, i32) {
    %c0_i32 = arith.constant 0 : i32
    %c0_i32_0 = arith.constant 0 : i32
    return %arg0, %c0_i32 : i32, i32
  }
  func.func @transform_1(%arg0: i32) -> (i32, i32) {
    %c0_i32 = arith.constant 0 : i32
    %c0_i32_0 = arith.constant 0 : i32
    %c0_i32_1 = arith.constant 0 : i32
    return %c0_i32, %c0_i32_0 : i32, i32
  }
  func.func @transform_2(%arg0: i32) -> (i32, i32) {
    %c0_i32 = arith.constant 0 : i32
    %c0_i32_0 = arith.constant 0 : i32
    %c0_i32_1 = arith.constant 0 : i32
    return %c0_i32, %c0_i32_0 : i32, i32
  }
  func.func @transform_3(%arg0: i32) -> (i32, i32) {
    %c0_i32 = arith.constant 0 : i32
    %c0_i32_0 = arith.constant 0 : i32
    %c0_i32_1 = arith.constant 0 : i32
    return %c0_i32, %c0_i32_0 : i32, i32
  }
  func.func @transform_4(%arg0: i32) -> (i32, i32) {
    %c0_i32 = arith.constant 0 : i32
    %c0_i32_0 = arith.constant 0 : i32
    %c0_i32_1 = arith.constant 0 : i32
    return %c0_i32, %c0_i32_0 : i32, i32
  }
  func.func @transform_5(%arg0: i32) -> (i32, i32) {
    %c0_i32 = arith.constant 0 : i32
    %c0_i32_0 = arith.constant 0 : i32
    %c0_i32_1 = arith.constant 0 : i32
    return %c0_i32, %c0_i32_0 : i32, i32
  }
  func.func @transform_6(%arg0: i32) -> (i32, i32) {
    %c0_i32 = arith.constant 0 : i32
    %c0_i32_0 = arith.constant 0 : i32
    %c0_i32_1 = arith.constant 0 : i32
    return %c0_i32, %c0_i32_0 : i32, i32
  }
  func.func @transform_7(%arg0: i32) -> (i32, i32) {
    %c0_i32 = arith.constant 0 : i32
    %c0_i32_0 = arith.constant 0 : i32
    %c0_i32_1 = arith.constant 0 : i32
    return %c0_i32, %c0_i32_0 : i32, i32
  }
  func.func @transform_8(%arg0: i32) -> (i32, i32) {
    %c0_i32 = arith.constant 0 : i32
    %c0_i32_0 = arith.constant 0 : i32
    %c0_i32_1 = arith.constant 0 : i32
    return %c0_i32, %c0_i32_0 : i32, i32
  }
  func.func @transform_9(%arg0: i32) -> (i32, i32) {
    %c0_i32 = arith.constant 0 : i32
    %c0_i32_0 = arith.constant 0 : i32
    return %arg0, %c0_i32 : i32, i32
  }
  func.func @transform_10(%arg0: i32) -> (i32, i32) {
    %c0_i32 = arith.constant 0 : i32
    %c0_i32_0 = arith.constant 0 : i32
    return %arg0, %c0_i32 : i32, i32
  }
}

</mosaic_0001>

<bundles_post_ra>
// kernel: ae_forward.1
= control target key start
LH: loop header
LB: loop body
LE: loop exit
PB: predicated region body
PF: predicated region fallthrough
CT: control target
= control target key end

     0   :  { %16 = vsyncpa [#allocation3], 0  ;;  %s8002_s0 = inlined_call_operand.vmem [shape: f32[2,256], index: 0, kind: input, shape index: {}]   ;;  %s8003_s1 = inlined_call_operand.hbm [shape: bf16[256,1024], index: 1, kind: input, shape index: {}]   ;;  %s8004_s2 = inlined_call_operand.vmem [shape: f32[1,1024], index: 2, kind: input, shape index: {}]   ;;  %s8005_s3 = inlined_call_operand.hbm [shape: bf16[1024,512], index: 3, kind: input, shape index: {}]   ;;  %s8006_s4 = inlined_call_operand.vmem [shape: f32[1,512], index: 4, kind: input, shape index: {}]   ;;  %s8007_s5 = inlined_call_operand.hbm [shape: bf16[512,1024], index: 5, kind: input, shape index: {}]   ;;  %s8008_s6 = inlined_call_operand.vmem [shape: f32[1,1024], index: 6, kind: input, shape index: {}]   ;;  %s8009_s7 = inlined_call_operand.hbm [shape: bf16[1024,256], index: 7, kind: input, shape index: {}]   ;;  %s8010_s8 = inlined_call_operand.vmem [shape: f32[1,256], index: 8, kind: input, shape index: {}]   ;;  %s8011_s9 = inlined_call_operand.vmem [shape: bf16[2,256], index: 9, kind: output, shape index: {0}]   ;;  %s8012_s10 = inlined_call_operand.vmem [shape: bf16[2,512], index: 10, kind: output, shape index: {1}]  }
   0x1   :  { %17 = vsyncpa [#allocation5], 0 }
   0x2   :  { %18 = vsyncpa [#allocation8], 0  ;;  %s7708_s13 = smov [#allocation4]  }
   0x3   :  { %s40_s14 = sshll.u32 %s7708_s13, 4  ;;  %s41_s14 = int_to_ptr.vmem [resolvable:$true] %s40_s14 }
   0x4   :  { %s7630_s15 = scalar_lea.vmem %s41_s14, 32768  ;;  %p7635_p1 = scmp.lt.s32.totalorder %s41_s14, %s41_s14 }
   0x5   :  { %p7631_p0 = scmp.ne.s32.totalorder %s41_s14, %s7630_s15  ;;  %p7636_p2 = scmp.lt.s32.totalorder %s7630_s15, %s7630_s15 }
   0x7   :  { %p7637_p3 = por %p7636_p2, %p7635_p1 }
   0x9   :  { %p7638_p4 = pnand %p7637_p3, %p7631_p0 }
   0xb   :  { %7641 = shalt.err (!%p7638_p4)
}
   0xc   :  { %s7709_s16 = smov 256   ;;  %s7710_s17 = smov 16  }
   0xd   :  { %46 = dma.hbm_to_vmem [thread:$0]  %s8005_s3, 32768, %s41_s14, [#allocation5], %s7709_s16, %s7709_s16, %s7710_s17  }
   0xe   :  { %s7711_s20 = smov [#allocation2]  }
   0xf   :  { %s26_s21 = sshll.u32 %s7711_s20, 4  ;;  %s27_s21 = int_to_ptr.vmem [resolvable:$true] %s26_s21 }
  0x10   :  { %s7650_s22 = scalar_lea.vmem %s27_s21, 16384  ;;  %p7655_p6 = scmp.lt.s32.totalorder %s27_s21, %s27_s21 }
  0x11   :  { %p7651_p5 = scmp.ne.s32.totalorder %s27_s21, %s7650_s22  ;;  %p7656_p7 = scmp.lt.s32.totalorder %s7650_s22, %s7650_s22 }
  0x13   :  { %p7657_p8 = por %p7656_p7, %p7655_p6 }
  0x15   :  { %p7658_p9 = pnand %p7657_p8, %p7651_p5 }
  0x17   :  { %7661 = shalt.err (!%p7658_p9)
}
  0x18   :  { %s7712_s23 = smov 512   ;;  %s7713_s24 = smov 32  }
  0x19   :  { %32 = dma.hbm_to_vmem [thread:$0]  %s8003_s1, 16384, %s27_s21, [#allocation3], %s7712_s23, %s7712_s23, %s7713_s24  }
  0x1a   :  { %s7714_s27 = smov [#allocation6]   ;;  %s7715_s29 = smov [#allocation7]  }
  0x1b   :  { %s54_s28 = sshll.u32 %s7714_s27, 4  ;;  %s68_s3 = sshll.u32 %s7715_s29, 4  ;;  %s55_s28 = int_to_ptr.vmem [resolvable:$true] %s54_s28  ;;  %s69_s3 = int_to_ptr.vmem [resolvable:$true] %s68_s3 }
  0x1c   :  { %s7670_s30 = scalar_lea.vmem %s55_s28, 32768  ;;  %p7675_p11 = scmp.lt.s32.totalorder %s55_s28, %s55_s28 }
  0x1d   :  { %p7671_p10 = scmp.ne.s32.totalorder %s55_s28, %s7670_s30  ;;  %p7676_p12 = scmp.lt.s32.totalorder %s7670_s30, %s7670_s30 }
  0x1f   :  { %p7677_p13 = por %p7676_p12, %p7675_p11 }
  0x21   :  { %p7678_p0 = pnand %p7677_p13, %p7671_p10 }
  0x23   :  { %7681 = shalt.err (!%p7678_p0)
}
  0x24   :  { %60 = dma.hbm_to_vmem [thread:$0]  %s8007_s5, 32768, %s55_s28, [#allocation5], %s7712_s23, %s7712_s23, %s7713_s24  }
  0x25   :  { %s7690_s13 = scalar_lea.vmem %s69_s3, 16384  ;;  %p7695_p2 = scmp.lt.s32.totalorder %s69_s3, %s69_s3 }
  0x26   :  { %p7691_p1 = scmp.ne.s32.totalorder %s69_s3, %s7690_s13  ;;  %p7696_p3 = scmp.lt.s32.totalorder %s7690_s13, %s7690_s13 }
  0x28   :  { %p7697_p4 = por %p7696_p3, %p7695_p2 }
  0x2a   :  { %p7698_p5 = pnand %p7697_p4, %p7691_p1 }
  0x2c   :  { %7701 = shalt.err (!%p7698_p5)
}
  0x2d   :  { %s7716_s1 = smov 128   ;;  %s7717_s14 = smov 8  }
  0x2e   :  { %74 = dma.hbm_to_vmem [thread:$0]  %s8009_s7, 16384, %s69_s3, [#allocation8], %s7716_s1, %s7716_s1, %s7717_s14  }
  0x2f   :  { %7702 = dma.done.wait [#allocation3], 16384  }
  0x30   :  { %7703 = vsyncadd [#allocation3], 4294950912 }
  0x31   :  { %7704 = dma.done.wait [#allocation5], 65536  }
  0x32   :  { %7705 = vsyncadd [#allocation5], 4294901760 }
  0x33   :  { %7706 = dma.done.wait [#allocation8], 16384  }
  0x34   :  { %7707 = vsyncadd [#allocation8], 4294950912  ;;  %v203_v0 = vld [vmem:[#allocation2 + $0x1c0] sm:$0xff]  ;;  %v204_v2 = vld [vmem:[#allocation2 + $0x1c8] sm:$0xff]  ;;  %v110_v40 = vlaneseq }
  0x35   :  { %v207_v1 = vld [vmem:[#allocation2 + $0x1e0] sm:$0xff]  ;;  %v208_v4 = vld [vmem:[#allocation2 + $0x1e8] sm:$0xff]  ;;  %v7801_v63 = vld.sshfl [vmem:[%s8002_s0 + $0x10] sm:$0xff pattern:$0x76325410] }
  0x36   :  { %v6285_v3 = vcombine.high %v203_v0, %v207_v1  ;;  %v6284_v5 = vcombine.low %v203_v0, %v207_v1  ;;  %v195_v6 = vld [vmem:[#allocation2 + $0x180] sm:$0xff]  ;;  %v6287_v8 = vcombine.high %v204_v2, %v208_v4  ;;  %v6286_v9 = vcombine.low %v204_v2, %v208_v4  ;;  %v196_v11 = vld [vmem:[#allocation2 + $0x188] sm:$0xff]  ;;  %v7806_v2 = vld.sshfl [vmem:[%s8002_s0 + $0x18] sm:$0xff pattern:$0x76325410] }
  0x37   :  { %v199_v7 = vld [vmem:[#allocation2 + $0x1a0] sm:$0xff]  ;;  %v200_v12 = vld [vmem:[#allocation2 + $0x1a8] sm:$0xff]  ;;  %v7786_v49 = vshrl.u32 %v110_v40, 7 }
  0x38   :  { %v6277_v10 = vcombine.high %v195_v6, %v199_v7  ;;  %v187_v13 = vld [vmem:[#allocation2 + $0x140] sm:$0xff]  ;;  %957 = vmatprep.subr.bf16.mxu0 %v6285_v3  ;;  %v6279_v14 = vcombine.high %v196_v11, %v200_v12  ;;  %v188_v16 = vld [vmem:[#allocation2 + $0x148] sm:$0xff]  ;;  %1000 = vmatprep.subr.bf16.mxu1 %v6287_v8  ;;  %v6276_v18 = vcombine.low %v195_v6, %v199_v7 }
  0x39   :  { %v191_v15 = vld [vmem:[#allocation2 + $0x160] sm:$0xff]  ;;  %v192_v17 = vld [vmem:[#allocation2 + $0x168] sm:$0xff]  ;;  %958 = vmatpush1.bf16.msra.mxu0 %v6284_v5  ;;  %1001 = vmatpush1.bf16.msra.mxu1 %v6286_v9  ;;  %v6278_v19 = vcombine.low %v196_v11, %v200_v12  ;;  %v140_v12 = vcombine.high %v7801_v63, %v7806_v2 }
  0x3a   :  { %959 = vmatprep.subr.bf16.mxu0 %v6277_v10  ;;  %v6269_v20 = vcombine.high %v187_v13, %v191_v15  ;;  %1002 = vmatprep.subr.bf16.mxu1 %v6279_v14  ;;  %v6271_v21 = vcombine.high %v188_v16, %v192_v17  ;;  %v179_v22 = vld [vmem:[#allocation2 + $0x100] sm:$0xff]  ;;  %v180_v24 = vld [vmem:[#allocation2 + $0x108] sm:$0xff]  ;;  %v6268_v26 = vcombine.low %v187_v13, %v191_v15 }
  0x3b   :  { %v183_v23 = vld [vmem:[#allocation2 + $0x120] sm:$0xff]  ;;  %v184_v25 = vld [vmem:[#allocation2 + $0x128] sm:$0xff]  ;;  %v6270_v27 = vcombine.low %v188_v16, %v192_v17 }
  0x3c   :  { %v6261_v28 = vcombine.high %v179_v22, %v183_v23  ;;  %v6263_v29 = vcombine.high %v180_v24, %v184_v25  ;;  %v171_v30 = vld [vmem:[#allocation2 + $0xc0] sm:$0xff]  ;;  %v172_v32 = vld [vmem:[#allocation2 + $0xc8] sm:$0xff]  ;;  %v6260_v34 = vcombine.low %v179_v22, %v183_v23  ;;  %v6262_v35 = vcombine.low %v180_v24, %v184_v25 }
  0x3d   :  { %960 = vmatpush1.bf16.msra.mxu0 %v6276_v18  ;;  %1003 = vmatpush1.bf16.msra.mxu1 %v6278_v19  ;;  %v175_v31 = vld [vmem:[#allocation2 + $0xe0] sm:$0xff]  ;;  %v176_v33 = vld [vmem:[#allocation2 + $0xe8] sm:$0xff] }
  0x3e   :  { %961 = vmatprep.subr.bf16.mxu0 %v6269_v20  ;;  %1004 = vmatprep.subr.bf16.mxu1 %v6271_v21  ;;  %v6253_v36 = vcombine.high %v171_v30, %v175_v31  ;;  %v6255_v37 = vcombine.high %v172_v32, %v176_v33  ;;  %v163_v38 = vld [vmem:[#allocation2 + $0x80] sm:$0xff]  ;;  %v164_v41 = vld [vmem:[#allocation2 + $0x88] sm:$0xff]  ;;  %v6252_v43 = vcombine.low %v171_v30, %v175_v31 }
  0x3f   :  { %v167_v39 = vld [vmem:[#allocation2 + $0xa0] sm:$0xff]  ;;  %v168_v42 = vld [vmem:[#allocation2 + $0xa8] sm:$0xff]  ;;  %v6254_v44 = vcombine.low %v172_v32, %v176_v33 }
  0x40   :  { %v6245_v45 = vcombine.high %v163_v38, %v167_v39  ;;  %v6247_v46 = vcombine.high %v164_v41, %v168_v42  ;;  %v155_v47 = vld [vmem:[#allocation2 + $0x40] sm:$0xff]  ;;  %v156_v50 = vld [vmem:[#allocation2 + $0x48] sm:$0xff]  ;;  %v6244_v52 = vcombine.low %v163_v38, %v167_v39  ;;  %v6246_v55 = vcombine.low %v164_v41, %v168_v42 }
  0x41   :  { %962 = vmatpush1.bf16.msra.mxu0 %v6268_v26  ;;  %1005 = vmatpush1.bf16.msra.mxu1 %v6270_v27  ;;  %v159_v48 = vld [vmem:[#allocation2 + $0x60] sm:$0xff]  ;;  %v160_v51 = vld [vmem:[#allocation2 + $0x68] sm:$0xff] }
  0x42   :  { %963 = vmatprep.subr.bf16.mxu0 %v6261_v28  ;;  %1006 = vmatprep.subr.bf16.mxu1 %v6263_v29  ;;  %v147_v53 = vld [vmem:[#allocation2] sm:$0xff]  ;;  %v6237_v56 = vcombine.high %v155_v47, %v159_v48  ;;  %v148_v57 = vld [vmem:[#allocation2 + $0x8] sm:$0xff]  ;;  %v6239_v59 = vcombine.high %v156_v50, %v160_v51  ;;  %v6236_v60 = vcombine.low %v155_v47, %v159_v48 }
  0x43   :  { %v151_v54 = vld [vmem:[#allocation2 + $0x20] sm:$0xff]  ;;  %v152_v58 = vld [vmem:[#allocation2 + $0x28] sm:$0xff]  ;;  %v6238_v0 = vcombine.low %v156_v50, %v160_v51 }
  0x44   :  { %v7791_v61 = vld.sshfl [vmem:[%s8002_s0] sm:$0xff pattern:$0x76325410]  ;;  %v7796_v62 = vld.sshfl [vmem:[%s8002_s0 + $0x8] sm:$0xff pattern:$0x76325410]  ;;  %v6229_v1 = vcombine.high %v147_v53, %v151_v54  ;;  %v6231_v3 = vcombine.high %v148_v57, %v152_v58  ;;  %v6228_v8 = vcombine.low %v147_v53, %v151_v54  ;;  %v6230_v10 = vcombine.low %v148_v57, %v152_v58 }
  0x45   :  { %964 = vmatpush1.bf16.msra.mxu0 %v6260_v34  ;;  %1007 = vmatpush1.bf16.msra.mxu1 %v6262_v35  ;;  %v267_v4 = vld [vmem:[#allocation2 + $0x3c0] sm:$0xff]  ;;  %v268_v6 = vld [vmem:[#allocation2 + $0x3c8] sm:$0xff]  ;;  %v122_v9 = vcombine.high %v7791_v61, %v7796_v62 }
  0x46   :  { %965 = vmatprep.subr.bf16.mxu0 %v6253_v36  ;;  %1008 = vmatprep.subr.bf16.mxu1 %v6255_v37  ;;  %v271_v5 = vld [vmem:[#allocation2 + $0x3e0] sm:$0xff]  ;;  %v272_v7 = vld [vmem:[#allocation2 + $0x3e8] sm:$0xff] }
  0x47   :  { %v6349_v11 = vcombine.high %v267_v4, %v271_v5  ;;  %v6351_v13 = vcombine.high %v268_v6, %v272_v7  ;;  %v259_v14 = vld [vmem:[#allocation2 + $0x380] sm:$0xff]  ;;  %v260_v16 = vld [vmem:[#allocation2 + $0x388] sm:$0xff]  ;;  %v7812_v18 = vpack.c.bf16 %v140_v12, %v122_v9  ;;  %v6348_v19 = vcombine.low %v267_v4, %v271_v5  ;;  %v205_v12 = vld [vmem:[#allocation2 + $0x1d0] sm:$0xff] }
  0x48   :  { %v263_v15 = vld [vmem:[#allocation2 + $0x3a0] sm:$0xff]  ;;  %v264_v17 = vld [vmem:[#allocation2 + $0x3a8] sm:$0xff]  ;;  %v6350_v20 = vcombine.low %v268_v6, %v272_v7 }
  0x49   :  { %966 = vmatpush1.bf16.msra.mxu0 %v6252_v43  ;;  %1009 = vmatpush1.bf16.msra.mxu1 %v6254_v44  ;;  %v6341_v21 = vcombine.high %v259_v14, %v263_v15  ;;  %v6343_v22 = vcombine.high %v260_v16, %v264_v17  ;;  %v251_v23 = vld [vmem:[#allocation2 + $0x340] sm:$0xff]  ;;  %v252_v25 = vld [vmem:[#allocation2 + $0x348] sm:$0xff]  ;;  %v6340_v27 = vcombine.low %v259_v14, %v263_v15 }
  0x4a   :  { %967 = vmatprep.subr.bf16.mxu0 %v6245_v45  ;;  %1010 = vmatprep.subr.bf16.mxu1 %v6247_v46  ;;  %v255_v24 = vld [vmem:[#allocation2 + $0x360] sm:$0xff]  ;;  %v256_v26 = vld [vmem:[#allocation2 + $0x368] sm:$0xff]  ;;  %v6342_v28 = vcombine.low %v260_v16, %v264_v17  ;;  %v121_v14 = vcombine.low %v7791_v61, %v7796_v62  ;;  %v139_v15 = vcombine.low %v7801_v63, %v7806_v2  ;;  %v206_v16 = vld [vmem:[#allocation2 + $0x1d8] sm:$0xff] }
  0x4b   :  { %989 = vmatprep.mubr.bf16.mxu0 %v7812_v18  ;;  %1032 = vmatprep.mubr.bf16.mxu1 %v7812_v18  ;;  %v6333_v29 = vcombine.high %v251_v23, %v255_v24  ;;  %v6335_v30 = vcombine.high %v252_v25, %v256_v26  ;;  %v243_v31 = vld [vmem:[#allocation2 + $0x300] sm:$0xff]  ;;  %v244_v33 = vld [vmem:[#allocation2 + $0x308] sm:$0xff]  ;;  %v6332_v35 = vcombine.low %v251_v23, %v255_v24  ;;  %v210_v17 = vld [vmem:[#allocation2 + $0x1f8] sm:$0xff] }
  0x4c   :  { %v247_v32 = vld [vmem:[#allocation2 + $0x320] sm:$0xff]  ;;  %v248_v34 = vld [vmem:[#allocation2 + $0x328] sm:$0xff]  ;;  %v6334_v36 = vcombine.low %v252_v25, %v256_v26  ;;  %v197_v23 = vld [vmem:[#allocation2 + $0x190] sm:$0xff]  ;;  %v7820_v25 = vpack.c.bf16 %v139_v15, %v121_v14  ;;  %v6290_v62 = vcombine.low %v206_v16, %v210_v17 }
  0x4d   :  { %968 = vmatpush1.bf16.msra.mxu0 %v6244_v52  ;;  %1011 = vmatpush1.bf16.msra.mxu1 %v6246_v55  ;;  %v6325_v37 = vcombine.high %v243_v31, %v247_v32  ;;  %v6327_v38 = vcombine.high %v244_v33, %v248_v34  ;;  %v235_v39 = vld [vmem:[#allocation2 + $0x2c0] sm:$0xff]  ;;  %v236_v41 = vld [vmem:[#allocation2 + $0x2c8] sm:$0xff]  ;;  %v6324_v43 = vcombine.low %v243_v31, %v247_v32  ;;  %v201_v24 = vld [vmem:[#allocation2 + $0x1b0] sm:$0xff] }
  0x4e   :  { %969 = vmatprep.subr.bf16.mxu0 %v6237_v56  ;;  %1012 = vmatprep.subr.bf16.mxu1 %v6239_v59  ;;  %v239_v40 = vld [vmem:[#allocation2 + $0x2e0] sm:$0xff]  ;;  %v240_v42 = vld [vmem:[#allocation2 + $0x2e8] sm:$0xff]  ;;  %v6326_v44 = vcombine.low %v244_v33, %v248_v34  ;;  %v198_v26 = vld [vmem:[#allocation2 + $0x198] sm:$0xff]  ;;  %v6281_v63 = vcombine.high %v197_v23, %v201_v24  ;;  %v6280_v32 = vcombine.low %v197_v23, %v201_v24 }
  0x4f   :  { %v6317_v45 = vcombine.high %v235_v39, %v239_v40  ;;  %v6319_v46 = vcombine.high %v236_v41, %v240_v42  ;;  %v227_v47 = vld [vmem:[#allocation2 + $0x280] sm:$0xff]  ;;  %v228_v50 = vld [vmem:[#allocation2 + $0x288] sm:$0xff]  ;;  %v6316_v52 = vcombine.low %v235_v39, %v239_v40  ;;  %v6318_v53 = vcombine.low %v236_v41, %v240_v42  ;;  %v194_v31 = vld [vmem:[#allocation2 + $0x178] sm:$0xff] }
  0x50   :  { %v231_v48 = vld [vmem:[#allocation2 + $0x2a0] sm:$0xff]  ;;  %v232_v51 = vld [vmem:[#allocation2 + $0x2a8] sm:$0xff]  ;;  %v186_v39 = vld [vmem:[#allocation2 + $0x138] sm:$0xff] }
  0x51   :  { %970 = vmatpush1.bf16.msra.mxu0 %v6236_v60  ;;  %1013 = vmatpush1.bf16.msra.mxu1 %v6238_v0  ;;  %v6309_v54 = vcombine.high %v227_v47, %v231_v48  ;;  %v6311_v55 = vcombine.high %v228_v50, %v232_v51  ;;  %v219_v56 = vld [vmem:[#allocation2 + $0x240] sm:$0xff]  ;;  %v220_v58 = vld [vmem:[#allocation2 + $0x248] sm:$0xff]  ;;  %v6308_v60 = vcombine.low %v227_v47, %v231_v48  ;;  %v178_v47 = vld [vmem:[#allocation2 + $0xf8] sm:$0xff] }
  0x52   :  { %971 = vmatprep.subr.bf16.mxu0 %v6229_v1  ;;  %1014 = vmatprep.subr.bf16.mxu1 %v6231_v3  ;;  %v223_v57 = vld [vmem:[#allocation2 + $0x260] sm:$0xff]  ;;  %v224_v59 = vld [vmem:[#allocation2 + $0x268] sm:$0xff]  ;;  %v6310_v0 = vcombine.low %v228_v50, %v232_v51  ;;  %v273_v14 = vld [vmem:[#allocation2 + $0x3f0] sm:$0xff] }
  0x53   :  { %v6301_v1 = vcombine.high %v219_v56, %v223_v57  ;;  %v6303_v3 = vcombine.high %v220_v58, %v224_v59  ;;  %v211_v4 = vld [vmem:[#allocation2 + $0x200] sm:$0xff]  ;;  %v212_v6 = vld [vmem:[#allocation2 + $0x208] sm:$0xff]  ;;  %v6302_v9 = vcombine.low %v220_v58, %v224_v59  ;;  %v161_v58 = vld [vmem:[#allocation2 + $0x70] sm:$0xff] }
  0x54   :  { %v215_v5 = vld [vmem:[#allocation2 + $0x220] sm:$0xff]  ;;  %v216_v7 = vld [vmem:[#allocation2 + $0x228] sm:$0xff]  ;;  %v265_v23 = vld [vmem:[#allocation2 + $0x3b0] sm:$0xff] }
  0x55   :  { %972 = vmatpush1.bf16.msra.mxu0 %v6228_v8  ;;  %1015 = vmatpush1.bf16.msra.mxu1 %v6230_v10  ;;  %v6300_v8 = vcombine.low %v219_v56, %v223_v57  ;;  %v6293_v10 = vcombine.high %v211_v4, %v215_v5  ;;  %v157_v57 = vld [vmem:[#allocation2 + $0x50] sm:$0xff] }
  0x56   :  { %973 = vmatprep.subr.bf16.mxu0 %v6349_v11  ;;  %1016 = vmatprep.subr.bf16.mxu1 %v6351_v13  ;;  %v6295_v11 = vcombine.high %v212_v6, %v216_v7  ;;  %v209_v13 = vld [vmem:[#allocation2 + $0x1f0] sm:$0xff] }
  0x57   :  { %v6288_v61 = vcombine.low %v205_v12, %v209_v13 }
  0x59   :  { %974 = vmatpush2.bf16.msra.mxu0 %v6348_v19  ;;  %1017 = vmatpush2.bf16.msra.mxu1 %v6350_v20  ;;  %v6292_v19 = vcombine.low %v211_v4, %v215_v5  ;;  %v6294_v20 = vcombine.low %v212_v6, %v216_v7  ;;  %v149_v5 = vld [vmem:[#allocation2 + $0x10] sm:$0xff] }
  0x5a   :  { %975 = vmatprep.subr.bf16.mxu0 %v6341_v21  ;;  %1018 = vmatprep.subr.bf16.mxu1 %v6343_v22  ;;  %v6289_v21 = vcombine.high %v205_v12, %v209_v13  ;;  %v6291_v22 = vcombine.high %v206_v16, %v210_v17  ;;  %v153_v6 = vld [vmem:[#allocation2 + $0x30] sm:$0xff]  ;;  %v6240_v12 = vcombine.low %v157_v57, %v161_v58  ;;  %v270_v17 = vld [vmem:[#allocation2 + $0x3d8] sm:$0xff] }
  0x5b   :  { %v269_v13 = vld [vmem:[#allocation2 + $0x3d0] sm:$0xff]  ;;  %v6233_v16 = vcombine.high %v149_v5, %v153_v6 }
  0x5d   :  { %976 = vmatpush2.bf16.msra.mxu0 %v6340_v27  ;;  %1019 = vmatpush2.bf16.msra.mxu1 %v6342_v28  ;;  %v202_v27 = vld [vmem:[#allocation2 + $0x1b8] sm:$0xff]  ;;  %v189_v28 = vld [vmem:[#allocation2 + $0x150] sm:$0xff] }
  0x5e   :  { %977 = vmatprep.subr.bf16.mxu0 %v6333_v29  ;;  %1020 = vmatprep.subr.bf16.mxu1 %v6335_v30  ;;  %v6283_v2 = vcombine.high %v198_v26, %v202_v27  ;;  %v193_v29 = vld [vmem:[#allocation2 + $0x170] sm:$0xff]  ;;  %v190_v30 = vld [vmem:[#allocation2 + $0x158] sm:$0xff]  ;;  %v6282_v33 = vcombine.low %v198_v26, %v202_v27  ;;  %v6353_v26 = vcombine.high %v269_v13, %v273_v14 }
  0x5f   :  { %v6273_v34 = vcombine.high %v189_v28, %v193_v29  ;;  %v6272_v40 = vcombine.low %v189_v28, %v193_v29  ;;  %v6274_v41 = vcombine.low %v190_v30, %v194_v31  ;;  %v262_v27 = vld [vmem:[#allocation2 + $0x398] sm:$0xff]  ;;  %v257_v28 = vld [vmem:[#allocation2 + $0x370] sm:$0xff] }
  0x61   :  { %978 = vmatpush2.bf16.msra.mxu0 %v6332_v35  ;;  %1021 = vmatpush2.bf16.msra.mxu1 %v6334_v36  ;;  %v6275_v35 = vcombine.high %v190_v30, %v194_v31  ;;  %v181_v36 = vld [vmem:[#allocation2 + $0x110] sm:$0xff]  ;;  %v254_v31 = vld [vmem:[#allocation2 + $0x358] sm:$0xff] }
  0x62   :  { %979 = vmatprep.subr.bf16.mxu0 %v6325_v37  ;;  %1022 = vmatprep.subr.bf16.mxu1 %v6327_v38  ;;  %v185_v37 = vld [vmem:[#allocation2 + $0x130] sm:$0xff]  ;;  %v182_v38 = vld [vmem:[#allocation2 + $0x118] sm:$0xff] }
  0x63   :  { %v6265_v42 = vcombine.high %v181_v36, %v185_v37  ;;  %v6264_v48 = vcombine.low %v181_v36, %v185_v37  ;;  %v6266_v50 = vcombine.low %v182_v38, %v186_v39  ;;  %v249_v36 = vld [vmem:[#allocation2 + $0x330] sm:$0xff] }
  0x65   :  { %980 = vmatpush2.bf16.msra.mxu0 %v6324_v43  ;;  %1023 = vmatpush2.bf16.msra.mxu1 %v6326_v44  ;;  %v6267_v43 = vcombine.high %v182_v38, %v186_v39  ;;  %v173_v44 = vld [vmem:[#allocation2 + $0xd0] sm:$0xff]  ;;  %v246_v39 = vld [vmem:[#allocation2 + $0x318] sm:$0xff] }
  0x66   :  { %981 = vmatprep.subr.bf16.mxu0 %v6317_v45  ;;  %1024 = vmatprep.subr.bf16.mxu1 %v6319_v46  ;;  %v177_v45 = vld [vmem:[#allocation2 + $0xf0] sm:$0xff]  ;;  %v174_v46 = vld [vmem:[#allocation2 + $0xd8] sm:$0xff] }
  0x67   :  { %v6257_v51 = vcombine.high %v173_v44, %v177_v45  ;;  %v6256_v56 = vcombine.low %v173_v44, %v177_v45  ;;  %v6258_v59 = vcombine.low %v174_v46, %v178_v47  ;;  %v241_v44 = vld [vmem:[#allocation2 + $0x2f0] sm:$0xff] }
  0x69   :  { %982 = vmatpush2.bf16.msra.mxu0 %v6316_v52  ;;  %1025 = vmatpush2.bf16.msra.mxu1 %v6318_v53  ;;  %v165_v52 = vld [vmem:[#allocation2 + $0x90] sm:$0xff] }
  0x6a   :  { %983 = vmatprep.subr.bf16.mxu0 %v6309_v54  ;;  %1026 = vmatprep.subr.bf16.mxu1 %v6311_v55  ;;  %v169_v53 = vld [vmem:[#allocation2 + $0xb0] sm:$0xff]  ;;  %v166_v54 = vld [vmem:[#allocation2 + $0x98] sm:$0xff] }
  0x6b   :  { %v170_v55 = vld [vmem:[#allocation2 + $0xb8] sm:$0xff]  ;;  %v6248_v4 = vcombine.low %v165_v52, %v169_v53 }
  0x6c   :  { %v6250_v7 = vcombine.low %v166_v54, %v170_v55 }
  0x6d   :  { %984 = vmatpush2.bf16.msra.mxu0 %v6308_v60  ;;  %1027 = vmatpush2.bf16.msra.mxu1 %v6310_v0  ;;  %v6249_v60 = vcombine.high %v165_v52, %v169_v53  ;;  %v158_v0 = vld [vmem:[#allocation2 + $0x58] sm:$0xff]  ;;  %v233_v52 = vld [vmem:[#allocation2 + $0x2b0] sm:$0xff] }
  0x6e   :  { %985 = vmatprep.subr.bf16.mxu0 %v6301_v1  ;;  %1028 = vmatprep.subr.bf16.mxu1 %v6303_v3  ;;  %v162_v1 = vld [vmem:[#allocation2 + $0x78] sm:$0xff]  ;;  %v6251_v3 = vcombine.high %v166_v54, %v170_v55 }
  0x6f   :  { %v6242_v15 = vcombine.low %v158_v0, %v162_v1  ;;  %v230_v55 = vld [vmem:[#allocation2 + $0x298] sm:$0xff] }
  0x71   :  { %986 = vmatpush2.bf16.msra.mxu0 %v6300_v8  ;;  %1029 = vmatpush2.bf16.msra.mxu1 %v6302_v9  ;;  %v6241_v8 = vcombine.high %v157_v57, %v161_v58  ;;  %v150_v9 = vld [vmem:[#allocation2 + $0x18] sm:$0xff] }
  0x72   :  { %987 = vmatprep.subr.bf16.mxu0 %v6293_v10  ;;  %1030 = vmatprep.subr.bf16.mxu1 %v6295_v11  ;;  %v154_v10 = vld [vmem:[#allocation2 + $0x38] sm:$0xff]  ;;  %v6243_v11 = vcombine.high %v158_v0, %v162_v1 }
  0x73   :  { %v6234_v24 = vcombine.low %v150_v9, %v154_v10 }
  0x75   :  { %988 = vmatpush2.bf16.msra.mxu0 %v6292_v19  ;;  %1031 = vmatpush2.bf16.msra.mxu1 %v6294_v20  ;;  %v274_v19 = vld [vmem:[#allocation2 + $0x3f8] sm:$0xff]  ;;  %v6235_v20 = vcombine.high %v150_v9, %v154_v10 }
  0x76   :  { %1043 = vmatprep.subr.bf16.mxu0 %v6289_v21  ;;  %1086 = vmatprep.subr.bf16.mxu1 %v6291_v22  ;;  %v6232_v21 = vcombine.low %v149_v5, %v153_v6  ;;  %v261_v22 = vld [vmem:[#allocation2 + $0x390] sm:$0xff]  ;;  %v6354_v29 = vcombine.low %v270_v17, %v274_v19 }
  0x77   :  { %v6345_v30 = vcombine.high %v261_v22, %v265_v23 }
  0x78   :  { %990 = vmatmul.mubr.bf16.vlgmr.msra.gmra.mxu0 %v7820_v25  ;;  %1033 = vmatmul.mubr.bf16.vlgmr.msra.gmra.mxu1 %v7820_v25 }
  0x79   :  { %1044 = vmatpush1.bf16.msra.mxu0 %v6288_v61  ;;  %1087 = vmatpush1.bf16.msra.mxu1 %v6290_v62  ;;  %v266_v61 = vld [vmem:[#allocation2 + $0x3b8] sm:$0xff]  ;;  %v6355_v62 = vcombine.high %v270_v17, %v274_v19  ;;  %v7028_v19 = vld [vmem:[#allocation4 + $0xe4] ss:$16 sps:$4 sm:$0xff]  }
  0x7a   :  { %1045 = vmatprep.subr.bf16.mxu0 %v6281_v63  ;;  %1088 = vmatprep.subr.bf16.mxu1 %v6283_v2  ;;  %v6352_v63 = vcombine.low %v269_v13, %v273_v14  ;;  %v253_v2 = vld [vmem:[#allocation2 + $0x350] sm:$0xff]  ;;  %v6346_v37 = vcombine.low %v262_v27, %v266_v61 }
  0x7b   :  { %1075 = vmatprep.mubr.bf16.mxu0 %v7812_v18  ;;  %1118 = vmatprep.mubr.bf16.mxu1 %v7812_v18  ;;  %v6259_v18 = vcombine.high %v174_v46, %v178_v47  ;;  %v6337_v38 = vcombine.high %v253_v2, %v257_v28  ;;  %v238_v47 = vld [vmem:[#allocation2 + $0x2d8] sm:$0xff] }
  0x7d   :  { %1046 = vmatpush1.bf16.msra.mxu0 %v6280_v32  ;;  %1089 = vmatpush1.bf16.msra.mxu1 %v6282_v33  ;;  %v258_v32 = vld [vmem:[#allocation2 + $0x378] sm:$0xff]  ;;  %v6347_v33 = vcombine.high %v262_v27, %v266_v61  ;;  %v7037_v27 = vld [vmem:[#allocation4 + $0x2c4] ss:$16 sps:$4 sm:$0xff]   ;;  %v7032_v61 = vld [vmem:[#allocation4 + $0xc0] ss:$16 sps:$4 sm:$0xff]  }
  0x7e   :  { %1047 = vmatprep.subr.bf16.mxu0 %v6273_v34  ;;  %1090 = vmatprep.subr.bf16.mxu1 %v6275_v35  ;;  %v6344_v34 = vcombine.low %v261_v22, %v265_v23  ;;  %v245_v35 = vld [vmem:[#allocation2 + $0x310] sm:$0xff]  ;;  %v6338_v45 = vcombine.low %v254_v31, %v258_v32 }
  0x7f   :  { %v6329_v46 = vcombine.high %v245_v35, %v249_v36  ;;  %v7026_v23 = vld [vmem:[#allocation4 + $0xe0] ss:$16 sps:$4 sm:$0xff]  }
  0x81   :  { %1048 = vmatpush1.bf16.msra.mxu0 %v6272_v40  ;;  %1091 = vmatpush1.bf16.msra.mxu1 %v6274_v41  ;;  %v250_v40 = vld [vmem:[#allocation2 + $0x338] sm:$0xff]  ;;  %v6339_v41 = vcombine.high %v254_v31, %v258_v32  ;;  %v7049_v31 = vld [vmem:[#allocation4 + $0x284] ss:$16 sps:$4 sm:$0xff]   ;;  %v7044_v32 = vld [vmem:[#allocation4 + $0x80] ss:$16 sps:$4 sm:$0xff]  }
  0x82   :  { %1049 = vmatprep.subr.bf16.mxu0 %v6265_v42  ;;  %1092 = vmatprep.subr.bf16.mxu1 %v6267_v43  ;;  %v6336_v42 = vcombine.low %v253_v2, %v257_v28  ;;  %v237_v43 = vld [vmem:[#allocation2 + $0x2d0] sm:$0xff]  ;;  %v6330_v53 = vcombine.low %v246_v39, %v250_v40 }
  0x83   :  { %v6321_v54 = vcombine.high %v237_v43, %v241_v44  ;;  %v6320_v58 = vcombine.low %v237_v43, %v241_v44  ;;  %v7043_v2 = vld [vmem:[#allocation4 + $0x2a4] ss:$16 sps:$4 sm:$0xff]   ;;  %v7038_v28 = vld [vmem:[#allocation4 + $0xa0] ss:$16 sps:$4 sm:$0xff]  }
  0x84   :  { %v7062_v43 = vld [vmem:[#allocation4 + $0x20] ss:$16 sps:$4 sm:$0xff]  }
  0x85   :  { %1050 = vmatpush1.bf16.msra.mxu0 %v6264_v48  ;;  %1093 = vmatpush1.bf16.msra.mxu1 %v6266_v50  ;;  %v242_v48 = vld [vmem:[#allocation2 + $0x2f8] sm:$0xff]  ;;  %v6331_v50 = vcombine.high %v246_v39, %v250_v40  ;;  %v7056_v39 = vld [vmem:[#allocation4 + $0x40] ss:$16 sps:$4 sm:$0xff]  }
  0x86   :  { %1051 = vmatprep.subr.bf16.mxu0 %v6257_v51  ;;  %1094 = vmatprep.subr.bf16.mxu1 %v6259_v18  ;;  %v6328_v51 = vcombine.low %v245_v35, %v249_v36  ;;  %v229_v18 = vld [vmem:[#allocation2 + $0x290] sm:$0xff]  ;;  %v6323_v57 = vcombine.high %v238_v47, %v242_v48  ;;  %v6322_v0 = vcombine.low %v238_v47, %v242_v48 }
  0x87   :  { %v6313_v1 = vcombine.high %v229_v18, %v233_v52  ;;  %v6312_v6 = vcombine.low %v229_v18, %v233_v52  ;;  %v7055_v35 = vld [vmem:[#allocation4 + $0x264] ss:$16 sps:$4 sm:$0xff]   ;;  %v7053_v36 = vld [vmem:[#allocation4 + $0x260] ss:$16 sps:$4 sm:$0xff]  }
  0x88   :  { %v7059_v40 = vld [vmem:[#allocation4 + $0x240] ss:$16 sps:$4 sm:$0xff]  }
  0x89   :  { %1052 = vmatpush1.bf16.msra.mxu0 %v6256_v56  ;;  %1095 = vmatpush1.bf16.msra.mxu1 %v6258_v59  ;;  %v234_v56 = vld [vmem:[#allocation2 + $0x2b8] sm:$0xff]  ;;  %v221_v59 = vld [vmem:[#allocation2 + $0x250] sm:$0xff] }
  0x8a   :  { %1053 = vmatprep.subr.bf16.mxu0 %v6249_v60  ;;  %1096 = vmatprep.subr.bf16.mxu1 %v6251_v3  ;;  %v225_v60 = vld [vmem:[#allocation2 + $0x270] sm:$0xff]  ;;  %v222_v3 = vld [vmem:[#allocation2 + $0x258] sm:$0xff]  ;;  %v6315_v5 = vcombine.high %v230_v55, %v234_v56  ;;  %v6314_v9 = vcombine.low %v230_v55, %v234_v56 }
  0x8b   :  { %v6305_v10 = vcombine.high %v221_v59, %v225_v60  ;;  %v6304_v14 = vcombine.low %v221_v59, %v225_v60  ;;  %v7065_v44 = vld [vmem:[#allocation4 + $0x220] ss:$16 sps:$4 sm:$0xff]  }
  0x8c   :  { %v7068_v47 = vld [vmem:[#allocation4] ss:$16 sps:$4 sm:$0xff]  }
  0x8d   :  { %1054 = vmatpush1.bf16.msra.mxu0 %v6248_v4  ;;  %1097 = vmatpush1.bf16.msra.mxu1 %v6250_v7  ;;  %v226_v4 = vld [vmem:[#allocation2 + $0x278] sm:$0xff]  ;;  %v213_v7 = vld [vmem:[#allocation2 + $0x210] sm:$0xff] }
  0x8e   :  { %1055 = vmatprep.subr.bf16.mxu0 %v6241_v8  ;;  %1098 = vmatprep.subr.bf16.mxu1 %v6243_v11  ;;  %v217_v8 = vld [vmem:[#allocation2 + $0x230] sm:$0xff]  ;;  %v214_v11 = vld [vmem:[#allocation2 + $0x218] sm:$0xff]  ;;  %v6307_v13 = vcombine.high %v222_v3, %v226_v4 }
  0x8f   :  { %v7071_v48 = vld [vmem:[#allocation4 + $0x200] ss:$16 sps:$4 sm:$0xff]  }
  0x90   :  { %v7074_v18 = vld [vmem:[#allocation4 + $0x1e0] ss:$16 sps:$4 sm:$0xff]  }
  0x91   :  { %1056 = vmatpush1.bf16.msra.mxu0 %v6240_v12  ;;  %1099 = vmatpush1.bf16.msra.mxu1 %v6242_v15  ;;  %v218_v12 = vld [vmem:[#allocation2 + $0x238] sm:$0xff]  ;;  %v6306_v15 = vcombine.low %v222_v3, %v226_v4  ;;  %v7077_v52 = vld [vmem:[#allocation4 + $0x3e0] ss:$16 sps:$4 sm:$0xff]  }
  0x92   :  { %1057 = vmatprep.subr.bf16.mxu0 %v6233_v16  ;;  %1100 = vmatprep.subr.bf16.mxu1 %v6235_v20  ;;  %v6297_v16 = vcombine.high %v213_v7, %v217_v8  ;;  %v6299_v17 = vcombine.high %v214_v11, %v218_v12  ;;  %v6296_v20 = vcombine.low %v213_v7, %v217_v8  ;;  %v7080_v55 = vld [vmem:[#allocation4 + $0x1c0] ss:$16 sps:$4 sm:$0xff]  }
  0x93   :  { %v6298_v22 = vcombine.low %v214_v11, %v218_v12  ;;  %v7083_v56 = vld [vmem:[#allocation4 + $0x3c0] ss:$16 sps:$4 sm:$0xff]  }
  0x94   :  { %v7086_v59 = vld [vmem:[#allocation4 + $0x1a0] ss:$16 sps:$4 sm:$0xff]  }
  0x95   :  { %1058 = vmatpush1.bf16.msra.mxu0 %v6232_v21  ;;  %1101 = vmatpush1.bf16.msra.mxu1 %v6234_v24  ;;  %v7031_v21 = vld [vmem:[#allocation4 + $0x2e4] ss:$16 sps:$4 sm:$0xff]   ;;  %v7029_v24 = vld [vmem:[#allocation4 + $0x2e0] ss:$16 sps:$4 sm:$0xff]  }
  0x96   :  { %1059 = vmatprep.subr.bf16.mxu0 %v6353_v26  ;;  %1102 = vmatprep.subr.bf16.mxu1 %v6355_v62  ;;  %v7034_v26 = vld [vmem:[#allocation4 + $0xc4] ss:$16 sps:$4 sm:$0xff]   ;;  %v7035_v62 = vld [vmem:[#allocation4 + $0x2c0] ss:$16 sps:$4 sm:$0xff]  }
  0x97   :  { %v7089_v60 = vld [vmem:[#allocation4 + $0x3a0] ss:$16 sps:$4 sm:$0xff]  }
  0x98   :  { %v7092_v3 = vld [vmem:[#allocation4 + $0x180] ss:$16 sps:$4 sm:$0xff]  }
  0x99   :  { %1060 = vmatpush2.bf16.msra.mxu0 %v6352_v63  ;;  %1103 = vmatpush2.bf16.msra.mxu1 %v6354_v29  ;;  %v7040_v63 = vld [vmem:[#allocation4 + $0xa4] ss:$16 sps:$4 sm:$0xff]   ;;  %v7041_v29 = vld [vmem:[#allocation4 + $0x2a0] ss:$16 sps:$4 sm:$0xff]  }
  0x9a   :  { %1061 = vmatprep.subr.bf16.mxu0 %v6345_v30  ;;  %1104 = vmatprep.subr.bf16.mxu1 %v6347_v33  ;;  %v7046_v30 = vld [vmem:[#allocation4 + $0x84] ss:$16 sps:$4 sm:$0xff]   ;;  %v7047_v33 = vld [vmem:[#allocation4 + $0x280] ss:$16 sps:$4 sm:$0xff]  }
  0x9b   :  { %v7095_v4 = vld [vmem:[#allocation4 + $0x380] ss:$16 sps:$4 sm:$0xff]  }
  0x9c   :  { %v7098_v7 = vld [vmem:[#allocation4 + $0x160] ss:$16 sps:$4 sm:$0xff]  }
  0x9d   :  { %1062 = vmatpush2.bf16.msra.mxu0 %v6344_v34  ;;  %1105 = vmatpush2.bf16.msra.mxu1 %v6346_v37  ;;  %v7052_v34 = vld [vmem:[#allocation4 + $0x64] ss:$16 sps:$4 sm:$0xff]   ;;  %v7101_v8 = vld [vmem:[#allocation4 + $0x360] ss:$16 sps:$4 sm:$0xff]  }
  0x9e   :  { %1063 = vmatprep.subr.bf16.mxu0 %v6337_v38  ;;  %1106 = vmatprep.subr.bf16.mxu1 %v6339_v41  ;;  %v7058_v37 = vld [vmem:[#allocation4 + $0x44] ss:$16 sps:$4 sm:$0xff]   ;;  %v7104_v11 = vld [vmem:[#allocation4 + $0x140] ss:$16 sps:$4 sm:$0xff]  }
  0x9f   :  { %v7061_v38 = vld [vmem:[#allocation4 + $0x244] ss:$16 sps:$4 sm:$0xff]   ;;  %v7107_v12 = vld [vmem:[#allocation4 + $0x340] ss:$16 sps:$4 sm:$0xff]  }
  0xa0   :  { %v7064_v41 = vld [vmem:[#allocation4 + $0x24] ss:$16 sps:$4 sm:$0xff]  }
  0xa1   :  { %1064 = vmatpush2.bf16.msra.mxu0 %v6336_v42  ;;  %1107 = vmatpush2.bf16.msra.mxu1 %v6338_v45  ;;  %v7067_v42 = vld [vmem:[#allocation4 + $0x224] ss:$16 sps:$4 sm:$0xff]  }
  0xa2   :  { %1065 = vmatprep.subr.bf16.mxu0 %v6329_v46  ;;  %1108 = vmatprep.subr.bf16.mxu1 %v6331_v50  ;;  %v7070_v45 = vld [vmem:[#allocation4 + $0x4] ss:$16 sps:$4 sm:$0xff]  }
  0xa3   :  { %v7073_v46 = vld [vmem:[#allocation4 + $0x204] ss:$16 sps:$4 sm:$0xff]  }
  0xa4   :  { %v7076_v50 = vld [vmem:[#allocation4 + $0x1e4] ss:$16 sps:$4 sm:$0xff]  }
  0xa5   :  { %1066 = vmatpush2.bf16.msra.mxu0 %v6328_v51  ;;  %1109 = vmatpush2.bf16.msra.mxu1 %v6330_v53  ;;  %v7079_v51 = vld [vmem:[#allocation4 + $0x3e4] ss:$16 sps:$4 sm:$0xff]  }
  0xa6   :  { %1067 = vmatprep.subr.bf16.mxu0 %v6321_v54  ;;  %1110 = vmatprep.subr.bf16.mxu1 %v6323_v57  ;;  %v7082_v53 = vld [vmem:[#allocation4 + $0x1c4] ss:$16 sps:$4 sm:$0xff]  }
  0xa7   :  { %v7085_v54 = vld [vmem:[#allocation4 + $0x3c4] ss:$16 sps:$4 sm:$0xff]  }
  0xa8   :  { %v7088_v57 = vld [vmem:[#allocation4 + $0x1a4] ss:$16 sps:$4 sm:$0xff]  }
  0xa9   :  { %1068 = vmatpush2.bf16.msra.mxu0 %v6320_v58  ;;  %1111 = vmatpush2.bf16.msra.mxu1 %v6322_v0  ;;  %v7091_v58 = vld [vmem:[#allocation4 + $0x3a4] ss:$16 sps:$4 sm:$0xff]  }
  0xaa   :  { %1069 = vmatprep.subr.bf16.mxu0 %v6313_v1  ;;  %1112 = vmatprep.subr.bf16.mxu1 %v6315_v5  ;;  %v7094_v0 = vld [vmem:[#allocation4 + $0x184] ss:$16 sps:$4 sm:$0xff]  }
  0xab   :  { %v7097_v1 = vld [vmem:[#allocation4 + $0x384] ss:$16 sps:$4 sm:$0xff]  }
  0xac   :  { %v7100_v5 = vld [vmem:[#allocation4 + $0x164] ss:$16 sps:$4 sm:$0xff]  }
  0xad   :  { %1070 = vmatpush2.bf16.msra.mxu0 %v6312_v6  ;;  %1113 = vmatpush2.bf16.msra.mxu1 %v6314_v9  ;;  %v7103_v6 = vld [vmem:[#allocation4 + $0x364] ss:$16 sps:$4 sm:$0xff]  }
  0xae   :  { %1071 = vmatprep.subr.bf16.mxu0 %v6305_v10  ;;  %1114 = vmatprep.subr.bf16.mxu1 %v6307_v13  ;;  %v7106_v9 = vld [vmem:[#allocation4 + $0x144] ss:$16 sps:$4 sm:$0xff]  }
  0xaf   :  { %v7109_v10 = vld [vmem:[#allocation4 + $0x344] ss:$16 sps:$4 sm:$0xff]  }
  0xb0   :  { %v7112_v13 = vld [vmem:[#allocation4 + $0x124] ss:$16 sps:$4 sm:$0xff]  }
  0xb1   :  { %1072 = vmatpush2.bf16.msra.mxu0 %v6304_v14  ;;  %1115 = vmatpush2.bf16.msra.mxu1 %v6306_v15  ;;  %v7115_v14 = vld [vmem:[#allocation4 + $0x324] ss:$16 sps:$4 sm:$0xff]   ;;  %v7110_v15 = vld [vmem:[#allocation4 + $0x120] ss:$16 sps:$4 sm:$0xff]  }
  0xb2   :  { %1073 = vmatprep.subr.bf16.mxu0 %v6297_v16  ;;  %1116 = vmatprep.subr.bf16.mxu1 %v6299_v17  ;;  %v7113_v16 = vld [vmem:[#allocation4 + $0x320] ss:$16 sps:$4 sm:$0xff]   ;;  %v7118_v17 = vld [vmem:[#allocation4 + $0x104] ss:$16 sps:$4 sm:$0xff]  }
  0xb5   :  { %1074 = vmatpush2.bf16.msra.mxu0 %v6296_v20  ;;  %1117 = vmatpush2.bf16.msra.mxu1 %v6298_v22  ;;  %v7116_v20 = vld [vmem:[#allocation4 + $0x100] ss:$16 sps:$4 sm:$0xff]   ;;  %v7124_v22 = vld [vmem:[#allocation4 + $0x4e4] ss:$16 sps:$4 sm:$0xff]  }
  0xb6   :  { %2711 = vmatprep.subr.bf16.mxu0 %v7028_v19  ;;  %2754 = vmatprep.subr.bf16.mxu1 %v7031_v21  ;;  %v7121_v19 = vld [vmem:[#allocation4 + $0x304] ss:$16 sps:$4 sm:$0xff]   ;;  %v7119_v21 = vld [vmem:[#allocation4 + $0x300] ss:$16 sps:$4 sm:$0xff]  }
  0xb8   :  { %1076 = vmatmul.mubr.bf16.vlgmr.msra.gmra.mxu0 %v7820_v25  ;;  %1119 = vmatmul.mubr.bf16.vlgmr.msra.gmra.mxu1 %v7820_v25  ;;  %v7050_v25 = vld [vmem:[#allocation4 + $0x60] ss:$16 sps:$4 sm:$0xff]  }
  0xb9   :  { %2712 = vmatpush1.bf16.msra.mxu0 %v7026_v23  ;;  %2755 = vmatpush1.bf16.msra.mxu1 %v7029_v24  ;;  %v7127_v23 = vld [vmem:[#allocation4 + $0x6e4] ss:$16 sps:$4 sm:$0xff]   ;;  %v7829_v24 = vsub.s32 1, %v7786_v49 }
  0xba   :  { %2713 = vmatprep.subr.bf16.mxu0 %v7034_v26  ;;  %2756 = vmatprep.subr.bf16.mxu1 %v7037_v27  ;;  %v7832_v26 = vsub.s32 0, %v7786_v49  ;;  %v7835_v27 = vsub.s32 3, %v7786_v49 }
  0xbd   :  { %2714 = vmatpush1.bf16.msra.mxu0 %v7032_v61  ;;  %2757 = vmatpush1.bf16.msra.mxu1 %v7035_v62  ;;  %v7840_v61 = vld [vmem:[%s8004_s2] sm:$0xff]  ;;  %v7843_v62 = vsub.s32 2, %v7786_v49 }
  0xbe   :  { %2715 = vmatprep.subr.bf16.mxu0 %v7040_v63  ;;  %2758 = vmatprep.subr.bf16.mxu1 %v7043_v2 }
  0xc1   :  { %2716 = vmatpush1.bf16.msra.mxu0 %v7038_v28  ;;  %2759 = vmatpush1.bf16.msra.mxu1 %v7041_v29  ;;  %v284_v28 = vrot.slane %v7840_v61, %v7829_v24  ;;  %v280_v29 = vrot.slane %v7840_v61, %v7832_v26 }
  0xc2   :  { %2717 = vmatprep.subr.bf16.mxu0 %v7046_v30  ;;  %2760 = vmatprep.subr.bf16.mxu1 %v7049_v31  ;;  %v292_v31 = vrot.slane %v7840_v61, %v7835_v27 }
  0xc5   :  { %2718 = vmatpush1.bf16.msra.mxu0 %v7044_v32  ;;  %2761 = vmatpush1.bf16.msra.mxu1 %v7047_v33  ;;  %v288_v32 = vrot.slane %v7840_v61, %v7843_v62 }
  0xc6   :  { %2719 = vmatprep.subr.bf16.mxu0 %v7052_v34  ;;  %2762 = vmatprep.subr.bf16.mxu1 %v7055_v35 }
  0xc9   :  { %2720 = vmatpush1.bf16.msra.mxu0 %v7050_v25  ;;  %2763 = vmatpush1.bf16.msra.mxu1 %v7053_v36 }
  0xca   :  { %2721 = vmatprep.subr.bf16.mxu0 %v7058_v37  ;;  %2764 = vmatprep.subr.bf16.mxu1 %v7061_v38 }
  0xcd   :  { %2722 = vmatpush1.bf16.msra.mxu0 %v7056_v39  ;;  %2765 = vmatpush1.bf16.msra.mxu1 %v7059_v40 }
  0xce   :  { %2723 = vmatprep.subr.bf16.mxu0 %v7064_v41  ;;  %2766 = vmatprep.subr.bf16.mxu1 %v7067_v42 }
  0xd1   :  { %2724 = vmatpush1.bf16.msra.mxu0 %v7062_v43  ;;  %2767 = vmatpush1.bf16.msra.mxu1 %v7065_v44 }
  0xd2   :  { %2725 = vmatprep.subr.bf16.mxu0 %v7070_v45  ;;  %2768 = vmatprep.subr.bf16.mxu1 %v7073_v46 }
  0xd5   :  { %2726 = vmatpush1.bf16.msra.mxu0 %v7068_v47  ;;  %2769 = vmatpush1.bf16.msra.mxu1 %v7071_v48 }
  0xd6   :  { %2727 = vmatprep.subr.bf16.mxu0 %v7076_v50  ;;  %2770 = vmatprep.subr.bf16.mxu1 %v7079_v51 }
  0xd9   :  { %2728 = vmatpush2.bf16.msra.mxu0 %v7074_v18  ;;  %2771 = vmatpush2.bf16.msra.mxu1 %v7077_v52 }
  0xda   :  { %2729 = vmatprep.subr.bf16.mxu0 %v7082_v53  ;;  %2772 = vmatprep.subr.bf16.mxu1 %v7085_v54  ;;  %v7122_v54 = vld [vmem:[#allocation4 + $0x4e0] ss:$16 sps:$4 sm:$0xff]  }
  0xdd   :  { %2730 = vmatpush2.bf16.msra.mxu0 %v7080_v55  ;;  %2773 = vmatpush2.bf16.msra.mxu1 %v7083_v56 }
  0xde   :  { %2731 = vmatprep.subr.bf16.mxu0 %v7088_v57  ;;  %2774 = vmatprep.subr.bf16.mxu1 %v7091_v58  ;;  %v7125_v57 = vld [vmem:[#allocation4 + $0x6e0] ss:$16 sps:$4 sm:$0xff]   ;;  %v7130_v58 = vld [vmem:[#allocation4 + $0x4c4] ss:$16 sps:$4 sm:$0xff]  }
  0xe1   :  { %2732 = vmatpush2.bf16.msra.mxu0 %v7086_v59  ;;  %2775 = vmatpush2.bf16.msra.mxu1 %v7089_v60  ;;  %v7133_v60 = vld [vmem:[#allocation4 + $0x6c4] ss:$16 sps:$4 sm:$0xff]  }
  0xe2   :  { %2733 = vmatprep.subr.bf16.mxu0 %v7094_v0  ;;  %2776 = vmatprep.subr.bf16.mxu1 %v7097_v1  ;;  %v7128_v0 = vld [vmem:[#allocation4 + $0x4c0] ss:$16 sps:$4 sm:$0xff]  }
  0xe3   :  { %v7131_v1 = vld [vmem:[#allocation4 + $0x6c0] ss:$16 sps:$4 sm:$0xff]  }
  0xe5   :  { %2734 = vmatpush2.bf16.msra.mxu0 %v7092_v3  ;;  %2777 = vmatpush2.bf16.msra.mxu1 %v7095_v4  ;;  %v7136_v3 = vld [vmem:[#allocation4 + $0x4a4] ss:$16 sps:$4 sm:$0xff]  }
  0xe6   :  { %2735 = vmatprep.subr.bf16.mxu0 %v7100_v5  ;;  %2778 = vmatprep.subr.bf16.mxu1 %v7103_v6  ;;  %v7139_v4 = vld [vmem:[#allocation4 + $0x6a4] ss:$16 sps:$4 sm:$0xff]   ;;  %v7134_v5 = vld [vmem:[#allocation4 + $0x4a0] ss:$16 sps:$4 sm:$0xff]  }
  0xe7   :  { %v7137_v6 = vld [vmem:[#allocation4 + $0x6a0] ss:$16 sps:$4 sm:$0xff]  }
  0xe9   :  { %2736 = vmatpush2.bf16.msra.mxu0 %v7098_v7  ;;  %2779 = vmatpush2.bf16.msra.mxu1 %v7101_v8  ;;  %v7142_v7 = vld [vmem:[#allocation4 + $0x484] ss:$16 sps:$4 sm:$0xff]  }
  0xea   :  { %2737 = vmatprep.subr.bf16.mxu0 %v7106_v9  ;;  %2780 = vmatprep.subr.bf16.mxu1 %v7109_v10  ;;  %v7145_v8 = vld [vmem:[#allocation4 + $0x684] ss:$16 sps:$4 sm:$0xff]   ;;  %v7140_v9 = vld [vmem:[#allocation4 + $0x480] ss:$16 sps:$4 sm:$0xff]  }
  0xeb   :  { %v7143_v10 = vld [vmem:[#allocation4 + $0x680] ss:$16 sps:$4 sm:$0xff]  }
  0xed   :  { %2738 = vmatpush2.bf16.msra.mxu0 %v7104_v11  ;;  %2781 = vmatpush2.bf16.msra.mxu1 %v7107_v12  ;;  %v7148_v11 = vld [vmem:[#allocation4 + $0x464] ss:$16 sps:$4 sm:$0xff]  }
  0xee   :  { %2739 = vmatprep.subr.bf16.mxu0 %v7112_v13  ;;  %2782 = vmatprep.subr.bf16.mxu1 %v7115_v14  ;;  %v7151_v12 = vld [vmem:[#allocation4 + $0x664] ss:$16 sps:$4 sm:$0xff]   ;;  %v7146_v13 = vld [vmem:[#allocation4 + $0x460] ss:$16 sps:$4 sm:$0xff]  }
  0xef   :  { %v7149_v14 = vld [vmem:[#allocation4 + $0x660] ss:$16 sps:$4 sm:$0xff]  }
  0xf1   :  { %2740 = vmatpush2.bf16.msra.mxu0 %v7110_v15  ;;  %2783 = vmatpush2.bf16.msra.mxu1 %v7113_v16  ;;  %v7154_v15 = vld [vmem:[#allocation4 + $0x444] ss:$16 sps:$4 sm:$0xff]  }
  0xf2   :  { %2741 = vmatprep.subr.bf16.mxu0 %v7118_v17  ;;  %2784 = vmatprep.subr.bf16.mxu1 %v7121_v19  ;;  %v7157_v16 = vld [vmem:[#allocation4 + $0x644] ss:$16 sps:$4 sm:$0xff]   ;;  %v7152_v17 = vld [vmem:[#allocation4 + $0x440] ss:$16 sps:$4 sm:$0xff]  }
  0xf3   :  { %v7155_v19 = vld [vmem:[#allocation4 + $0x640] ss:$16 sps:$4 sm:$0xff]  }
  0xf5   :  { %2742 = vmatpush2.bf16.msra.mxu0 %v7116_v20  ;;  %2785 = vmatpush2.bf16.msra.mxu1 %v7119_v21  ;;  %v7160_v20 = vld [vmem:[#allocation4 + $0x424] ss:$16 sps:$4 sm:$0xff]  }
  0xf6   :  { %2797 = vmatprep.subr.bf16.mxu0 %v7124_v22  ;;  %2840 = vmatprep.subr.bf16.mxu1 %v7127_v23  ;;  %v7163_v21 = vld [vmem:[#allocation4 + $0x624] ss:$16 sps:$4 sm:$0xff]   ;;  %v7158_v22 = vld [vmem:[#allocation4 + $0x420] ss:$16 sps:$4 sm:$0xff]  }
  0xf7   :  { %v7161_v23 = vld [vmem:[#allocation4 + $0x620] ss:$16 sps:$4 sm:$0xff]  }
 0x138   :  { %v991_v63 = vpop.f32.mrf.mxu0  ;;  %v1034_v2 = vpop.f32.mrf.mxu1 }
 0x139   :  { %v992_v37 = vadd.f32 %v991_v63, %v280_v29  ;;  %v1035_v41 = vadd.f32 %v1034_v2, %v288_v32  ;;  %v7166_v63 = vld [vmem:[#allocation4 + $0x404] ss:$16 sps:$4 sm:$0xff]  }
 0x13a   :  { %v993_v30 = vpop.f32.mrf.mxu0  ;;  %v1036_v33 = vpop.f32.mrf.mxu1  ;;  %v7169_v2 = vld [vmem:[#allocation4 + $0x604] ss:$16 sps:$4 sm:$0xff]  }
 0x13b   :  { %v994_v35 = vadd.f32 %v993_v30, %v284_v28  ;;  %v1037_v38 = vadd.f32 %v1036_v33, %v292_v31  ;;  %v1129_v50 = vmax.f32 %v992_v37, 0.0  ;;  %v1131_v52 = vmax.f32 %v1035_v41, 0.0  ;;  %v7172_v30 = vld [vmem:[#allocation4 + $0x5e4] ss:$16 sps:$4 sm:$0xff]   ;;  %v7173_v33 = vld [vmem:[#allocation4 + $0x7e0] ss:$16 sps:$4 sm:$0xff]  }
 0x13c   :  { %v995_v34 = vpop.f32.mrf.mxu0  ;;  %v1038_v36 = vpop.f32.mrf.mxu1  ;;  %v7184_v37 = vld [vmem:[#allocation4 + $0x5a4] ss:$16 sps:$4 sm:$0xff]  }
 0x13d   :  { %v996_v25 = vadd.f32 %v995_v34, %v280_v29  ;;  %v1039_v39 = vadd.f32 %v1038_v36, %v288_v32  ;;  %v1130_v46 = vmax.f32 %v994_v35, 0.0  ;;  %v1132_v51 = vmax.f32 %v1037_v38, 0.0  ;;  %v7167_v29 = vld [vmem:[#allocation4 + $0x600] ss:$16 sps:$4 sm:$0xff]   ;;  %v7178_v34 = vld [vmem:[#allocation4 + $0x5c4] ss:$16 sps:$4 sm:$0xff]  }
 0x13e   :  { %v997_v40 = vpop.f32.mrf.mxu0  ;;  %v1040_v43 = vpop.f32.mrf.mxu1  ;;  %v7170_v32 = vld [vmem:[#allocation4 + $0x5e0] ss:$16 sps:$4 sm:$0xff]   ;;  %v7181_v35 = vld [vmem:[#allocation4 + $0x7c4] ss:$16 sps:$4 sm:$0xff]  }
 0x13f   :  { %v998_v42 = vadd.f32 %v997_v40, %v284_v28  ;;  %v1137_v44 = vmax.f32 %v996_v25, 0.0  ;;  %v1041_v45 = vadd.f32 %v1040_v43, %v292_v31  ;;  %v1139_v47 = vmax.f32 %v1039_v39, 0.0  ;;  %v7164_v28 = vld [vmem:[#allocation4 + $0x400] ss:$16 sps:$4 sm:$0xff]   ;;  %v7175_v31 = vld [vmem:[#allocation4 + $0x7e4] ss:$16 sps:$4 sm:$0xff]  }
 0x140   :  { %v7176_v25 = vld [vmem:[#allocation4 + $0x5c0] ss:$16 sps:$4 sm:$0xff]   ;;  %v7187_v38 = vld [vmem:[#allocation4 + $0x7a4] ss:$16 sps:$4 sm:$0xff]  }
 0x141   :  { %v1138_v48 = vmax.f32 %v998_v42, 0.0  ;;  %v1140_v18 = vmax.f32 %v1041_v45, 0.0  ;;  %v7855_v55 = vpack.c.bf16 %v1137_v44, %v1129_v50  ;;  %v7859_v59 = vpack.c.bf16 %v1139_v47, %v1131_v52  ;;  %v7179_v36 = vld [vmem:[#allocation4 + $0x7c0] ss:$16 sps:$4 sm:$0xff]   ;;  %v7190_v41 = vld [vmem:[#allocation4 + $0x584] ss:$16 sps:$4 sm:$0xff]  }
 0x142   :  { %v7182_v39 = vld [vmem:[#allocation4 + $0x5a0] ss:$16 sps:$4 sm:$0xff]   ;;  %v7193_v42 = vld [vmem:[#allocation4 + $0x784] ss:$16 sps:$4 sm:$0xff]   ;;  %v295_v52 = vsub.s32 4, %v7786_v49 }
 0x143   :  { %v7853_v53 = vpack.c.bf16 %v1138_v48, %v1130_v46  ;;  %v7857_v56 = vpack.c.bf16 %v1140_v18, %v1132_v51  ;;  %v7185_v40 = vld [vmem:[#allocation4 + $0x7a0] ss:$16 sps:$4 sm:$0xff]   ;;  %v7196_v45 = vld [vmem:[#allocation4 + $0x564] ss:$16 sps:$4 sm:$0xff]   ;;  %v299_v18 = vsub.s32 5, %v7786_v49 }
 0x144   :  { %v7188_v43 = vld [vmem:[#allocation4 + $0x580] ss:$16 sps:$4 sm:$0xff]   ;;  %v7199_v46 = vld [vmem:[#allocation4 + $0x764] ss:$16 sps:$4 sm:$0xff]  }
 0x145   :  { %2743 = vmatprep.mubr.bf16.mxu0 %v7853_v53  ;;  %2786 = vmatprep.mubr.bf16.mxu1 %v7857_v56  ;;  %v7191_v44 = vld [vmem:[#allocation4 + $0x780] ss:$16 sps:$4 sm:$0xff]   ;;  %v7202_v50 = vld [vmem:[#allocation4 + $0x544] ss:$16 sps:$4 sm:$0xff]  }
 0x146   :  { %2744 = vmatmul.mubr.bf16.vlgmr.msra.gmra.mxu0 %v7855_v55  ;;  %2787 = vmatmul.mubr.bf16.vlgmr.msra.gmra.mxu1 %v7859_v59  ;;  %v7194_v47 = vld [vmem:[#allocation4 + $0x560] ss:$16 sps:$4 sm:$0xff]   ;;  %v7205_v51 = vld [vmem:[#allocation4 + $0x744] ss:$16 sps:$4 sm:$0xff]  }
 0x147   :  { %2798 = vmatpush1.bf16.msra.mxu0 %v7122_v54  ;;  %2841 = vmatpush1.bf16.msra.mxu1 %v7125_v57  ;;  %v7197_v48 = vld [vmem:[#allocation4 + $0x760] ss:$16 sps:$4 sm:$0xff]   ;;  %v307_v54 = vsub.s32 7, %v7786_v49  ;;  %v303_v57 = vsub.s32 6, %v7786_v49 }
 0x148   :  { %2799 = vmatprep.subr.bf16.mxu0 %v7130_v58  ;;  %2842 = vmatprep.subr.bf16.mxu1 %v7133_v60  ;;  %v7200_v58 = vld [vmem:[#allocation4 + $0x540] ss:$16 sps:$4 sm:$0xff]  }
 0x14b   :  { %2800 = vmatpush1.bf16.msra.mxu0 %v7128_v0  ;;  %2843 = vmatpush1.bf16.msra.mxu1 %v7131_v1  ;;  %v7203_v0 = vld [vmem:[#allocation4 + $0x740] ss:$16 sps:$4 sm:$0xff]   ;;  %v7208_v1 = vld [vmem:[#allocation4 + $0x524] ss:$16 sps:$4 sm:$0xff]  }
 0x14c   :  { %2801 = vmatprep.subr.bf16.mxu0 %v7136_v3  ;;  %2844 = vmatprep.subr.bf16.mxu1 %v7139_v4  ;;  %v300_v4 = vrot.slane %v7840_v61, %v299_v18 }
 0x14f   :  { %2802 = vmatpush1.bf16.msra.mxu0 %v7134_v5  ;;  %2845 = vmatpush1.bf16.msra.mxu1 %v7137_v6  ;;  %v7211_v5 = vld [vmem:[#allocation4 + $0x724] ss:$16 sps:$4 sm:$0xff]   ;;  %v296_v6 = vrot.slane %v7840_v61, %v295_v52 }
 0x150   :  { %2803 = vmatprep.subr.bf16.mxu0 %v7142_v7  ;;  %2846 = vmatprep.subr.bf16.mxu1 %v7145_v8  ;;  %v308_v8 = vrot.slane %v7840_v61, %v307_v54 }
 0x153   :  { %2804 = vmatpush1.bf16.msra.mxu0 %v7140_v9  ;;  %2847 = vmatpush1.bf16.msra.mxu1 %v7143_v10  ;;  %v304_v9 = vrot.slane %v7840_v61, %v303_v57 }
 0x154   :  { %2805 = vmatprep.subr.bf16.mxu0 %v7148_v11  ;;  %2848 = vmatprep.subr.bf16.mxu1 %v7151_v12  ;;  %v7206_v11 = vld [vmem:[#allocation4 + $0x520] ss:$16 sps:$4 sm:$0xff]  }
 0x157   :  { %2806 = vmatpush1.bf16.msra.mxu0 %v7146_v13  ;;  %2849 = vmatpush1.bf16.msra.mxu1 %v7149_v14  ;;  %v7209_v13 = vld [vmem:[#allocation4 + $0x720] ss:$16 sps:$4 sm:$0xff]   ;;  %v7214_v14 = vld [vmem:[#allocation4 + $0x504] ss:$16 sps:$4 sm:$0xff]  }
 0x158   :  { %2807 = vmatprep.subr.bf16.mxu0 %v7154_v15  ;;  %2850 = vmatprep.subr.bf16.mxu1 %v7157_v16 }
 0x15b   :  { %2808 = vmatpush1.bf16.msra.mxu0 %v7152_v17  ;;  %2851 = vmatpush1.bf16.msra.mxu1 %v7155_v19  ;;  %v7217_v19 = vld [vmem:[#allocation4 + $0x704] ss:$16 sps:$4 sm:$0xff]  }
 0x15c   :  { %2809 = vmatprep.subr.bf16.mxu0 %v7160_v20  ;;  %2852 = vmatprep.subr.bf16.mxu1 %v7163_v21 }
 0x15f   :  { %2810 = vmatpush1.bf16.msra.mxu0 %v7158_v22  ;;  %2853 = vmatpush1.bf16.msra.mxu1 %v7161_v23 }
 0x160   :  { %2811 = vmatprep.subr.bf16.mxu0 %v7166_v63  ;;  %2854 = vmatprep.subr.bf16.mxu1 %v7169_v2 }
 0x163   :  { %2812 = vmatpush1.bf16.msra.mxu0 %v7164_v28  ;;  %2855 = vmatpush1.bf16.msra.mxu1 %v7167_v29  ;;  %v7212_v28 = vld [vmem:[#allocation4 + $0x500] ss:$16 sps:$4 sm:$0xff]  }
 0x164   :  { %2813 = vmatprep.subr.bf16.mxu0 %v7172_v30  ;;  %2856 = vmatprep.subr.bf16.mxu1 %v7175_v31  ;;  %v7215_v31 = vld [vmem:[#allocation4 + $0x700] ss:$16 sps:$4 sm:$0xff]  }
 0x167   :  { %2814 = vmatpush2.bf16.msra.mxu0 %v7170_v32  ;;  %2857 = vmatpush2.bf16.msra.mxu1 %v7173_v33  ;;  %v7220_v32 = vld [vmem:[#allocation4 + $0xec] ss:$16 sps:$4 sm:$0xff]  }
 0x168   :  { %2815 = vmatprep.subr.bf16.mxu0 %v7178_v34  ;;  %2858 = vmatprep.subr.bf16.mxu1 %v7181_v35 }
 0x16b   :  { %2816 = vmatpush2.bf16.msra.mxu0 %v7176_v25  ;;  %2859 = vmatpush2.bf16.msra.mxu1 %v7179_v36  ;;  %v7223_v25 = vld [vmem:[#allocation4 + $0x2ec] ss:$16 sps:$4 sm:$0xff]  }
 0x16c   :  { %2817 = vmatprep.subr.bf16.mxu0 %v7184_v37  ;;  %2860 = vmatprep.subr.bf16.mxu1 %v7187_v38 }
 0x16f   :  { %2818 = vmatpush2.bf16.msra.mxu0 %v7182_v39  ;;  %2861 = vmatpush2.bf16.msra.mxu1 %v7185_v40 }
 0x170   :  { %2819 = vmatprep.subr.bf16.mxu0 %v7190_v41  ;;  %2862 = vmatprep.subr.bf16.mxu1 %v7193_v42  ;;  %v7218_v41 = vld [vmem:[#allocation4 + $0xe8] ss:$16 sps:$4 sm:$0xff]  }
 0x173   :  { %2820 = vmatpush2.bf16.msra.mxu0 %v7188_v43  ;;  %2863 = vmatpush2.bf16.msra.mxu1 %v7191_v44  ;;  %v7221_v44 = vld [vmem:[#allocation4 + $0x2e8] ss:$16 sps:$4 sm:$0xff]  }
 0x174   :  { %2821 = vmatprep.subr.bf16.mxu0 %v7196_v45  ;;  %2864 = vmatprep.subr.bf16.mxu1 %v7199_v46  ;;  %v7226_v46 = vld [vmem:[#allocation4 + $0xcc] ss:$16 sps:$4 sm:$0xff]  }
 0x177   :  { %2822 = vmatpush2.bf16.msra.mxu0 %v7194_v47  ;;  %2865 = vmatpush2.bf16.msra.mxu1 %v7197_v48  ;;  %v7229_v47 = vld [vmem:[#allocation4 + $0x2cc] ss:$16 sps:$4 sm:$0xff]   ;;  %v7224_v48 = vld [vmem:[#allocation4 + $0xc8] ss:$16 sps:$4 sm:$0xff]  }
 0x178   :  { %v1077_v60 = vpop.f32.mrf.mxu0  ;;  %2823 = vmatprep.subr.bf16.mxu0 %v7202_v50  ;;  %v1120_v3 = vpop.f32.mrf.mxu1  ;;  %2866 = vmatprep.subr.bf16.mxu1 %v7205_v51  ;;  %v7227_v50 = vld [vmem:[#allocation4 + $0x2c8] ss:$16 sps:$4 sm:$0xff]   ;;  %v7232_v51 = vld [vmem:[#allocation4 + $0xac] ss:$16 sps:$4 sm:$0xff]  }
 0x179   :  { %v1078_v20 = vadd.f32 %v1077_v60, %v296_v6  ;;  %v1121_v63 = vadd.f32 %v1120_v3, %v304_v9  ;;  %v7230_v60 = vld [vmem:[#allocation4 + $0xa8] ss:$16 sps:$4 sm:$0xff]   ;;  %v7241_v3 = vld [vmem:[#allocation4 + $0x28c] ss:$16 sps:$4 sm:$0xff]  }
 0x17a   :  { %v1079_v7 = vpop.f32.mrf.mxu0  ;;  %v1122_v10 = vpop.f32.mrf.mxu1 }
 0x17b   :  { %2824 = vmatpush2.bf16.msra.mxu0 %v7200_v58  ;;  %2867 = vmatpush2.bf16.msra.mxu1 %v7203_v0  ;;  %v1080_v15 = vadd.f32 %v1079_v7, %v300_v4  ;;  %v1123_v21 = vadd.f32 %v1122_v10, %v308_v8  ;;  %v1133_v36 = vmax.f32 %v1078_v20, 0.0  ;;  %v1135_v39 = vmax.f32 %v1121_v63, 0.0  ;;  %v7235_v58 = vld [vmem:[#allocation4 + $0x2ac] ss:$16 sps:$4 sm:$0xff]   ;;  %v7233_v0 = vld [vmem:[#allocation4 + $0x2a8] ss:$16 sps:$4 sm:$0xff]  }
 0x17c   :  { %v1081_v12 = vpop.f32.mrf.mxu0  ;;  %2825 = vmatprep.subr.bf16.mxu0 %v7208_v1  ;;  %v1124_v17 = vpop.f32.mrf.mxu1  ;;  %2868 = vmatprep.subr.bf16.mxu1 %v7211_v5  ;;  %v7238_v1 = vld [vmem:[#allocation4 + $0x8c] ss:$16 sps:$4 sm:$0xff]   ;;  %v7245_v7 = vld [vmem:[#allocation4 + $0x268] ss:$16 sps:$4 sm:$0xff]  }
 0x17d   :  { %v1082_v16 = vadd.f32 %v1081_v12, %v296_v6  ;;  %v1125_v22 = vadd.f32 %v1124_v17, %v304_v9  ;;  %v1134_v33 = vmax.f32 %v1080_v15, 0.0  ;;  %v1136_v37 = vmax.f32 %v1123_v21, 0.0  ;;  %v7244_v5 = vld [vmem:[#allocation4 + $0x6c] ss:$16 sps:$4 sm:$0xff]   ;;  %v7248_v10 = vld [vmem:[#allocation4 + $0x48] ss:$16 sps:$4 sm:$0xff]  }
 0x17e   :  { %v1083_v23 = vpop.f32.mrf.mxu0  ;;  %v1126_v61 = vpop.f32.mrf.mxu1  ;;  %v7247_v6 = vld [vmem:[#allocation4 + $0x26c] ss:$16 sps:$4 sm:$0xff]   ;;  %v7257_v15 = vld [vmem:[#allocation4 + $0x228] ss:$16 sps:$4 sm:$0xff]  }
 0x17f   :  { %v1084_v2 = vadd.f32 %v1083_v23, %v300_v4  ;;  %2826 = vmatpush2.bf16.msra.mxu0 %v7206_v11  ;;  %v1141_v29 = vmax.f32 %v1082_v16, 0.0  ;;  %v1127_v30 = vadd.f32 %v1126_v61, %v308_v8  ;;  %2869 = vmatpush2.bf16.msra.mxu1 %v7209_v13  ;;  %v1143_v34 = vmax.f32 %v1125_v22, 0.0  ;;  %v7236_v4 = vld [vmem:[#allocation4 + $0x88] ss:$16 sps:$4 sm:$0xff]   ;;  %v7250_v8 = vld [vmem:[#allocation4 + $0x4c] ss:$16 sps:$4 sm:$0xff]  }
 0x180   :  { %2827 = vmatprep.subr.bf16.mxu0 %v7214_v14  ;;  %2870 = vmatprep.subr.bf16.mxu1 %v7217_v19  ;;  %v7253_v9 = vld [vmem:[#allocation4 + $0x24c] ss:$16 sps:$4 sm:$0xff]   ;;  %v7251_v11 = vld [vmem:[#allocation4 + $0x248] ss:$16 sps:$4 sm:$0xff]  }
 0x181   :  { %v1142_v35 = vmax.f32 %v1084_v2, 0.0  ;;  %v1144_v38 = vmax.f32 %v1127_v30, 0.0  ;;  %v7883_v42 = vpack.c.bf16 %v1141_v29, %v1133_v36  ;;  %v7887_v45 = vpack.c.bf16 %v1143_v34, %v1135_v39  ;;  %v7256_v12 = vld [vmem:[#allocation4 + $0x2c] ss:$16 sps:$4 sm:$0xff]   ;;  %v7254_v14 = vld [vmem:[#allocation4 + $0x28] ss:$16 sps:$4 sm:$0xff]  }
 0x182   :  { %v7259_v13 = vld [vmem:[#allocation4 + $0x22c] ss:$16 sps:$4 sm:$0xff]   ;;  %v7260_v19 = vld [vmem:[#allocation4 + $0x8] ss:$16 sps:$4 sm:$0xff]  }
 0x183   :  { %v7881_v40 = vpack.c.bf16 %v1142_v35, %v1134_v33  ;;  %2828 = vmatpush2.bf16.msra.mxu0 %v7212_v28  ;;  %v7885_v43 = vpack.c.bf16 %v1144_v38, %v1136_v37  ;;  %2871 = vmatpush2.bf16.msra.mxu1 %v7215_v31  ;;  %v7262_v16 = vld [vmem:[#allocation4 + $0xc] ss:$16 sps:$4 sm:$0xff]   ;;  %v7263_v20 = vld [vmem:[#allocation4 + $0x208] ss:$16 sps:$4 sm:$0xff]  }
 0x184   :  { %2883 = vmatprep.subr.bf16.mxu0 %v7220_v32  ;;  %2926 = vmatprep.subr.bf16.mxu1 %v7223_v25  ;;  %v7265_v17 = vld [vmem:[#allocation4 + $0x20c] ss:$16 sps:$4 sm:$0xff]   ;;  %v7266_v23 = vld [vmem:[#allocation4 + $0x1e8] ss:$16 sps:$4 sm:$0xff]  }
 0x185   :  { %2829 = vmatprep.mubr.bf16.mxu0 %v7881_v40  ;;  %2872 = vmatprep.mubr.bf16.mxu1 %v7885_v43  ;;  %v7268_v21 = vld [vmem:[#allocation4 + $0x1ec] ss:$16 sps:$4 sm:$0xff]   ;;  %v7269_v63 = vld [vmem:[#allocation4 + $0x3e8] ss:$16 sps:$4 sm:$0xff]  }
 0x186   :  { %2830 = vmatmul.mubr.bf16.vlgmr.msra.gmra.mxu0 %v7883_v42  ;;  %2873 = vmatmul.mubr.bf16.vlgmr.msra.gmra.mxu1 %v7887_v45  ;;  %v7271_v22 = vld [vmem:[#allocation4 + $0x3ec] ss:$16 sps:$4 sm:$0xff]   ;;  %v7272_v28 = vld [vmem:[#allocation4 + $0x1c8] ss:$16 sps:$4 sm:$0xff]  }
 0x187   :  { %2884 = vmatpush1.bf16.msra.mxu0 %v7218_v41  ;;  %2927 = vmatpush1.bf16.msra.mxu1 %v7221_v44  ;;  %v7274_v2 = vld [vmem:[#allocation4 + $0x1cc] ss:$16 sps:$4 sm:$0xff]   ;;  %v7275_v29 = vld [vmem:[#allocation4 + $0x3c8] ss:$16 sps:$4 sm:$0xff]  }
 0x188   :  { %2915 = vmatprep.mubr.bf16.mxu0 %v7853_v53  ;;  %2958 = vmatprep.mubr.bf16.mxu1 %v7857_v56  ;;  %v7239_v53 = vld [vmem:[#allocation4 + $0x288] ss:$16 sps:$4 sm:$0xff]   ;;  %v7277_v61 = vld [vmem:[#allocation4 + $0x3cc] ss:$16 sps:$4 sm:$0xff]  }
 0x189   :  { %2885 = vmatprep.subr.bf16.mxu0 %v7226_v46  ;;  %2928 = vmatprep.subr.bf16.mxu1 %v7229_v47  ;;  %v7242_v56 = vld [vmem:[#allocation4 + $0x68] ss:$16 sps:$4 sm:$0xff]   ;;  %v7280_v30 = vld [vmem:[#allocation4 + $0x1ac] ss:$16 sps:$4 sm:$0xff]  }
 0x18a   :  { %v7283_v31 = vld [vmem:[#allocation4 + $0x3ac] ss:$16 sps:$4 sm:$0xff]   ;;  %v7278_v32 = vld [vmem:[#allocation4 + $0x1a8] ss:$16 sps:$4 sm:$0xff]  }
 0x18b   :  { %2886 = vmatpush1.bf16.msra.mxu0 %v7224_v48  ;;  %2929 = vmatpush1.bf16.msra.mxu1 %v7227_v50  ;;  %v7281_v33 = vld [vmem:[#allocation4 + $0x3a8] ss:$16 sps:$4 sm:$0xff]   ;;  %v7286_v34 = vld [vmem:[#allocation4 + $0x18c] ss:$16 sps:$4 sm:$0xff]  }
 0x18c   :  { %2887 = vmatprep.subr.bf16.mxu0 %v7232_v51  ;;  %2930 = vmatprep.subr.bf16.mxu1 %v7235_v58  ;;  %v7289_v35 = vld [vmem:[#allocation4 + $0x38c] ss:$16 sps:$4 sm:$0xff]   ;;  %v7284_v25 = vld [vmem:[#allocation4 + $0x188] ss:$16 sps:$4 sm:$0xff]  }
 0x18d   :  { %v7287_v36 = vld [vmem:[#allocation4 + $0x388] ss:$16 sps:$4 sm:$0xff]   ;;  %v7292_v37 = vld [vmem:[#allocation4 + $0x16c] ss:$16 sps:$4 sm:$0xff]  }
 0x18e   :  { %v7295_v38 = vld [vmem:[#allocation4 + $0x36c] ss:$16 sps:$4 sm:$0xff]   ;;  %v7290_v39 = vld [vmem:[#allocation4 + $0x168] ss:$16 sps:$4 sm:$0xff]  }
 0x18f   :  { %2888 = vmatpush1.bf16.msra.mxu0 %v7230_v60  ;;  %2931 = vmatpush1.bf16.msra.mxu1 %v7233_v0  ;;  %v7293_v41 = vld [vmem:[#allocation4 + $0x368] ss:$16 sps:$4 sm:$0xff]   ;;  %v7298_v44 = vld [vmem:[#allocation4 + $0x14c] ss:$16 sps:$4 sm:$0xff]  }
 0x190   :  { %2889 = vmatprep.subr.bf16.mxu0 %v7238_v1  ;;  %2932 = vmatprep.subr.bf16.mxu1 %v7241_v3  ;;  %v7301_v46 = vld [vmem:[#allocation4 + $0x34c] ss:$16 sps:$4 sm:$0xff]   ;;  %v7296_v47 = vld [vmem:[#allocation4 + $0x148] ss:$16 sps:$4 sm:$0xff]  }
 0x191   :  { %v7299_v48 = vld [vmem:[#allocation4 + $0x348] ss:$16 sps:$4 sm:$0xff]   ;;  %v7304_v50 = vld [vmem:[#allocation4 + $0x12c] ss:$16 sps:$4 sm:$0xff]  }
 0x192   :  { %v7307_v51 = vld [vmem:[#allocation4 + $0x32c] ss:$16 sps:$4 sm:$0xff]   ;;  %v7302_v58 = vld [vmem:[#allocation4 + $0x128] ss:$16 sps:$4 sm:$0xff]  }
 0x193   :  { %2890 = vmatpush1.bf16.msra.mxu0 %v7236_v4  ;;  %2933 = vmatpush1.bf16.msra.mxu1 %v7239_v53  ;;  %v7305_v60 = vld [vmem:[#allocation4 + $0x328] ss:$16 sps:$4 sm:$0xff]   ;;  %v7310_v0 = vld [vmem:[#allocation4 + $0x10c] ss:$16 sps:$4 sm:$0xff]  }
 0x194   :  { %2891 = vmatprep.subr.bf16.mxu0 %v7244_v5  ;;  %2934 = vmatprep.subr.bf16.mxu1 %v7247_v6  ;;  %v7313_v1 = vld [vmem:[#allocation4 + $0x30c] ss:$16 sps:$4 sm:$0xff]   ;;  %v7308_v3 = vld [vmem:[#allocation4 + $0x108] ss:$16 sps:$4 sm:$0xff]  }
 0x195   :  { %v7311_v4 = vld [vmem:[#allocation4 + $0x308] ss:$16 sps:$4 sm:$0xff]   ;;  %v7316_v53 = vld [vmem:[#allocation4 + $0x4ec] ss:$16 sps:$4 sm:$0xff]  }
 0x196   :  { %v7319_v5 = vld [vmem:[#allocation4 + $0x6ec] ss:$16 sps:$4 sm:$0xff]   ;;  %v7314_v6 = vld [vmem:[#allocation4 + $0x4e8] ss:$16 sps:$4 sm:$0xff]  }
 0x197   :  { %2892 = vmatpush1.bf16.msra.mxu0 %v7242_v56  ;;  %2935 = vmatpush1.bf16.msra.mxu1 %v7245_v7  ;;  %v7317_v56 = vld [vmem:[#allocation4 + $0x6e8] ss:$16 sps:$4 sm:$0xff]   ;;  %v7322_v7 = vld [vmem:[#allocation4 + $0x4cc] ss:$16 sps:$4 sm:$0xff]  }
 0x198   :  { %2893 = vmatprep.subr.bf16.mxu0 %v7250_v8  ;;  %2936 = vmatprep.subr.bf16.mxu1 %v7253_v9  ;;  %v7325_v8 = vld [vmem:[#allocation4 + $0x6cc] ss:$16 sps:$4 sm:$0xff]   ;;  %v7320_v9 = vld [vmem:[#allocation4 + $0x4c8] ss:$16 sps:$4 sm:$0xff]  }
 0x19b   :  { %2894 = vmatpush1.bf16.msra.mxu0 %v7248_v10  ;;  %2937 = vmatpush1.bf16.msra.mxu1 %v7251_v11  ;;  %v7323_v10 = vld [vmem:[#allocation4 + $0x6c8] ss:$16 sps:$4 sm:$0xff]   ;;  %v7328_v11 = vld [vmem:[#allocation4 + $0x4ac] ss:$16 sps:$4 sm:$0xff]  }
 0x19c   :  { %2895 = vmatprep.subr.bf16.mxu0 %v7256_v12  ;;  %2938 = vmatprep.subr.bf16.mxu1 %v7259_v13  ;;  %v7331_v12 = vld [vmem:[#allocation4 + $0x6ac] ss:$16 sps:$4 sm:$0xff]   ;;  %v7326_v13 = vld [vmem:[#allocation4 + $0x4a8] ss:$16 sps:$4 sm:$0xff]  }
 0x19f   :  { %2896 = vmatpush1.bf16.msra.mxu0 %v7254_v14  ;;  %2939 = vmatpush1.bf16.msra.mxu1 %v7257_v15  ;;  %v7334_v14 = vld [vmem:[#allocation4 + $0x48c] ss:$16 sps:$4 sm:$0xff]   ;;  %v7332_v15 = vld [vmem:[#allocation4 + $0x488] ss:$16 sps:$4 sm:$0xff]  }
 0x1a0   :  { %2897 = vmatprep.subr.bf16.mxu0 %v7262_v16  ;;  %2940 = vmatprep.subr.bf16.mxu1 %v7265_v17  ;;  %v7340_v16 = vld [vmem:[#allocation4 + $0x46c] ss:$16 sps:$4 sm:$0xff]  }
 0x1a1   :  { %v7343_v17 = vld [vmem:[#allocation4 + $0x66c] ss:$16 sps:$4 sm:$0xff]  }
 0x1a3   :  { %2898 = vmatpush1.bf16.msra.mxu0 %v7260_v19  ;;  %2941 = vmatpush1.bf16.msra.mxu1 %v7263_v20  ;;  %v7341_v19 = vld [vmem:[#allocation4 + $0x668] ss:$16 sps:$4 sm:$0xff]   ;;  %v7346_v20 = vld [vmem:[#allocation4 + $0x44c] ss:$16 sps:$4 sm:$0xff]  }
 0x1a4   :  { %2899 = vmatprep.subr.bf16.mxu0 %v7268_v21  ;;  %2942 = vmatprep.subr.bf16.mxu1 %v7271_v22  ;;  %v7349_v21 = vld [vmem:[#allocation4 + $0x64c] ss:$16 sps:$4 sm:$0xff]   ;;  %v7344_v22 = vld [vmem:[#allocation4 + $0x448] ss:$16 sps:$4 sm:$0xff]  }
 0x1a7   :  { %2900 = vmatpush2.bf16.msra.mxu0 %v7266_v23  ;;  %2943 = vmatpush2.bf16.msra.mxu1 %v7269_v63  ;;  %v7347_v23 = vld [vmem:[#allocation4 + $0x648] ss:$16 sps:$4 sm:$0xff]   ;;  %v7352_v63 = vld [vmem:[#allocation4 + $0x42c] ss:$16 sps:$4 sm:$0xff]  }
 0x1a8   :  { %2901 = vmatprep.subr.bf16.mxu0 %v7274_v2  ;;  %2944 = vmatprep.subr.bf16.mxu1 %v7277_v61  ;;  %v7355_v2 = vld [vmem:[#allocation4 + $0x62c] ss:$16 sps:$4 sm:$0xff]   ;;  %v7350_v61 = vld [vmem:[#allocation4 + $0x428] ss:$16 sps:$4 sm:$0xff]  }
 0x1ab   :  { %2902 = vmatpush2.bf16.msra.mxu0 %v7272_v28  ;;  %2945 = vmatpush2.bf16.msra.mxu1 %v7275_v29  ;;  %v7353_v28 = vld [vmem:[#allocation4 + $0x628] ss:$16 sps:$4 sm:$0xff]   ;;  %v7358_v29 = vld [vmem:[#allocation4 + $0x40c] ss:$16 sps:$4 sm:$0xff]  }
 0x1ac   :  { %2903 = vmatprep.subr.bf16.mxu0 %v7280_v30  ;;  %2946 = vmatprep.subr.bf16.mxu1 %v7283_v31  ;;  %v7361_v30 = vld [vmem:[#allocation4 + $0x60c] ss:$16 sps:$4 sm:$0xff]   ;;  %v7356_v31 = vld [vmem:[#allocation4 + $0x408] ss:$16 sps:$4 sm:$0xff]  }
 0x1af   :  { %2904 = vmatpush2.bf16.msra.mxu0 %v7278_v32  ;;  %2947 = vmatpush2.bf16.msra.mxu1 %v7281_v33  ;;  %v7359_v32 = vld [vmem:[#allocation4 + $0x608] ss:$16 sps:$4 sm:$0xff]   ;;  %v7364_v33 = vld [vmem:[#allocation4 + $0x5ec] ss:$16 sps:$4 sm:$0xff]  }
 0x1b0   :  { %2905 = vmatprep.subr.bf16.mxu0 %v7286_v34  ;;  %2948 = vmatprep.subr.bf16.mxu1 %v7289_v35  ;;  %v7367_v34 = vld [vmem:[#allocation4 + $0x7ec] ss:$16 sps:$4 sm:$0xff]   ;;  %v7362_v35 = vld [vmem:[#allocation4 + $0x5e8] ss:$16 sps:$4 sm:$0xff]  }
 0x1b3   :  { %2906 = vmatpush2.bf16.msra.mxu0 %v7284_v25  ;;  %2949 = vmatpush2.bf16.msra.mxu1 %v7287_v36  ;;  %v7365_v25 = vld [vmem:[#allocation4 + $0x7e8] ss:$16 sps:$4 sm:$0xff]   ;;  %v7370_v36 = vld [vmem:[#allocation4 + $0x5cc] ss:$16 sps:$4 sm:$0xff]  }
 0x1b4   :  { %2907 = vmatprep.subr.bf16.mxu0 %v7292_v37  ;;  %2950 = vmatprep.subr.bf16.mxu1 %v7295_v38  ;;  %v7373_v37 = vld [vmem:[#allocation4 + $0x7cc] ss:$16 sps:$4 sm:$0xff]   ;;  %v7368_v38 = vld [vmem:[#allocation4 + $0x5c8] ss:$16 sps:$4 sm:$0xff]  }
 0x1b7   :  { %2908 = vmatpush2.bf16.msra.mxu0 %v7290_v39  ;;  %2951 = vmatpush2.bf16.msra.mxu1 %v7293_v41  ;;  %v7371_v39 = vld [vmem:[#allocation4 + $0x7c8] ss:$16 sps:$4 sm:$0xff]   ;;  %v7376_v41 = vld [vmem:[#allocation4 + $0x5ac] ss:$16 sps:$4 sm:$0xff]  }
 0x1b8   :  { %2909 = vmatprep.subr.bf16.mxu0 %v7298_v44  ;;  %2952 = vmatprep.subr.bf16.mxu1 %v7301_v46  ;;  %v7379_v44 = vld [vmem:[#allocation4 + $0x7ac] ss:$16 sps:$4 sm:$0xff]   ;;  %v7374_v46 = vld [vmem:[#allocation4 + $0x5a8] ss:$16 sps:$4 sm:$0xff]  }
 0x1bb   :  { %2910 = vmatpush2.bf16.msra.mxu0 %v7296_v47  ;;  %2953 = vmatpush2.bf16.msra.mxu1 %v7299_v48  ;;  %v7377_v47 = vld [vmem:[#allocation4 + $0x7a8] ss:$16 sps:$4 sm:$0xff]   ;;  %v7382_v48 = vld [vmem:[#allocation4 + $0x58c] ss:$16 sps:$4 sm:$0xff]  }
 0x1bc   :  { %2911 = vmatprep.subr.bf16.mxu0 %v7304_v50  ;;  %2954 = vmatprep.subr.bf16.mxu1 %v7307_v51  ;;  %v7385_v50 = vld [vmem:[#allocation4 + $0x78c] ss:$16 sps:$4 sm:$0xff]   ;;  %v7380_v51 = vld [vmem:[#allocation4 + $0x588] ss:$16 sps:$4 sm:$0xff]  }
 0x1bf   :  { %2912 = vmatpush2.bf16.msra.mxu0 %v7302_v58  ;;  %2955 = vmatpush2.bf16.msra.mxu1 %v7305_v60  ;;  %v7383_v58 = vld [vmem:[#allocation4 + $0x788] ss:$16 sps:$4 sm:$0xff]   ;;  %v7388_v60 = vld [vmem:[#allocation4 + $0x56c] ss:$16 sps:$4 sm:$0xff]  }
 0x1c0   :  { %2913 = vmatprep.subr.bf16.mxu0 %v7310_v0  ;;  %2956 = vmatprep.subr.bf16.mxu1 %v7313_v1  ;;  %v7391_v0 = vld [vmem:[#allocation4 + $0x76c] ss:$16 sps:$4 sm:$0xff]   ;;  %v7386_v1 = vld [vmem:[#allocation4 + $0x568] ss:$16 sps:$4 sm:$0xff]  }
 0x1c3   :  { %2914 = vmatpush2.bf16.msra.mxu0 %v7308_v3  ;;  %2957 = vmatpush2.bf16.msra.mxu1 %v7311_v4  ;;  %v7389_v3 = vld [vmem:[#allocation4 + $0x768] ss:$16 sps:$4 sm:$0xff]   ;;  %v7394_v4 = vld [vmem:[#allocation4 + $0x54c] ss:$16 sps:$4 sm:$0xff]  }
 0x1c4   :  { %2969 = vmatprep.subr.bf16.mxu0 %v7316_v53  ;;  %3012 = vmatprep.subr.bf16.mxu1 %v7319_v5  ;;  %v7397_v53 = vld [vmem:[#allocation4 + $0x74c] ss:$16 sps:$4 sm:$0xff]   ;;  %v7392_v5 = vld [vmem:[#allocation4 + $0x548] ss:$16 sps:$4 sm:$0xff]  }
 0x1c6   :  { %2916 = vmatmul.mubr.bf16.vlgmr.msra.gmra.mxu0 %v7855_v55  ;;  %2959 = vmatmul.mubr.bf16.vlgmr.msra.gmra.mxu1 %v7859_v59  ;;  %v7329_v55 = vld [vmem:[#allocation4 + $0x6a8] ss:$16 sps:$4 sm:$0xff]   ;;  %v7337_v59 = vld [vmem:[#allocation4 + $0x68c] ss:$16 sps:$4 sm:$0xff]  }
 0x1c7   :  { %2970 = vmatpush1.bf16.msra.mxu0 %v7314_v6  ;;  %3001 = vmatprep.mubr.bf16.mxu0 %v7881_v40  ;;  %v7335_v40 = vld [vmem:[#allocation4 + $0x688] ss:$16 sps:$4 sm:$0xff]  }
 0x1c8   :  { %3013 = vmatpush1.bf16.msra.mxu1 %v7317_v56  ;;  %3044 = vmatprep.mubr.bf16.mxu1 %v7885_v43  ;;  %v7338_v43 = vld [vmem:[#allocation4 + $0x468] ss:$16 sps:$4 sm:$0xff]   ;;  %v7400_v56 = vld [vmem:[#allocation4 + $0x52c] ss:$16 sps:$4 sm:$0xff]  }
 0x1c9   :  { %2971 = vmatprep.subr.bf16.mxu0 %v7322_v7  ;;  %3014 = vmatprep.subr.bf16.mxu1 %v7325_v8  ;;  %v7395_v6 = vld [vmem:[#allocation4 + $0x748] ss:$16 sps:$4 sm:$0xff]   ;;  %v7403_v7 = vld [vmem:[#allocation4 + $0x72c] ss:$16 sps:$4 sm:$0xff]  }
 0x1ca   :  { %v7398_v8 = vld [vmem:[#allocation4 + $0x528] ss:$16 sps:$4 sm:$0xff]  }
 0x1cb   :  { %2972 = vmatpush1.bf16.msra.mxu0 %v7320_v9  ;;  %v7401_v9 = vld [vmem:[#allocation4 + $0x728] ss:$16 sps:$4 sm:$0xff]  }
 0x1cc   :  { %3015 = vmatpush1.bf16.msra.mxu1 %v7323_v10  ;;  %2973 = vmatprep.subr.bf16.mxu0 %v7328_v11  ;;  %v7406_v10 = vld [vmem:[#allocation4 + $0x50c] ss:$16 sps:$4 sm:$0xff]  }
 0x1cd   :  { %3016 = vmatprep.subr.bf16.mxu1 %v7331_v12  ;;  %v7409_v11 = vld [vmem:[#allocation4 + $0x70c] ss:$16 sps:$4 sm:$0xff]   ;;  %v3211_v12 = vld [vmem:[#allocation6 + $0x1c0] sm:$0xff] }
 0x1cf   :  { %2974 = vmatpush1.bf16.msra.mxu0 %v7326_v13  ;;  %v3215_v13 = vld [vmem:[#allocation6 + $0x1e0] sm:$0xff] }
 0x1d0   :  { %3017 = vmatpush1.bf16.msra.mxu1 %v7329_v55  ;;  %2975 = vmatprep.subr.bf16.mxu0 %v7334_v14  ;;  %v7404_v55 = vld [vmem:[#allocation4 + $0x508] ss:$16 sps:$4 sm:$0xff]  }
 0x1d1   :  { %3018 = vmatprep.subr.bf16.mxu1 %v7337_v59  ;;  %v7407_v14 = vld [vmem:[#allocation4 + $0x708] ss:$16 sps:$4 sm:$0xff]   ;;  %v6677_v59 = vcombine.high %v3211_v12, %v3215_v13 }
 0x1d3   :  { %2976 = vmatpush1.bf16.msra.mxu0 %v7332_v15  ;;  %v3203_v15 = vld [vmem:[#allocation6 + $0x180] sm:$0xff] }
 0x1d4   :  { %3019 = vmatpush1.bf16.msra.mxu1 %v7335_v40  ;;  %2977 = vmatprep.subr.bf16.mxu0 %v7340_v16  ;;  %v3207_v40 = vld [vmem:[#allocation6 + $0x1a0] sm:$0xff]  ;;  %v6676_v16 = vcombine.low %v3211_v12, %v3215_v13 }
 0x1d5   :  { %3020 = vmatprep.subr.bf16.mxu1 %v7343_v17  ;;  %v6669_v17 = vcombine.high %v3203_v15, %v3207_v40  ;;  %v3307_v13 = vld [vmem:[#allocation6 + $0x4c0] sm:$0xff] }
 0x1d7   :  { %2978 = vmatpush1.bf16.msra.mxu0 %v7338_v43  ;;  %v3195_v43 = vld [vmem:[#allocation6 + $0x140] sm:$0xff] }
 0x1d8   :  { %3021 = vmatpush1.bf16.msra.mxu1 %v7341_v19  ;;  %2979 = vmatprep.subr.bf16.mxu0 %v7346_v20  ;;  %v3199_v19 = vld [vmem:[#allocation6 + $0x160] sm:$0xff]  ;;  %v6668_v20 = vcombine.low %v3203_v15, %v3207_v40 }
 0x1d9   :  { %3022 = vmatprep.subr.bf16.mxu1 %v7349_v21  ;;  %v6661_v21 = vcombine.high %v3195_v43, %v3199_v19  ;;  %v3259_v40 = vld [vmem:[#allocation6 + $0x340] sm:$0xff] }
 0x1db   :  { %2980 = vmatpush1.bf16.msra.mxu0 %v7344_v22  ;;  %v3187_v22 = vld [vmem:[#allocation6 + $0x100] sm:$0xff] }
 0x1dc   :  { %3023 = vmatpush1.bf16.msra.mxu1 %v7347_v23  ;;  %2981 = vmatprep.subr.bf16.mxu0 %v7352_v63  ;;  %v3191_v23 = vld [vmem:[#allocation6 + $0x120] sm:$0xff]  ;;  %v6660_v63 = vcombine.low %v3195_v43, %v3199_v19 }
 0x1dd   :  { %3024 = vmatprep.subr.bf16.mxu1 %v7355_v2  ;;  %v6653_v2 = vcombine.high %v3187_v22, %v3191_v23  ;;  %v3299_v43 = vld [vmem:[#allocation6 + $0x480] sm:$0xff] }
 0x1de   :  { %v3303_v19 = vld [vmem:[#allocation6 + $0x4a0] sm:$0xff] }
 0x1df   :  { %2982 = vmatpush1.bf16.msra.mxu0 %v7350_v61  ;;  %v3179_v61 = vld [vmem:[#allocation6 + $0xc0] sm:$0xff] }
 0x1e0   :  { %3025 = vmatpush1.bf16.msra.mxu1 %v7353_v28  ;;  %2983 = vmatprep.subr.bf16.mxu0 %v7358_v29  ;;  %v3183_v28 = vld [vmem:[#allocation6 + $0xe0] sm:$0xff]  ;;  %v6652_v29 = vcombine.low %v3187_v22, %v3191_v23  ;;  %v6765_v22 = vcombine.high %v3299_v43, %v3303_v19 }
 0x1e1   :  { %3026 = vmatprep.subr.bf16.mxu1 %v7361_v30  ;;  %v6645_v30 = vcombine.high %v3179_v61, %v3183_v28  ;;  %v3251_v23 = vld [vmem:[#allocation6 + $0x300] sm:$0xff] }
 0x1e3   :  { %2984 = vmatpush1.bf16.msra.mxu0 %v7356_v31  ;;  %v3171_v31 = vld [vmem:[#allocation6 + $0x80] sm:$0xff] }
 0x1e4   :  { %3027 = vmatpush1.bf16.msra.mxu1 %v7359_v32  ;;  %2985 = vmatprep.subr.bf16.mxu0 %v7364_v33  ;;  %v3339_v32 = vld [vmem:[#allocation6 + $0x5c0] sm:$0xff] }
 0x1e5   :  { %3028 = vmatprep.subr.bf16.mxu1 %v7367_v34  ;;  %v3343_v33 = vld [vmem:[#allocation6 + $0x5e0] sm:$0xff] }
 0x1e7   :  { %2986 = vmatpush2.bf16.msra.mxu0 %v7362_v35  ;;  %v6804_v35 = vcombine.low %v3339_v32, %v3343_v33 }
 0x1e8   :  { %3029 = vmatpush2.bf16.msra.mxu1 %v7365_v25  ;;  %2987 = vmatprep.subr.bf16.mxu0 %v7370_v36  ;;  %v6805_v25 = vcombine.high %v3339_v32, %v3343_v33  ;;  %v3163_v36 = vld [vmem:[#allocation6 + $0x40] sm:$0xff] }
 0x1e9   :  { %3030 = vmatprep.subr.bf16.mxu1 %v7373_v37  ;;  %v3167_v37 = vld [vmem:[#allocation6 + $0x60] sm:$0xff] }
 0x1ea   :  { %v3283_v33 = vld [vmem:[#allocation6 + $0x400] sm:$0xff] }
 0x1eb   :  { %2988 = vmatpush2.bf16.msra.mxu0 %v7368_v38 }
 0x1ec   :  { %3031 = vmatpush2.bf16.msra.mxu1 %v7371_v39  ;;  %2989 = vmatprep.subr.bf16.mxu0 %v7376_v41  ;;  %v3331_v39 = vld [vmem:[#allocation6 + $0x580] sm:$0xff] }
 0x1ed   :  { %3032 = vmatprep.subr.bf16.mxu1 %v7379_v44  ;;  %v3335_v41 = vld [vmem:[#allocation6 + $0x5a0] sm:$0xff]  ;;  %v6629_v44 = vcombine.high %v3163_v36, %v3167_v37 }
 0x1ef   :  { %2990 = vmatpush2.bf16.msra.mxu0 %v7374_v46  ;;  %v6796_v46 = vcombine.low %v3331_v39, %v3335_v41 }
 0x1f0   :  { %3033 = vmatpush2.bf16.msra.mxu1 %v7377_v47  ;;  %2991 = vmatprep.subr.bf16.mxu0 %v7382_v48  ;;  %v6797_v47 = vcombine.high %v3331_v39, %v3335_v41  ;;  %v3155_v48 = vld [vmem:[#allocation6] sm:$0xff] }
 0x1f1   :  { %3034 = vmatprep.subr.bf16.mxu1 %v7385_v50  ;;  %v3159_v50 = vld [vmem:[#allocation6 + $0x20] sm:$0xff] }
 0x1f2   :  { %v3403_v41 = vld [vmem:[#allocation6 + $0x7c0] sm:$0xff] }
 0x1f3   :  { %2992 = vmatpush2.bf16.msra.mxu0 %v7380_v51  ;;  %v6628_v51 = vcombine.low %v3163_v36, %v3167_v37  ;;  %v3235_v37 = vld [vmem:[#allocation6 + $0x280] sm:$0xff] }
 0x1f4   :  { %3035 = vmatpush2.bf16.msra.mxu1 %v7383_v58  ;;  %2993 = vmatprep.subr.bf16.mxu0 %v7388_v60  ;;  %v3323_v58 = vld [vmem:[#allocation6 + $0x540] sm:$0xff] }
 0x1f5   :  { %3036 = vmatprep.subr.bf16.mxu1 %v7391_v0  ;;  %v3327_v60 = vld [vmem:[#allocation6 + $0x560] sm:$0xff]  ;;  %v6621_v0 = vcombine.high %v3155_v48, %v3159_v50 }
 0x1f7   :  { %2994 = vmatpush2.bf16.msra.mxu0 %v7386_v1  ;;  %v6788_v1 = vcombine.low %v3323_v58, %v3327_v60 }
 0x1f8   :  { %3037 = vmatpush2.bf16.msra.mxu1 %v7389_v3  ;;  %2995 = vmatprep.subr.bf16.mxu0 %v7394_v4  ;;  %v6789_v3 = vcombine.high %v3323_v58, %v3327_v60  ;;  %v3275_v4 = vld [vmem:[#allocation6 + $0x3c0] sm:$0xff] }
 0x1f9   :  { %3038 = vmatprep.subr.bf16.mxu1 %v7397_v53  ;;  %v3279_v53 = vld [vmem:[#allocation6 + $0x3e0] sm:$0xff] }
 0x1fa   :  { %v6740_v12 = vcombine.low %v3275_v4, %v3279_v53  ;;  %v3395_v60 = vld [vmem:[#allocation6 + $0x780] sm:$0xff] }
 0x1fb   :  { %2996 = vmatpush2.bf16.msra.mxu0 %v7392_v5  ;;  %v6620_v5 = vcombine.low %v3155_v48, %v3159_v50  ;;  %v3227_v50 = vld [vmem:[#allocation6 + $0x240] sm:$0xff] }
 0x1fc   :  { %3039 = vmatpush2.bf16.msra.mxu1 %v7395_v6  ;;  %2997 = vmatprep.subr.bf16.mxu0 %v7400_v56  ;;  %v3315_v6 = vld [vmem:[#allocation6 + $0x500] sm:$0xff] }
 0x1fd   :  { %3040 = vmatprep.subr.bf16.mxu1 %v7403_v7  ;;  %v3319_v56 = vld [vmem:[#allocation6 + $0x520] sm:$0xff]  ;;  %v6741_v7 = vcombine.high %v3275_v4, %v3279_v53 }
 0x1ff   :  { %2998 = vmatpush2.bf16.msra.mxu0 %v7398_v8  ;;  %v6780_v8 = vcombine.low %v3315_v6, %v3319_v56 }
 0x200   :  { %3041 = vmatpush2.bf16.msra.mxu1 %v7401_v9  ;;  %2999 = vmatprep.subr.bf16.mxu0 %v7406_v10  ;;  %v6781_v9 = vcombine.high %v3315_v6, %v3319_v56  ;;  %v3267_v10 = vld [vmem:[#allocation6 + $0x380] sm:$0xff] }
 0x201   :  { %3042 = vmatprep.subr.bf16.mxu1 %v7409_v11  ;;  %v3271_v11 = vld [vmem:[#allocation6 + $0x3a0] sm:$0xff] }
 0x202   :  { %v3219_v6 = vld [vmem:[#allocation6 + $0x200] sm:$0xff] }
 0x203   :  { %3000 = vmatpush2.bf16.msra.mxu0 %v7404_v55  ;;  %v3311_v55 = vld [vmem:[#allocation6 + $0x4e0] sm:$0xff] }
 0x204   :  { %3043 = vmatpush2.bf16.msra.mxu1 %v7407_v14  ;;  %4733 = vmatprep.subr.bf16.mxu0 %v6677_v59  ;;  %v6733_v14 = vcombine.high %v3267_v10, %v3271_v11  ;;  %v6772_v59 = vcombine.low %v3307_v13, %v3311_v55  ;;  %v6773_v15 = vcombine.high %v3307_v13, %v3311_v55  ;;  %v3223_v56 = vld [vmem:[#allocation6 + $0x220] sm:$0xff] }
 0x205   :  { %4776 = vmatprep.subr.bf16.mxu1 %v6805_v25 }
 0x206   :  { %3002 = vmatmul.mubr.bf16.vlgmr.msra.gmra.mxu0 %v7883_v42  ;;  %v3175_v42 = vld [vmem:[#allocation6 + $0xa0] sm:$0xff] }
 0x207   :  { %3045 = vmatmul.mubr.bf16.vlgmr.msra.gmra.mxu1 %v7887_v45  ;;  %4734 = vmatpush1.bf16.msra.mxu0 %v6676_v16  ;;  %v6644_v45 = vcombine.low %v3179_v61, %v3183_v28  ;;  %v6637_v34 = vcombine.high %v3171_v31, %v3175_v42  ;;  %v6636_v38 = vcombine.low %v3171_v31, %v3175_v42  ;;  %v3263_v16 = vld [vmem:[#allocation6 + $0x360] sm:$0xff] }
 0x208   :  { %4735 = vmatprep.subr.bf16.mxu0 %v6669_v17  ;;  %4777 = vmatpush1.bf16.msra.mxu1 %v6804_v35  ;;  %v6732_v17 = vcombine.low %v3267_v10, %v3271_v11  ;;  %v3291_v61 = vld [vmem:[#allocation6 + $0x440] sm:$0xff] }
 0x209   :  { %4778 = vmatprep.subr.bf16.mxu1 %v6797_v47  ;;  %v3295_v28 = vld [vmem:[#allocation6 + $0x460] sm:$0xff] }
 0x20a   :  { %v6757_v31 = vcombine.high %v3291_v61, %v3295_v28  ;;  %v3243_v42 = vld [vmem:[#allocation6 + $0x2c0] sm:$0xff] }
 0x20b   :  { %4736 = vmatpush1.bf16.msra.mxu0 %v6668_v20  ;;  %v6725_v20 = vcombine.high %v3259_v40, %v3263_v16  ;;  %v3391_v10 = vld [vmem:[#allocation6 + $0x760] sm:$0xff] }
 0x20c   :  { %4737 = vmatprep.subr.bf16.mxu0 %v6661_v21  ;;  %4779 = vmatpush1.bf16.msra.mxu1 %v6796_v46  ;;  %v6764_v21 = vcombine.low %v3299_v43, %v3303_v19  ;;  %v3379_v43 = vld [vmem:[#allocation6 + $0x700] sm:$0xff] }
 0x20d   :  { %4780 = vmatprep.subr.bf16.mxu1 %v6789_v3  ;;  %v3383_v19 = vld [vmem:[#allocation6 + $0x720] sm:$0xff] }
 0x20f   :  { %4738 = vmatpush1.bf16.msra.mxu0 %v6660_v63  ;;  %v3255_v63 = vld [vmem:[#allocation6 + $0x320] sm:$0xff] }
 0x210   :  { %4739 = vmatprep.subr.bf16.mxu0 %v6653_v2  ;;  %4781 = vmatpush1.bf16.msra.mxu1 %v6788_v1  ;;  %v6724_v2 = vcombine.low %v3259_v40, %v3263_v16  ;;  %v6716_v32 = vcombine.low %v3251_v23, %v3255_v63  ;;  %v2745_v1 = vpop.f32.mrf.mxu0  ;;  %v7910_v40 = vld [vmem:[#allocation6 + $0x1e8] sm:$0xff] }
 0x211   :  { %4782 = vmatprep.subr.bf16.mxu1 %v6781_v9  ;;  %v3387_v9 = vld [vmem:[#allocation6 + $0x740] sm:$0xff] }
 0x212   :  { %v2747_v11 = vpop.f32.mrf.mxu0  ;;  %v6852_v13 = vcombine.low %v3387_v9, %v3391_v10  ;;  %v6853_v55 = vcombine.high %v3387_v9, %v3391_v10 }
 0x213   :  { %4740 = vmatpush1.bf16.msra.mxu0 %v6652_v29  ;;  %v6717_v29 = vcombine.high %v3251_v23, %v3255_v63  ;;  %v6845_v23 = vcombine.high %v3379_v43, %v3383_v19 }
 0x214   :  { %4741 = vmatprep.subr.bf16.mxu0 %v6645_v30  ;;  %4783 = vmatpush1.bf16.msra.mxu1 %v6780_v8  ;;  %v6756_v30 = vcombine.low %v3291_v61, %v3295_v28  ;;  %v3371_v28 = vld [vmem:[#allocation6 + $0x6c0] sm:$0xff] }
 0x215   :  { %4784 = vmatprep.subr.bf16.mxu1 %v6773_v15  ;;  %v7908_v15 = vld [vmem:[#allocation6 + $0x1c8] sm:$0xff] }
 0x217   :  { %4742 = vmatpush1.bf16.msra.mxu0 %v6644_v45  ;;  %v3247_v45 = vld [vmem:[#allocation6 + $0x2e0] sm:$0xff] }
 0x218   :  { %4743 = vmatprep.subr.bf16.mxu0 %v6637_v34  ;;  %4785 = vmatpush1.bf16.msra.mxu1 %v6772_v59  ;;  %v3287_v34 = vld [vmem:[#allocation6 + $0x420] sm:$0xff]  ;;  %v6709_v35 = vcombine.high %v3243_v42, %v3247_v45  ;;  %v6708_v39 = vcombine.low %v3243_v42, %v3247_v45 }
 0x219   :  { %4786 = vmatprep.subr.bf16.mxu1 %v6765_v22  ;;  %v6748_v25 = vcombine.low %v3283_v33, %v3287_v34  ;;  %v6749_v36 = vcombine.high %v3283_v33, %v3287_v34  ;;  %v6844_v22 = vcombine.low %v3379_v43, %v3383_v19  ;;  %v3204_v43 = vld [vmem:[#allocation6 + $0x188] sm:$0xff] }
 0x21a   :  { %v3208_v19 = vld [vmem:[#allocation6 + $0x1a8] sm:$0xff] }
 0x21b   :  { %4744 = vmatpush1.bf16.msra.mxu0 %v6636_v38  ;;  %v3239_v38 = vld [vmem:[#allocation6 + $0x2a0] sm:$0xff] }
 0x21c   :  { %4745 = vmatprep.subr.bf16.mxu0 %v6629_v44  ;;  %4787 = vmatpush1.bf16.msra.mxu1 %v6764_v21  ;;  %v3407_v44 = vld [vmem:[#allocation6 + $0x7e0] sm:$0xff]  ;;  %v6701_v46 = vcombine.high %v3235_v37, %v3239_v38  ;;  %v6700_v58 = vcombine.low %v3235_v37, %v3239_v38  ;;  %v6679_v21 = vcombine.high %v7908_v15, %v7910_v40 }
 0x21d   :  { %4788 = vmatprep.subr.bf16.mxu1 %v6757_v31  ;;  %v6868_v47 = vcombine.low %v3403_v41, %v3407_v44  ;;  %v6869_v48 = vcombine.high %v3403_v41, %v3407_v44  ;;  %v3367_v41 = vld [vmem:[#allocation6 + $0x6a0] sm:$0xff] }
 0x21f   :  { %4746 = vmatpush1.bf16.msra.mxu0 %v6628_v51  ;;  %v3231_v51 = vld [vmem:[#allocation6 + $0x260] sm:$0xff] }
 0x220   :  { %4747 = vmatprep.subr.bf16.mxu0 %v6621_v0  ;;  %4789 = vmatpush1.bf16.msra.mxu1 %v6756_v30  ;;  %v3399_v0 = vld [vmem:[#allocation6 + $0x7a0] sm:$0xff]  ;;  %v6693_v3 = vcombine.high %v3227_v50, %v3231_v51  ;;  %v6692_v8 = vcombine.low %v3227_v50, %v3231_v51 }
 0x221   :  { %4790 = vmatprep.subr.bf16.mxu1 %v6749_v36  ;;  %v6860_v4 = vcombine.low %v3395_v60, %v3399_v0  ;;  %v6861_v53 = vcombine.high %v3395_v60, %v3399_v0 }
 0x223   :  { %4748 = vmatpush1.bf16.msra.mxu0 %v6620_v5  ;;  %v2788_v5 = vpop.f32.mrf.mxu1 }
 0x224   :  { %4749 = vmatprep.subr.bf16.mxu0 %v6741_v7  ;;  %4791 = vmatpush1.bf16.msra.mxu1 %v6748_v25  ;;  %v7904_v7 = vld [vmem:[%s8006_s4] sm:$0xf] }
 0x225   :  { %4792 = vmatprep.subr.bf16.mxu1 %v6869_v48  ;;  %v2790_v59 = vpop.f32.mrf.mxu1  ;;  %v1418_v16 = vrot.slane %v7904_v7, %v7829_v24 }
 0x227   :  { %4750 = vmatpush2.bf16.msra.mxu0 %v6740_v12  ;;  %v6685_v12 = vcombine.high %v3219_v6, %v3223_v56  ;;  %v2748_v61 = vadd.f32 %v2747_v11, %v1418_v16 }
 0x228   :  { %4751 = vmatprep.subr.bf16.mxu0 %v6733_v14  ;;  %4793 = vmatpush2.bf16.msra.mxu1 %v6868_v47  ;;  %v1414_v14 = vrot.slane %v7904_v7, %v7832_v26 }
 0x229   :  { %4794 = vmatprep.subr.bf16.mxu1 %v6861_v53 }
 0x22a   :  { %v2746_v63 = vadd.f32 %v2745_v1, %v1414_v14 }
 0x22b   :  { %4752 = vmatpush2.bf16.msra.mxu0 %v6732_v17  ;;  %v6684_v17 = vcombine.low %v3219_v6, %v3223_v56  ;;  %v3359_v6 = vld [vmem:[#allocation6 + $0x660] sm:$0xff] }
 0x22c   :  { %4753 = vmatprep.subr.bf16.mxu0 %v6725_v20  ;;  %4795 = vmatpush2.bf16.msra.mxu1 %v6860_v4  ;;  %v2749_v20 = vpop.f32.mrf.mxu0  ;;  %v2789_v45 = vadd.f32 %v2788_v5, %v2746_v63  ;;  %v3355_v5 = vld [vmem:[#allocation6 + $0x640] sm:$0xff] }
 0x22d   :  { %4796 = vmatprep.subr.bf16.mxu1 %v6853_v55  ;;  %v6821_v10 = vcombine.high %v3355_v5, %v3359_v6 }
 0x22e   :  { %v2751_v30 = vpop.f32.mrf.mxu0 }
 0x22f   :  { %4754 = vmatpush2.bf16.msra.mxu0 %v6724_v2  ;;  %v2792_v2 = vpop.f32.mrf.mxu1  ;;  %v2752_v25 = vadd.f32 %v2751_v30, %v1418_v16  ;;  %v3351_v16 = vld [vmem:[#allocation6 + $0x620] sm:$0xff]  ;;  %v3200_v30 = vld [vmem:[#allocation6 + $0x168] sm:$0xff] }
 0x230   :  { %4755 = vmatprep.subr.bf16.mxu0 %v6717_v29  ;;  %4797 = vmatpush2.bf16.msra.mxu1 %v6852_v13  ;;  %v3375_v29 = vld [vmem:[#allocation6 + $0x6e0] sm:$0xff] }
 0x231   :  { %4798 = vmatprep.subr.bf16.mxu1 %v6845_v23  ;;  %v6836_v31 = vcombine.low %v3371_v28, %v3375_v29  ;;  %v6837_v42 = vcombine.high %v3371_v28, %v3375_v29  ;;  %v2794_v33 = vpop.f32.mrf.mxu1  ;;  %v6678_v23 = vcombine.low %v7908_v15, %v7910_v40  ;;  %v7926_v28 = vld [vmem:[#allocation6 + $0x5e8] sm:$0xff]  ;;  %v6670_v40 = vcombine.low %v3204_v43, %v3208_v19 }
 0x232   :  { %v2795_v60 = vadd.f32 %v2794_v33, %v2752_v25  ;;  %v3196_v29 = vld [vmem:[#allocation6 + $0x148] sm:$0xff] }
 0x233   :  { %4756 = vmatpush2.bf16.msra.mxu0 %v6716_v32  ;;  %v2750_v32 = vadd.f32 %v2749_v20, %v1414_v14  ;;  %v6662_v33 = vcombine.low %v3196_v29, %v3200_v30  ;;  %v3184_v25 = vld [vmem:[#allocation6 + $0xe8] sm:$0xff] }
 0x234   :  { %4757 = vmatprep.subr.bf16.mxu0 %v6709_v35  ;;  %4799 = vmatpush2.bf16.msra.mxu1 %v6844_v22  ;;  %v2791_v35 = vadd.f32 %v2790_v59, %v2748_v61  ;;  %v3347_v59 = vld [vmem:[#allocation6 + $0x600] sm:$0xff]  ;;  %v7924_v61 = vld [vmem:[#allocation6 + $0x5c8] sm:$0xff] }
 0x235   :  { %4800 = vmatprep.subr.bf16.mxu1 %v6837_v42  ;;  %v2793_v44 = vadd.f32 %v2792_v2, %v2750_v32  ;;  %v6813_v20 = vcombine.high %v3347_v59, %v3351_v16  ;;  %v6671_v2 = vcombine.high %v3204_v43, %v3208_v19  ;;  %v6806_v15 = vcombine.low %v7924_v61, %v7926_v28  ;;  %v3192_v32 = vld [vmem:[#allocation6 + $0x128] sm:$0xff] }
 0x236   :  { %v6663_v42 = vcombine.high %v3196_v29, %v3200_v30  ;;  %v3248_v43 = vld [vmem:[#allocation6 + $0x2e8] sm:$0xff] }
 0x237   :  { %4758 = vmatpush2.bf16.msra.mxu0 %v6708_v39  ;;  %v3363_v39 = vld [vmem:[#allocation6 + $0x680] sm:$0xff]  ;;  %v3228_v30 = vld [vmem:[#allocation6 + $0x248] sm:$0xff] }
 0x238   :  { %4759 = vmatprep.subr.bf16.mxu0 %v6701_v46  ;;  %4801 = vmatpush2.bf16.msra.mxu1 %v6836_v31  ;;  %v6829_v50 = vcombine.high %v3363_v39, %v3367_v41  ;;  %v6807_v31 = vcombine.high %v7924_v61, %v7926_v28 }
 0x23a   :  { %4802 = vmatprep.subr.bf16.mxu1 %v6829_v50 }
 0x23b   :  { %4760 = vmatpush2.bf16.msra.mxu0 %v6700_v58  ;;  %v6828_v58 = vcombine.low %v3363_v39, %v3367_v41  ;;  %v3176_v39 = vld [vmem:[#allocation6 + $0xa8] sm:$0xff] }
 0x23c   :  { %4761 = vmatprep.subr.bf16.mxu0 %v6693_v3 }
 0x23d   :  { %4803 = vmatpush2.bf16.msra.mxu1 %v6828_v58  ;;  %v3160_v58 = vld [vmem:[#allocation6 + $0x28] sm:$0xff] }
 0x23e   :  { %4804 = vmatprep.subr.bf16.mxu1 %v6821_v10  ;;  %v3264_v10 = vld [vmem:[#allocation6 + $0x368] sm:$0xff] }
 0x23f   :  { %4762 = vmatpush2.bf16.msra.mxu0 %v6692_v8 }
 0x240   :  { %4763 = vmatprep.subr.bf16.mxu0 %v6685_v12  ;;  %v6820_v12 = vcombine.low %v3355_v5, %v3359_v6  ;;  %v3268_v5 = vld [vmem:[#allocation6 + $0x388] sm:$0xff] }
 0x241   :  { %v3272_v6 = vld [vmem:[#allocation6 + $0x3a8] sm:$0xff] }
 0x242   :  { %4805 = vmatpush2.bf16.msra.mxu1 %v6820_v12 }
 0x243   :  { %4764 = vmatpush2.bf16.msra.mxu0 %v6684_v17  ;;  %4806 = vmatprep.subr.bf16.mxu1 %v6813_v20 }
 0x244   :  { %4819 = vmatprep.subr.bf16.mxu0 %v6679_v21  ;;  %v6812_v21 = vcombine.low %v3347_v59, %v3351_v16 }
 0x246   :  { %v2831_v34 = vpop.f32.mrf.mxu0  ;;  %v2874_v37 = vpop.f32.mrf.mxu1  ;;  %4807 = vmatpush2.bf16.msra.mxu1 %v6812_v21  ;;  %v3236_v21 = vld [vmem:[#allocation6 + $0x288] sm:$0xff] }
 0x247   :  { %v2832_v36 = vadd.f32 %v2831_v34, %v2789_v45  ;;  %4862 = vmatprep.subr.bf16.mxu1 %v6807_v31  ;;  %v3188_v45 = vld [vmem:[#allocation6 + $0x108] sm:$0xff] }
 0x248   :  { %v2833_v38 = vpop.f32.mrf.mxu0  ;;  %v2876_v48 = vpop.f32.mrf.mxu1  ;;  %v6655_v34 = vcombine.high %v3188_v45, %v3192_v32  ;;  %v3232_v31 = vld [vmem:[#allocation6 + $0x268] sm:$0xff] }
 0x249   :  { %v2875_v46 = vadd.f32 %v2874_v37, %v2832_v36  ;;  %v2834_v47 = vadd.f32 %v2833_v38, %v2791_v35  ;;  %v3180_v35 = vld [vmem:[#allocation6 + $0xc8] sm:$0xff]  ;;  %v6654_v36 = vcombine.low %v3188_v45, %v3192_v32 }
 0x24a   :  { %v2835_v51 = vpop.f32.mrf.mxu0  ;;  %v2878_v3 = vpop.f32.mrf.mxu1  ;;  %v6647_v37 = vcombine.high %v3180_v35, %v3184_v25  ;;  %v3172_v38 = vld [vmem:[#allocation6 + $0x88] sm:$0xff]  ;;  %v6646_v41 = vcombine.low %v3180_v35, %v3184_v25  ;;  %v3213_v35 = vld [vmem:[#allocation6 + $0x1d0] sm:$0xff] }
 0x24b   :  { %v2877_v0 = vadd.f32 %v2876_v48, %v2834_v47  ;;  %v2836_v1 = vadd.f32 %v2835_v51, %v2793_v44  ;;  %v3055_v4 = vmax.f32 %v2875_v46, 0.0  ;;  %v6639_v44 = vcombine.high %v3172_v38, %v3176_v39  ;;  %v3164_v46 = vld [vmem:[#allocation6 + $0x48] sm:$0xff]  ;;  %v3217_v25 = vld [vmem:[#allocation6 + $0x1f0] sm:$0xff] }
 0x24c   :  { %v2837_v53 = vpop.f32.mrf.mxu0  ;;  %v2880_v11 = vpop.f32.mrf.mxu1  ;;  %v3168_v47 = vld [vmem:[#allocation6 + $0x68] sm:$0xff]  ;;  %v6638_v48 = vcombine.low %v3172_v38, %v3176_v39  ;;  %v3205_v38 = vld [vmem:[#allocation6 + $0x190] sm:$0xff] }
 0x24d   :  { %v3056_v56 = vmax.f32 %v2877_v0, 0.0  ;;  %v2879_v8 = vadd.f32 %v2878_v3, %v2836_v1  ;;  %v2838_v9 = vadd.f32 %v2837_v53, %v2795_v60  ;;  %v6631_v50 = vcombine.high %v3164_v46, %v3168_v47  ;;  %v3156_v51 = vld [vmem:[#allocation6 + $0x8] sm:$0xff]  ;;  %v3209_v39 = vld [vmem:[#allocation6 + $0x1b0] sm:$0xff] }
 0x24e   :  { %v6630_v60 = vcombine.low %v3164_v46, %v3168_v47  ;;  %v6623_v0 = vcombine.high %v3156_v51, %v3160_v58  ;;  %v3276_v1 = vld [vmem:[#allocation6 + $0x3c8] sm:$0xff]  ;;  %v3197_v46 = vld [vmem:[#allocation6 + $0x150] sm:$0xff] }
 0x24f   :  { %v7916_v13 = vpack.c.bf16 %v3056_v56, %v3055_v4  ;;  %v2881_v55 = vadd.f32 %v2880_v11, %v2838_v9  ;;  %v3059_v14 = vmax.f32 %v2879_v8, 0.0  ;;  %v3280_v3 = vld [vmem:[#allocation6 + $0x3e8] sm:$0xff]  ;;  %v6735_v8 = vcombine.high %v3268_v5, %v3272_v6  ;;  %v3201_v47 = vld [vmem:[#allocation6 + $0x170] sm:$0xff] }
 0x250   :  { %v6743_v53 = vcombine.high %v3276_v1, %v3280_v3  ;;  %v3260_v9 = vld [vmem:[#allocation6 + $0x348] sm:$0xff]  ;;  %v6734_v11 = vcombine.low %v3268_v5, %v3272_v6  ;;  %v3173_v5 = vld [vmem:[#allocation6 + $0x90] sm:$0xff] }
 0x251   :  { %v3060_v17 = vmax.f32 %v2881_v55, 0.0  ;;  %v7922_v63 = vpack.c.bf16 %v3059_v14, %v3055_v4  ;;  %v6622_v4 = vcombine.low %v3156_v51, %v3160_v58  ;;  %v6727_v12 = vcombine.high %v3260_v9, %v3264_v10  ;;  %v3252_v55 = vld [vmem:[#allocation6 + $0x308] sm:$0xff]  ;;  %v3189_v51 = vld [vmem:[#allocation6 + $0x110] sm:$0xff] }
 0x252   :  { %v3256_v14 = vld [vmem:[#allocation6 + $0x328] sm:$0xff]  ;;  %v6726_v59 = vcombine.low %v3260_v9, %v3264_v10  ;;  %v3193_v58 = vld [vmem:[#allocation6 + $0x130] sm:$0xff] }
 0x253   :  { %v7918_v22 = vpack.c.bf16 %v3060_v17, %v3056_v56  ;;  %v6742_v56 = vcombine.low %v3276_v1, %v3280_v3  ;;  %v6719_v16 = vcombine.high %v3252_v55, %v3256_v14  ;;  %v3244_v17 = vld [vmem:[#allocation6 + $0x2c8] sm:$0xff]  ;;  %v6718_v19 = vcombine.low %v3252_v55, %v3256_v14  ;;  %v3181_v1 = vld [vmem:[#allocation6 + $0xd0] sm:$0xff] }
 0x254   :  { %v6711_v20 = vcombine.high %v3244_v17, %v3248_v43  ;;  %v3220_v45 = vld [vmem:[#allocation6 + $0x208] sm:$0xff]  ;;  %v3185_v3 = vld [vmem:[#allocation6 + $0xf0] sm:$0xff] }
 0x255   :  { %4765 = vmatprep.mubr.bf16.mxu0 %v7918_v22  ;;  %v3224_v32 = vld [vmem:[#allocation6 + $0x228] sm:$0xff]  ;;  %v3177_v6 = vld [vmem:[#allocation6 + $0xb0] sm:$0xff] }
 0x256   :  { %4766 = vmatmul.mubr.bf16.vlgmr.msra.gmra.mxu0 %v7922_v63  ;;  %v3165_v9 = vld [vmem:[#allocation6 + $0x50] sm:$0xff] }
 0x257   :  { %4820 = vmatpush1.bf16.msra.mxu0 %v6678_v23  ;;  %4851 = vmatprep.mubr.bf16.mxu0 %v7918_v22  ;;  %v3240_v23 = vld [vmem:[#allocation6 + $0x2a8] sm:$0xff]  ;;  %v3169_v10 = vld [vmem:[#allocation6 + $0x70] sm:$0xff] }
 0x258   :  { %4821 = vmatprep.subr.bf16.mxu0 %v6671_v2  ;;  %v6710_v2 = vcombine.low %v3244_v17, %v3248_v43  ;;  %v6703_v29 = vcombine.high %v3236_v21, %v3240_v23  ;;  %v3157_v55 = vld [vmem:[#allocation6 + $0x10] sm:$0xff] }
 0x259   :  { %v3161_v14 = vld [vmem:[#allocation6 + $0x30] sm:$0xff] }
 0x25a   :  { %v3277_v17 = vld [vmem:[#allocation6 + $0x3d0] sm:$0xff] }
 0x25b   :  { %4822 = vmatpush1.bf16.msra.mxu0 %v6670_v40  ;;  %v6702_v40 = vcombine.low %v3236_v21, %v3240_v23  ;;  %v3281_v43 = vld [vmem:[#allocation6 + $0x3f0] sm:$0xff] }
 0x25c   :  { %4823 = vmatprep.subr.bf16.mxu0 %v6663_v42  ;;  %v6695_v42 = vcombine.high %v3228_v30, %v3232_v31  ;;  %v3269_v21 = vld [vmem:[#allocation6 + $0x390] sm:$0xff] }
 0x25d   :  { %v3273_v23 = vld [vmem:[#allocation6 + $0x3b0] sm:$0xff] }
 0x25f   :  { %4824 = vmatpush1.bf16.msra.mxu0 %v6662_v33  ;;  %v6694_v33 = vcombine.low %v3228_v30, %v3232_v31  ;;  %v3261_v30 = vld [vmem:[#allocation6 + $0x350] sm:$0xff] }
 0x260   :  { %4825 = vmatprep.subr.bf16.mxu0 %v6655_v34  ;;  %v6687_v34 = vcombine.high %v3220_v45, %v3224_v32  ;;  %v3265_v31 = vld [vmem:[#allocation6 + $0x370] sm:$0xff] }
 0x263   :  { %4826 = vmatpush1.bf16.msra.mxu0 %v6654_v36  ;;  %v6686_v36 = vcombine.low %v3220_v45, %v3224_v32  ;;  %v6729_v45 = vcombine.high %v3261_v30, %v3265_v31 }
 0x264   :  { %4827 = vmatprep.subr.bf16.mxu0 %v6647_v37  ;;  %v6681_v37 = vcombine.high %v3213_v35, %v3217_v25 }
 0x267   :  { %4828 = vmatpush1.bf16.msra.mxu0 %v6646_v41  ;;  %v6680_v41 = vcombine.low %v3213_v35, %v3217_v25  ;;  %v6728_v35 = vcombine.low %v3261_v30, %v3265_v31 }
 0x268   :  { %4829 = vmatprep.subr.bf16.mxu0 %v6639_v44  ;;  %v6673_v44 = vcombine.high %v3205_v38, %v3209_v39 }
 0x26b   :  { %4830 = vmatpush1.bf16.msra.mxu0 %v6638_v48  ;;  %v6672_v48 = vcombine.low %v3205_v38, %v3209_v39  ;;  %v3245_v39 = vld [vmem:[#allocation6 + $0x2d0] sm:$0xff] }
 0x26c   :  { %4831 = vmatprep.subr.bf16.mxu0 %v6631_v50  ;;  %v6665_v50 = vcombine.high %v3197_v46, %v3201_v47 }
 0x26f   :  { %4832 = vmatpush1.bf16.msra.mxu0 %v6630_v60  ;;  %v6664_v60 = vcombine.low %v3197_v46, %v3201_v47 }
 0x270   :  { %4833 = vmatprep.subr.bf16.mxu0 %v6623_v0  ;;  %v6657_v0 = vcombine.high %v3189_v51, %v3193_v58 }
 0x273   :  { %4834 = vmatpush1.bf16.msra.mxu0 %v6622_v4  ;;  %v6656_v4 = vcombine.low %v3189_v51, %v3193_v58  ;;  %v3237_v58 = vld [vmem:[#allocation6 + $0x290] sm:$0xff] }
 0x274   :  { %4835 = vmatprep.subr.bf16.mxu0 %v6743_v53  ;;  %v6649_v53 = vcombine.high %v3181_v1, %v3185_v3 }
 0x277   :  { %4836 = vmatpush2.bf16.msra.mxu0 %v6742_v56  ;;  %v6648_v56 = vcombine.low %v3181_v1, %v3185_v3  ;;  %v7718_v3 = vmov 1966171168  }
 0x278   :  { %4837 = vmatprep.subr.bf16.mxu0 %v6735_v8  ;;  %v6641_v8 = vcombine.high %v3173_v5, %v3177_v6 }
 0x27b   :  { %4838 = vmatpush2.bf16.msra.mxu0 %v6734_v11  ;;  %v6640_v11 = vcombine.low %v3173_v5, %v3177_v6 }
 0x27c   :  { %4839 = vmatprep.subr.bf16.mxu0 %v6727_v12  ;;  %v6633_v12 = vcombine.high %v3165_v9, %v3169_v10 }
 0x27f   :  { %4840 = vmatpush2.bf16.msra.mxu0 %v6726_v59  ;;  %v6632_v59 = vcombine.low %v3165_v9, %v3169_v10  ;;  %v3233_v9 = vld [vmem:[#allocation6 + $0x270] sm:$0xff] }
 0x280   :  { %4841 = vmatprep.subr.bf16.mxu0 %v6719_v16  ;;  %v6625_v16 = vcombine.high %v3157_v55, %v3161_v14 }
 0x283   :  { %4842 = vmatpush2.bf16.msra.mxu0 %v6718_v19  ;;  %v6624_v19 = vcombine.low %v3157_v55, %v3161_v14 }
 0x284   :  { %4843 = vmatprep.subr.bf16.mxu0 %v6711_v20  ;;  %v6745_v20 = vcombine.high %v3277_v17, %v3281_v43 }
 0x286   :  { %v2960_v32 = vpop.f32.mrf.mxu1 }
 0x287   :  { %4844 = vmatpush2.bf16.msra.mxu0 %v6710_v2  ;;  %v6744_v2 = vcombine.low %v3277_v17, %v3281_v43 }
 0x288   :  { %4845 = vmatprep.subr.bf16.mxu0 %v6703_v29  ;;  %v6737_v29 = vcombine.high %v3269_v21, %v3273_v23  ;;  %v2962_v38 = vpop.f32.mrf.mxu1 }
 0x28a   :  { %v2964_v51 = vpop.f32.mrf.mxu1 }
 0x28b   :  { %4846 = vmatpush2.bf16.msra.mxu0 %v6702_v40  ;;  %v6736_v40 = vcombine.low %v3269_v21, %v3273_v23 }
 0x28c   :  { %4847 = vmatprep.subr.bf16.mxu0 %v6695_v42  ;;  %v2917_v42 = vpop.f32.mrf.mxu0 }
 0x28e   :  { %v2919_v25 = vpop.f32.mrf.mxu0 }
 0x28f   :  { %4848 = vmatpush2.bf16.msra.mxu0 %v6694_v33  ;;  %v3253_v33 = vld [vmem:[#allocation6 + $0x310] sm:$0xff] }
 0x290   :  { %4849 = vmatprep.subr.bf16.mxu0 %v6687_v34  ;;  %v3257_v34 = vld [vmem:[#allocation6 + $0x330] sm:$0xff]  ;;  %v2921_v47 = vpop.f32.mrf.mxu0 }
 0x291   :  { %v6720_v46 = vcombine.low %v3253_v33, %v3257_v34 }
 0x293   :  { %4850 = vmatpush2.bf16.msra.mxu0 %v6686_v36  ;;  %v6721_v36 = vcombine.high %v3253_v33, %v3257_v34 }
 0x294   :  { %4905 = vmatprep.subr.bf16.mxu0 %v6681_v37  ;;  %v1422_v37 = vrot.slane %v7904_v7, %v7843_v62 }
 0x296   :  { %4852 = vmatmul.mubr.bf16.vlgmr.msra.gmra.mxu0 %v7922_v63 }
 0x297   :  { %4906 = vmatpush1.bf16.msra.mxu0 %v6680_v41  ;;  %4937 = vmatprep.mubr.bf16.mxu0 %v7918_v22  ;;  %v3249_v41 = vld [vmem:[#allocation6 + $0x2f0] sm:$0xff] }
 0x298   :  { %4907 = vmatprep.subr.bf16.mxu0 %v6673_v44  ;;  %v1426_v44 = vrot.slane %v7904_v7, %v7835_v27  ;;  %v6712_v1 = vcombine.low %v3245_v39, %v3249_v41  ;;  %v2966_v7 = vpop.f32.mrf.mxu1 }
 0x29b   :  { %4908 = vmatpush1.bf16.msra.mxu0 %v6672_v48  ;;  %v6713_v48 = vcombine.high %v3245_v39, %v3249_v41  ;;  %v3214_v39 = vld [vmem:[#allocation6 + $0x1d8] sm:$0xff] }
 0x29c   :  { %4909 = vmatprep.subr.bf16.mxu0 %v6665_v50  ;;  %v2918_v50 = vadd.f32 %v2917_v42, %v1422_v37  ;;  %v3218_v41 = vld [vmem:[#allocation6 + $0x1f8] sm:$0xff] }
 0x29e   :  { %v2961_v6 = vadd.f32 %v2960_v32, %v2918_v50 }
 0x29f   :  { %4910 = vmatpush1.bf16.msra.mxu0 %v6664_v60  ;;  %v3241_v60 = vld [vmem:[#allocation6 + $0x2b0] sm:$0xff] }
 0x2a0   :  { %4911 = vmatprep.subr.bf16.mxu0 %v6657_v0  ;;  %v2920_v0 = vadd.f32 %v2919_v25, %v1426_v44  ;;  %v6705_v5 = vcombine.high %v3237_v58, %v3241_v60 }
 0x2a3   :  { %4912 = vmatpush1.bf16.msra.mxu0 %v6656_v4  ;;  %v3076_v4 = vunpack.c.l.s4 %v7718_v3  ;;  %v3336_v3 = vld [vmem:[#allocation6 + $0x5a8] sm:$0xff] }
 0x2a4   :  { %4913 = vmatprep.subr.bf16.mxu0 %v6649_v53  ;;  %v2923_v53 = vpop.f32.mrf.mxu0 }
 0x2a7   :  { %4914 = vmatpush1.bf16.msra.mxu0 %v6648_v56  ;;  %v2922_v56 = vadd.f32 %v2921_v47, %v1422_v37 }
 0x2a8   :  { %4915 = vmatprep.subr.bf16.mxu0 %v6641_v8  ;;  %v3229_v8 = vld [vmem:[#allocation6 + $0x250] sm:$0xff] }
 0x2a9   :  { %v6697_v43 = vcombine.high %v3229_v8, %v3233_v9  ;;  %v6696_v32 = vcombine.low %v3229_v8, %v3233_v9  ;;  %v3328_v9 = vld [vmem:[#allocation6 + $0x568] sm:$0xff] }
 0x2ab   :  { %4916 = vmatpush1.bf16.msra.mxu0 %v6640_v11  ;;  %v2963_v11 = vadd.f32 %v2962_v38, %v2920_v0 }
 0x2ac   :  { %4917 = vmatprep.subr.bf16.mxu0 %v6633_v12  ;;  %v2924_v12 = vadd.f32 %v2923_v53, %v1426_v44 }
 0x2ae   :  { %v2967_v31 = vadd.f32 %v2966_v7, %v2924_v12  ;;  %v6682_v7 = vcombine.low %v3214_v39, %v3218_v41  ;;  %v3198_v12 = vld [vmem:[#allocation6 + $0x158] sm:$0xff] }
 0x2af   :  { %4918 = vmatpush1.bf16.msra.mxu0 %v6632_v59  ;;  %v6704_v59 = vcombine.low %v3237_v58, %v3241_v60 }
 0x2b0   :  { %4919 = vmatprep.subr.bf16.mxu0 %v6625_v16  ;;  %v3077_v16 = vunpack.c.0.s8 %v3076_v4 }
 0x2b2   :  { %v7942_v33 = vsub.s32 %v3077_v16, %v7786_v49 }
 0x2b3   :  { %4920 = vmatpush1.bf16.msra.mxu0 %v6624_v19  ;;  %v2965_v19 = vadd.f32 %v2964_v51, %v2922_v56  ;;  %v6683_v51 = vcombine.high %v3214_v39, %v3218_v41  ;;  %v3292_v41 = vld [vmem:[#allocation6 + $0x448] sm:$0xff] }
 0x2b4   :  { %4921 = vmatprep.subr.bf16.mxu0 %v6745_v20  ;;  %v3081_v58 = vrot.slane %v7916_v13, %v7942_v33  ;;  %v3324_v13 = vld [vmem:[#allocation6 + $0x548] sm:$0xff] }
 0x2b7   :  { %4922 = vmatpush2.bf16.msra.mxu0 %v6744_v2  ;;  %v3221_v2 = vld [vmem:[#allocation6 + $0x210] sm:$0xff] }
 0x2b8   :  { %4923 = vmatprep.subr.bf16.mxu0 %v6737_v29  ;;  %v3225_v29 = vld [vmem:[#allocation6 + $0x230] sm:$0xff] }
 0x2bb   :  { %4924 = vmatpush2.bf16.msra.mxu0 %v6736_v40 }
 0x2bc   :  { %4925 = vmatprep.subr.bf16.mxu0 %v6729_v45 }
 0x2bf   :  { %4926 = vmatpush2.bf16.msra.mxu0 %v6728_v35  ;;  %v6689_v35 = vcombine.high %v3221_v2, %v3225_v29 }
 0x2c0   :  { %4927 = vmatprep.subr.bf16.mxu0 %v6721_v36 }
 0x2c3   :  { %4928 = vmatpush2.bf16.msra.mxu0 %v6720_v46 }
 0x2c4   :  { %4929 = vmatprep.subr.bf16.mxu0 %v6713_v48  ;;  %v6688_v48 = vcombine.low %v3221_v2, %v3225_v29  ;;  %v3312_v2 = vld [vmem:[#allocation6 + $0x4e8] sm:$0xff]  ;;  %v3182_v29 = vld [vmem:[#allocation6 + $0xd8] sm:$0xff] }
 0x2c6   :  { %v3003_v10 = vpop.f32.mrf.mxu0 }
 0x2c7   :  { %v3004_v55 = vadd.f32 %v3003_v10, %v2961_v6  ;;  %v3046_v14 = vpop.f32.mrf.mxu1  ;;  %4930 = vmatpush2.bf16.msra.mxu0 %v6712_v1  ;;  %v3332_v1 = vld [vmem:[#allocation6 + $0x588] sm:$0xff]  ;;  %v3210_v6 = vld [vmem:[#allocation6 + $0x1b8] sm:$0xff] }
 0x2c8   :  { %v3005_v17 = vpop.f32.mrf.mxu0  ;;  %4931 = vmatprep.subr.bf16.mxu0 %v6705_v5  ;;  %v3206_v5 = vld [vmem:[#allocation6 + $0x198] sm:$0xff]  ;;  %v6799_v8 = vcombine.high %v3332_v1, %v3336_v3  ;;  %v6798_v10 = vcombine.low %v3332_v1, %v3336_v3 }
 0x2c9   :  { %v3047_v20 = vadd.f32 %v3046_v14, %v3004_v55  ;;  %v3006_v21 = vadd.f32 %v3005_v17, %v2963_v11  ;;  %v3048_v23 = vpop.f32.mrf.mxu1  ;;  %v6675_v11 = vcombine.high %v3206_v5, %v3210_v6  ;;  %v3202_v55 = vld [vmem:[#allocation6 + $0x178] sm:$0xff]  ;;  %v6674_v14 = vcombine.low %v3206_v5, %v3210_v6  ;;  %v3316_v17 = vld [vmem:[#allocation6 + $0x508] sm:$0xff] }
 0x2ca   :  { %v3007_v30 = vpop.f32.mrf.mxu0  ;;  %v6667_v16 = vcombine.high %v3198_v12, %v3202_v55  ;;  %v6666_v61 = vcombine.low %v3198_v12, %v3202_v55  ;;  %v3158_v1 = vld [vmem:[#allocation6 + $0x18] sm:$0xff] }
 0x2cb   :  { %v3049_v40 = vadd.f32 %v3048_v23, %v3006_v21  ;;  %v3008_v42 = vadd.f32 %v3007_v30, %v2965_v19  ;;  %v3050_v45 = vpop.f32.mrf.mxu1  ;;  %4932 = vmatpush2.bf16.msra.mxu0 %v6704_v59  ;;  %v3057_v25 = vmax.f32 %v3047_v20, 0.0  ;;  %v6791_v59 = vcombine.high %v3324_v13, %v3328_v9  ;;  %v3190_v19 = vld [vmem:[#allocation6 + $0x118] sm:$0xff] }
 0x2cc   :  { %v3009_v34 = vpop.f32.mrf.mxu0  ;;  %4933 = vmatprep.subr.bf16.mxu0 %v6697_v43  ;;  %v3320_v43 = vld [vmem:[#allocation6 + $0x528] sm:$0xff]  ;;  %v3194_v20 = vld [vmem:[#allocation6 + $0x138] sm:$0xff]  ;;  %v6790_v21 = vcombine.low %v3324_v13, %v3328_v9 }
 0x2cd   :  { %v3058_v36 = vmax.f32 %v3049_v40, 0.0  ;;  %v3051_v37 = vadd.f32 %v3050_v45, %v3008_v42  ;;  %v3010_v38 = vadd.f32 %v3009_v34, %v2967_v31  ;;  %v3052_v44 = vpop.f32.mrf.mxu1  ;;  %v6783_v28 = vcombine.high %v3316_v17, %v3320_v43  ;;  %v3186_v30 = vld [vmem:[#allocation6 + $0xf8] sm:$0xff]  ;;  %v3304_v34 = vld [vmem:[#allocation6 + $0x4a8] sm:$0xff] }
 0x2ce   :  { %v6782_v31 = vcombine.low %v3316_v17, %v3320_v43  ;;  %v6658_v40 = vcombine.low %v3190_v19, %v3194_v20  ;;  %v6651_v45 = vcombine.high %v3182_v29, %v3186_v30  ;;  %v3162_v3 = vld [vmem:[#allocation6 + $0x38] sm:$0xff]  ;;  %v3408_v13 = vld [vmem:[#allocation6 + $0x7e8] sm:$0xff] }
 0x2cf   :  { %v6614_v46 = vpack.c.bf16 %v3058_v36, %v3057_v25  ;;  %v3053_v47 = vadd.f32 %v3052_v44, %v3010_v38  ;;  %4934 = vmatpush2.bf16.msra.mxu0 %v6696_v32  ;;  %v3061_v50 = vmax.f32 %v3051_v37, 0.0  ;;  %v3300_v32 = vld [vmem:[#allocation6 + $0x488] sm:$0xff]  ;;  %v6650_v37 = vcombine.low %v3182_v29, %v3186_v30  ;;  %v3278_v9 = vld [vmem:[#allocation6 + $0x3d8] sm:$0xff] }
 0x2d0   :  { %4935 = vmatprep.subr.bf16.mxu0 %v6689_v35  ;;  %v3174_v35 = vld [vmem:[#allocation6 + $0x98] sm:$0xff]  ;;  %v6767_v38 = vcombine.high %v3300_v32, %v3304_v34  ;;  %v3296_v44 = vld [vmem:[#allocation6 + $0x468] sm:$0xff]  ;;  %v6626_v12 = vcombine.low %v3158_v1, %v3162_v3 }
 0x2d1   :  { %v3095_v60 = vrot.slane %v6614_v46, %v7942_v33  ;;  %v3062_v0 = vmax.f32 %v3053_v47, 0.0  ;;  %v7949_v56 = vpack.c.bf16 %v3061_v50, %v3057_v25  ;;  %v3178_v25 = vld [vmem:[#allocation6 + $0xb8] sm:$0xff] }
 0x2d2   :  { %v6643_v39 = vcombine.high %v3174_v35, %v3178_v25  ;;  %v3166_v46 = vld [vmem:[#allocation6 + $0x58] sm:$0xff]  ;;  %v6642_v50 = vcombine.low %v3174_v35, %v3178_v25 }
 0x2d3   :  { %v3103_v4 = vcombine.low %v3081_v58, %v3095_v60  ;;  %v7947_v53 = vpack.c.bf16 %v3062_v0, %v3058_v36  ;;  %4936 = vmatpush2.bf16.msra.mxu0 %v6688_v48  ;;  %v3170_v47 = vld [vmem:[#allocation6 + $0x78] sm:$0xff]  ;;  %v6766_v48 = vcombine.low %v3300_v32, %v3304_v34  ;;  %v3284_v60 = vld [vmem:[#allocation6 + $0x408] sm:$0xff] }
 0x2d4   :  { %4991 = vmatprep.subr.bf16.mxu0 %v6683_v51  ;;  %v6759_v51 = vcombine.high %v3292_v41, %v3296_v44  ;;  %v6635_v58 = vcombine.high %v3166_v46, %v3170_v47  ;;  %v3288_v0 = vld [vmem:[#allocation6 + $0x428] sm:$0xff]  ;;  %v6634_v5 = vcombine.low %v3166_v46, %v3170_v47  ;;  %v3270_v17 = vld [vmem:[#allocation6 + $0x398] sm:$0xff] }
 0x2d5   :  { %6616 = vst.sshfl [vmem:[#allocation10] sm:$0x55 pattern:$0x73625140] %v3103_v4  ;;  %4808 = vmatprep.mubr.bf16.mxu1 %v7947_v53  ;;  %v6758_v4 = vcombine.low %v3292_v41, %v3296_v44  ;;  %v6751_v6 = vcombine.high %v3284_v60, %v3288_v0  ;;  %v3274_v43 = vld [vmem:[#allocation6 + $0x3b8] sm:$0xff] }
 0x2d6   :  { %4809 = vmatmul.mubr.bf16.vlgmr.msra.gmra.mxu1 %v7949_v56  ;;  %4938 = vmatmul.mubr.bf16.vlgmr.msra.gmra.mxu0 %v7922_v63  ;;  %v6738_v29 = vcombine.low %v3270_v17, %v3274_v43  ;;  %v3258_v32 = vld [vmem:[#allocation6 + $0x338] sm:$0xff] }
 0x2d7   :  { %4863 = vmatpush1.bf16.msra.mxu1 %v6806_v15  ;;  %4894 = vmatprep.mubr.bf16.mxu1 %v7947_v53  ;;  %v3308_v15 = vld [vmem:[#allocation6 + $0x4c8] sm:$0xff]  ;;  %v3250_v41 = vld [vmem:[#allocation6 + $0x2f8] sm:$0xff] }
 0x2d8   :  { %4992 = vmatpush1.bf16.msra.mxu0 %v6682_v7  ;;  %5023 = vmatprep.mubr.bf16.mxu0 %v7918_v22  ;;  %v6659_v22 = vcombine.high %v3190_v19, %v3194_v20  ;;  %v6775_v42 = vcombine.high %v3308_v15, %v3312_v2  ;;  %v6774_v36 = vcombine.low %v3308_v15, %v3312_v2  ;;  %v3266_v15 = vld [vmem:[#allocation6 + $0x378] sm:$0xff] }
 0x2d9   :  { %4864 = vmatprep.subr.bf16.mxu1 %v6799_v8  ;;  %4993 = vmatprep.subr.bf16.mxu0 %v6675_v11  ;;  %v6627_v7 = vcombine.high %v3158_v1, %v3162_v3  ;;  %v3404_v8 = vld [vmem:[#allocation6 + $0x7c8] sm:$0xff]  ;;  %v6750_v11 = vcombine.low %v3284_v60, %v3288_v0  ;;  %v3242_v60 = vld [vmem:[#allocation6 + $0x2b8] sm:$0xff] }
 0x2da   :  { %v6871_v55 = vcombine.high %v3404_v8, %v3408_v13  ;;  %v6870_v19 = vcombine.low %v3404_v8, %v3408_v13  ;;  %v3234_v8 = vld [vmem:[#allocation6 + $0x278] sm:$0xff] }
 0x2db   :  { %4865 = vmatpush1.bf16.msra.mxu1 %v6798_v10  ;;  %v3282_v10 = vld [vmem:[#allocation6 + $0x3f8] sm:$0xff] }
 0x2dc   :  { %v6196_v23 = vld [vmem:[#allocation10] sm:$0xf]  ;;  %4994 = vmatpush1.bf16.msra.mxu0 %v6674_v14  ;;  %4866 = vmatprep.subr.bf16.mxu1 %v6791_v59  ;;  %v6747_v14 = vcombine.high %v3278_v9, %v3282_v10  ;;  %v3396_v59 = vld [vmem:[#allocation6 + $0x788] sm:$0xff]  ;;  %v6746_v20 = vcombine.low %v3278_v9, %v3282_v10 }
 0x2dd   :  { %6197 = vst [vmem:[%s8012_s10] sm:$0xf] %v6196_v23  ;;  %4995 = vmatprep.subr.bf16.mxu0 %v6667_v16  ;;  %v3400_v16 = vld [vmem:[#allocation6 + $0x7a8] sm:$0xff]  ;;  %v6739_v23 = vcombine.high %v3270_v17, %v3274_v43 }
 0x2de   :  { %v6862_v2 = vcombine.low %v3396_v59, %v3400_v16 }
 0x2df   :  { %4867 = vmatpush1.bf16.msra.mxu1 %v6790_v21  ;;  %v6863_v21 = vcombine.high %v3396_v59, %v3400_v16  ;;  %v3226_v59 = vld [vmem:[#allocation6 + $0x238] sm:$0xff] }
 0x2e0   :  { %4996 = vmatpush1.bf16.msra.mxu0 %v6666_v61  ;;  %4868 = vmatprep.subr.bf16.mxu1 %v6783_v28  ;;  %v3388_v61 = vld [vmem:[#allocation6 + $0x748] sm:$0xff] }
 0x2e1   :  { %4997 = vmatprep.subr.bf16.mxu0 %v6659_v22  ;;  %v3392_v28 = vld [vmem:[#allocation6 + $0x768] sm:$0xff]  ;;  %v3262_v22 = vld [vmem:[#allocation6 + $0x358] sm:$0xff] }
 0x2e2   :  { %v6855_v30 = vcombine.high %v3388_v61, %v3392_v28  ;;  %v6854_v34 = vcombine.low %v3388_v61, %v3392_v28  ;;  %v6730_v35 = vcombine.low %v3262_v22, %v3266_v15 }
 0x2e3   :  { %4869 = vmatpush1.bf16.msra.mxu1 %v6782_v31  ;;  %v6731_v31 = vcombine.high %v3262_v22, %v3266_v15  ;;  %v3333_v22 = vld [vmem:[#allocation6 + $0x590] sm:$0xff] }
 0x2e4   :  { %4998 = vmatpush1.bf16.msra.mxu0 %v6658_v40  ;;  %4870 = vmatprep.subr.bf16.mxu1 %v6775_v42  ;;  %v3380_v40 = vld [vmem:[#allocation6 + $0x708] sm:$0xff]  ;;  %v3337_v15 = vld [vmem:[#allocation6 + $0x5b0] sm:$0xff] }
 0x2e5   :  { %4999 = vmatprep.subr.bf16.mxu0 %v6651_v45  ;;  %v3384_v42 = vld [vmem:[#allocation6 + $0x728] sm:$0xff]  ;;  %v3254_v45 = vld [vmem:[#allocation6 + $0x318] sm:$0xff] }
 0x2e6   :  { %v6847_v25 = vcombine.high %v3380_v40, %v3384_v42  ;;  %v6846_v44 = vcombine.low %v3380_v40, %v3384_v42  ;;  %v6722_v46 = vcombine.low %v3254_v45, %v3258_v32  ;;  %v3329_v40 = vld [vmem:[#allocation6 + $0x570] sm:$0xff] }
 0x2e7   :  { %4871 = vmatpush1.bf16.msra.mxu1 %v6774_v36  ;;  %v6723_v36 = vcombine.high %v3254_v45, %v3258_v32  ;;  %v7410_v42 = vld [vmem:[#allocation7 + $0x70] ss:$8 sps:$4 sm:$0xff]   ;;  %v7415_v45 = vld [vmem:[#allocation7 + $0x64] ss:$8 sps:$4 sm:$0xff]   ;;  %v6800_v32 = vcombine.low %v3333_v22, %v3337_v15 }
 0x2e8   :  { %5000 = vmatpush1.bf16.msra.mxu0 %v6650_v37  ;;  %4872 = vmatprep.subr.bf16.mxu1 %v6767_v38  ;;  %v3372_v37 = vld [vmem:[#allocation6 + $0x6c8] sm:$0xff] }
 0x2e9   :  { %5001 = vmatprep.subr.bf16.mxu0 %v6643_v39  ;;  %v3376_v38 = vld [vmem:[#allocation6 + $0x6e8] sm:$0xff]  ;;  %v3246_v39 = vld [vmem:[#allocation6 + $0x2d8] sm:$0xff] }
 0x2ea   :  { %v6839_v47 = vcombine.high %v3372_v37, %v3376_v38  ;;  %v6838_v0 = vcombine.low %v3372_v37, %v3376_v38  ;;  %v6714_v1 = vcombine.low %v3246_v39, %v3250_v41  ;;  %v7418_v37 = vld [vmem:[#allocation7 + $0x54] ss:$8 sps:$4 sm:$0xff]  }
 0x2eb   :  { %4873 = vmatpush1.bf16.msra.mxu1 %v6766_v48  ;;  %v6715_v48 = vcombine.high %v3246_v39, %v3250_v41  ;;  %v3309_v41 = vld [vmem:[#allocation6 + $0x4d0] sm:$0xff] }
 0x2ec   :  { %5002 = vmatpush1.bf16.msra.mxu0 %v6642_v50  ;;  %4874 = vmatprep.subr.bf16.mxu1 %v6759_v51  ;;  %v3364_v50 = vld [vmem:[#allocation6 + $0x688] sm:$0xff] }
 0x2ed   :  { %5003 = vmatprep.subr.bf16.mxu0 %v6635_v58  ;;  %v3368_v51 = vld [vmem:[#allocation6 + $0x6a8] sm:$0xff]  ;;  %v3238_v58 = vld [vmem:[#allocation6 + $0x298] sm:$0xff] }
 0x2ee   :  { %v6831_v3 = vcombine.high %v3364_v50, %v3368_v51  ;;  %v6830_v13 = vcombine.low %v3364_v50, %v3368_v51  ;;  %v6706_v9 = vcombine.low %v3238_v58, %v3242_v60  ;;  %v3301_v50 = vld [vmem:[#allocation6 + $0x490] sm:$0xff] }
 0x2ef   :  { %4875 = vmatpush1.bf16.msra.mxu1 %v6758_v4  ;;  %v6707_v4 = vcombine.high %v3238_v58, %v3242_v60  ;;  %v3305_v51 = vld [vmem:[#allocation6 + $0x4b0] sm:$0xff]  ;;  %v7419_v58 = vld [vmem:[#allocation7 + $0x40] ss:$8 sps:$4 sm:$0xff]  }
 0x2f0   :  { %5004 = vmatpush1.bf16.msra.mxu0 %v6634_v5  ;;  %4876 = vmatprep.subr.bf16.mxu1 %v6751_v6  ;;  %v3356_v5 = vld [vmem:[#allocation6 + $0x648] sm:$0xff]  ;;  %v7424_v60 = vld [vmem:[#allocation7 + $0x34] ss:$8 sps:$4 sm:$0xff]  }
 0x2f1   :  { %5005 = vmatprep.subr.bf16.mxu0 %v6627_v7  ;;  %v3360_v6 = vld [vmem:[#allocation6 + $0x668] sm:$0xff]  ;;  %v3230_v7 = vld [vmem:[#allocation6 + $0x258] sm:$0xff] }
 0x2f2   :  { %v6823_v10 = vcombine.high %v3356_v5, %v3360_v6  ;;  %v6822_v16 = vcombine.low %v3356_v5, %v3360_v6  ;;  %v6698_v17 = vcombine.low %v3230_v7, %v3234_v8  ;;  %v7422_v5 = vld [vmem:[#allocation7 + $0x30] ss:$8 sps:$4 sm:$0xff]   ;;  %v7427_v6 = vld [vmem:[#allocation7 + $0x24] ss:$8 sps:$4 sm:$0xff]  }
 0x2f3   :  { %4877 = vmatpush1.bf16.msra.mxu1 %v6750_v11  ;;  %v6699_v11 = vcombine.high %v3230_v7, %v3234_v8  ;;  %v6768_v7 = vcombine.low %v3301_v50, %v3305_v51 }
 0x2f4   :  { %5006 = vmatpush1.bf16.msra.mxu0 %v6626_v12  ;;  %4878 = vmatprep.subr.bf16.mxu1 %v6871_v55  ;;  %v3348_v12 = vld [vmem:[#allocation6 + $0x608] sm:$0xff] }
 0x2f5   :  { %5007 = vmatprep.subr.bf16.mxu0 %v6747_v14  ;;  %v3352_v55 = vld [vmem:[#allocation6 + $0x628] sm:$0xff]  ;;  %v3222_v14 = vld [vmem:[#allocation6 + $0x218] sm:$0xff] }
 0x2f6   :  { %v6815_v43 = vcombine.high %v3348_v12, %v3352_v55  ;;  %v6690_v61 = vcombine.low %v3222_v14, %v3226_v59 }
 0x2f7   :  { %4879 = vmatpush2.bf16.msra.mxu1 %v6870_v19  ;;  %v6691_v19 = vcombine.high %v3222_v14, %v3226_v59  ;;  %v3405_v14 = vld [vmem:[#allocation6 + $0x7d0] sm:$0xff] }
 0x2f8   :  { %5008 = vmatpush2.bf16.msra.mxu0 %v6746_v20  ;;  %4880 = vmatprep.subr.bf16.mxu1 %v6863_v21  ;;  %v3341_v20 = vld [vmem:[#allocation6 + $0x5d0] sm:$0xff] }
 0x2f9   :  { %5009 = vmatprep.subr.bf16.mxu0 %v6739_v23  ;;  %v3345_v21 = vld [vmem:[#allocation6 + $0x5f0] sm:$0xff]  ;;  %v6814_v23 = vcombine.low %v3348_v12, %v3352_v55 }
 0x2fa   :  { %v6809_v28 = vcombine.high %v3341_v20, %v3345_v21  ;;  %v3409_v59 = vld [vmem:[#allocation6 + $0x7f0] sm:$0xff] }
 0x2fb   :  { %4881 = vmatpush2.bf16.msra.mxu1 %v6862_v2  ;;  %v7412_v2 = vld [vmem:[#allocation7 + $0x74] ss:$8 sps:$4 sm:$0xff]  }
 0x2fc   :  { %5010 = vmatpush2.bf16.msra.mxu0 %v6738_v29  ;;  %4882 = vmatprep.subr.bf16.mxu1 %v6855_v30  ;;  %v6808_v29 = vcombine.low %v3341_v20, %v3345_v21  ;;  %v6801_v30 = vcombine.high %v3333_v22, %v3337_v15  ;;  %v3397_v20 = vld [vmem:[#allocation6 + $0x790] sm:$0xff] }
 0x2fd   :  { %5011 = vmatprep.subr.bf16.mxu0 %v6731_v31  ;;  %v3325_v31 = vld [vmem:[#allocation6 + $0x550] sm:$0xff] }
 0x2fe   :  { %v6792_v38 = vcombine.low %v3325_v31, %v3329_v40  ;;  %v3401_v21 = vld [vmem:[#allocation6 + $0x7b0] sm:$0xff] }
 0x2ff   :  { %4883 = vmatpush2.bf16.msra.mxu1 %v6854_v34  ;;  %v6793_v34 = vcombine.high %v3325_v31, %v3329_v40  ;;  %v6865_v22 = vcombine.high %v3397_v20, %v3401_v21  ;;  %v3389_v15 = vld [vmem:[#allocation6 + $0x750] sm:$0xff]  ;;  %v6864_v31 = vcombine.low %v3397_v20, %v3401_v21  ;;  %v3326_v21 = vld [vmem:[#allocation6 + $0x558] sm:$0xff] }
 0x300   :  { %5012 = vmatpush2.bf16.msra.mxu0 %v6730_v35  ;;  %4884 = vmatprep.subr.bf16.mxu1 %v6847_v25  ;;  %v3317_v35 = vld [vmem:[#allocation6 + $0x510] sm:$0xff] }
 0x301   :  { %5013 = vmatprep.subr.bf16.mxu0 %v6723_v36  ;;  %v3321_v25 = vld [vmem:[#allocation6 + $0x530] sm:$0xff]  ;;  %v7413_v36 = vld [vmem:[#allocation7 + $0x60] ss:$8 sps:$4 sm:$0xff]  }
 0x302   :  { %v6785_v39 = vcombine.high %v3317_v35, %v3321_v25 }
 0x303   :  { %4885 = vmatpush2.bf16.msra.mxu1 %v6846_v44  ;;  %v3313_v44 = vld [vmem:[#allocation6 + $0x4f0] sm:$0xff] }
 0x304   :  { %5014 = vmatpush2.bf16.msra.mxu0 %v6722_v46  ;;  %4886 = vmatprep.subr.bf16.mxu1 %v6839_v47  ;;  %v7416_v46 = vld [vmem:[#allocation7 + $0x50] ss:$8 sps:$4 sm:$0xff]   ;;  %v7421_v47 = vld [vmem:[#allocation7 + $0x44] ss:$8 sps:$4 sm:$0xff]  }
 0x305   :  { %5015 = vmatprep.subr.bf16.mxu0 %v6715_v48  ;;  %v6777_v48 = vcombine.high %v3309_v41, %v3313_v44 }
 0x307   :  { %4887 = vmatpush2.bf16.msra.mxu1 %v6838_v0  ;;  %v6776_v0 = vcombine.low %v3309_v41, %v3313_v44 }
 0x308   :  { %5016 = vmatpush2.bf16.msra.mxu0 %v6714_v1  ;;  %4888 = vmatprep.subr.bf16.mxu1 %v6831_v3  ;;  %v6769_v1 = vcombine.high %v3301_v50, %v3305_v51  ;;  %v3293_v3 = vld [vmem:[#allocation6 + $0x450] sm:$0xff] }
 0x309   :  { %5017 = vmatprep.subr.bf16.mxu0 %v6707_v4  ;;  %v3297_v4 = vld [vmem:[#allocation6 + $0x470] sm:$0xff] }
 0x30a   :  { %v6761_v8 = vcombine.high %v3293_v3, %v3297_v4  ;;  %v6760_v12 = vcombine.low %v3293_v3, %v3297_v4 }
 0x30b   :  { %4889 = vmatpush2.bf16.msra.mxu1 %v6830_v13  ;;  %v3285_v13 = vld [vmem:[#allocation6 + $0x410] sm:$0xff] }
 0x30c   :  { %5018 = vmatpush2.bf16.msra.mxu0 %v6706_v9  ;;  %4890 = vmatprep.subr.bf16.mxu1 %v6823_v10  ;;  %v3289_v9 = vld [vmem:[#allocation6 + $0x430] sm:$0xff]  ;;  %v7425_v10 = vld [vmem:[#allocation7 + $0x20] ss:$8 sps:$4 sm:$0xff]  }
 0x30d   :  { %5019 = vmatprep.subr.bf16.mxu0 %v6699_v11  ;;  %v7430_v11 = vld [vmem:[#allocation7 + $0x14] ss:$8 sps:$4 sm:$0xff]   ;;  %v6753_v55 = vcombine.high %v3285_v13, %v3289_v9 }
 0x30f   :  { %4891 = vmatpush2.bf16.msra.mxu1 %v6822_v16  ;;  %v7428_v16 = vld [vmem:[#allocation7 + $0x10] ss:$8 sps:$4 sm:$0xff]  }
 0x310   :  { %5020 = vmatpush2.bf16.msra.mxu0 %v6698_v17  ;;  %4892 = vmatprep.subr.bf16.mxu1 %v6815_v43  ;;  %v7433_v17 = vld [vmem:[#allocation7 + $0x4] ss:$8 sps:$4 sm:$0xff]   ;;  %v6752_v43 = vcombine.low %v3285_v13, %v3289_v9 }
 0x311   :  { %5021 = vmatprep.subr.bf16.mxu0 %v6691_v19  ;;  %v6873_v19 = vcombine.high %v3405_v14, %v3409_v59 }
 0x313   :  { %4893 = vmatpush2.bf16.msra.mxu1 %v6814_v23  ;;  %v7431_v23 = vld [vmem:[#allocation7] ss:$8 sps:$4 sm:$0xff]  }
 0x314   :  { %5022 = vmatpush2.bf16.msra.mxu0 %v6690_v61  ;;  %4948 = vmatprep.subr.bf16.mxu1 %v6809_v28  ;;  %v7436_v61 = vld [vmem:[#allocation7 + $0xf4] ss:$8 sps:$4 sm:$0xff]   ;;  %v6872_v28 = vcombine.low %v3405_v14, %v3409_v59 }
 0x315   :  { %5881 = vmatprep.subr.bf16.mxu0 %v7412_v2  ;;  %v3393_v2 = vld [vmem:[#allocation6 + $0x770] sm:$0xff] }
 0x316   :  { %4895 = vmatmul.mubr.bf16.vlgmr.msra.gmra.mxu1 %v7949_v56  ;;  %v6857_v40 = vcombine.high %v3389_v15, %v3393_v2 }
 0x317   :  { %4949 = vmatpush1.bf16.msra.mxu1 %v6808_v29  ;;  %4980 = vmatprep.mubr.bf16.mxu1 %v7947_v53  ;;  %v7434_v29 = vld [vmem:[#allocation7 + $0xf0] ss:$8 sps:$4 sm:$0xff]  }
 0x318   :  { %5024 = vmatmul.mubr.bf16.vlgmr.msra.gmra.mxu0 %v7922_v63  ;;  %4950 = vmatprep.subr.bf16.mxu1 %v6801_v30  ;;  %v6784_v63 = vcombine.low %v3317_v35, %v3321_v25  ;;  %v7439_v30 = vld [vmem:[#allocation7 + $0xe4] ss:$8 sps:$4 sm:$0xff]   ;;  %v6856_v35 = vcombine.low %v3389_v15, %v3393_v2  ;;  %v3322_v15 = vld [vmem:[#allocation6 + $0x538] sm:$0xff] }
 0x319   :  { %5882 = vmatpush1.bf16.msra.mxu0 %v7410_v42  ;;  %v3381_v42 = vld [vmem:[#allocation6 + $0x710] sm:$0xff] }
 0x31a   :  { %5883 = vmatprep.subr.bf16.mxu0 %v7415_v45  ;;  %v3385_v45 = vld [vmem:[#allocation6 + $0x730] sm:$0xff] }
 0x31b   :  { %4951 = vmatpush1.bf16.msra.mxu1 %v6800_v32  ;;  %v7437_v32 = vld [vmem:[#allocation7 + $0xe0] ss:$8 sps:$4 sm:$0xff]   ;;  %v6849_v25 = vcombine.high %v3381_v42, %v3385_v45  ;;  %v6848_v41 = vcombine.low %v3381_v42, %v3385_v45  ;;  %v3302_v45 = vld [vmem:[#allocation6 + $0x498] sm:$0xff] }
 0x31c   :  { %4952 = vmatprep.subr.bf16.mxu1 %v6793_v34  ;;  %v7442_v34 = vld [vmem:[#allocation7 + $0xd4] ss:$8 sps:$4 sm:$0xff]  }
 0x31d   :  { %5884 = vmatpush1.bf16.msra.mxu0 %v7413_v36  ;;  %v3373_v36 = vld [vmem:[#allocation6 + $0x6d0] sm:$0xff] }
 0x31e   :  { %5885 = vmatprep.subr.bf16.mxu0 %v7418_v37  ;;  %v3377_v37 = vld [vmem:[#allocation6 + $0x6f0] sm:$0xff] }
 0x31f   :  { %4953 = vmatpush1.bf16.msra.mxu1 %v6792_v38  ;;  %v7440_v38 = vld [vmem:[#allocation7 + $0xd0] ss:$8 sps:$4 sm:$0xff]   ;;  %v6841_v44 = vcombine.high %v3373_v36, %v3377_v37  ;;  %v6840_v50 = vcombine.low %v3373_v36, %v3377_v37 }
 0x320   :  { %4954 = vmatprep.subr.bf16.mxu1 %v6785_v39  ;;  %v7445_v39 = vld [vmem:[#allocation7 + $0xc4] ss:$8 sps:$4 sm:$0xff]   ;;  %v3298_v36 = vld [vmem:[#allocation6 + $0x478] sm:$0xff] }
 0x321   :  { %5886 = vmatpush1.bf16.msra.mxu0 %v7416_v46  ;;  %v3365_v46 = vld [vmem:[#allocation6 + $0x690] sm:$0xff] }
 0x322   :  { %5887 = vmatprep.subr.bf16.mxu0 %v7421_v47  ;;  %v3369_v47 = vld [vmem:[#allocation6 + $0x6b0] sm:$0xff] }
 0x323   :  { %4955 = vmatpush1.bf16.msra.mxu1 %v6784_v63  ;;  %v7443_v63 = vld [vmem:[#allocation7 + $0xc0] ss:$8 sps:$4 sm:$0xff]   ;;  %v6833_v51 = vcombine.high %v3365_v46, %v3369_v47  ;;  %v6832_v3 = vcombine.low %v3365_v46, %v3369_v47  ;;  %v3406_v47 = vld [vmem:[#allocation6 + $0x7d8] sm:$0xff] }
 0x324   :  { %4956 = vmatprep.subr.bf16.mxu1 %v6777_v48  ;;  %v7448_v48 = vld [vmem:[#allocation7 + $0xb4] ss:$8 sps:$4 sm:$0xff]  }
 0x325   :  { %5888 = vmatpush1.bf16.msra.mxu0 %v7419_v58  ;;  %v3357_v58 = vld [vmem:[#allocation6 + $0x650] sm:$0xff] }
 0x326   :  { %5889 = vmatprep.subr.bf16.mxu0 %v7424_v60  ;;  %v3361_v60 = vld [vmem:[#allocation6 + $0x670] sm:$0xff] }
 0x327   :  { %4957 = vmatpush1.bf16.msra.mxu1 %v6776_v0  ;;  %v7446_v0 = vld [vmem:[#allocation7 + $0xb0] ss:$8 sps:$4 sm:$0xff]   ;;  %v6825_v4 = vcombine.high %v3357_v58, %v3361_v60  ;;  %v6824_v13 = vcombine.low %v3357_v58, %v3361_v60 }
 0x328   :  { %4958 = vmatprep.subr.bf16.mxu1 %v6769_v1  ;;  %v7451_v1 = vld [vmem:[#allocation7 + $0xa4] ss:$8 sps:$4 sm:$0xff]   ;;  %v3402_v58 = vld [vmem:[#allocation6 + $0x7b8] sm:$0xff] }
 0x329   :  { %5890 = vmatpush1.bf16.msra.mxu0 %v7422_v5  ;;  %v3349_v5 = vld [vmem:[#allocation6 + $0x610] sm:$0xff] }
 0x32a   :  { %5891 = vmatprep.subr.bf16.mxu0 %v7427_v6  ;;  %v3353_v6 = vld [vmem:[#allocation6 + $0x630] sm:$0xff] }
 0x32b   :  { %4959 = vmatpush1.bf16.msra.mxu1 %v6768_v7  ;;  %v7449_v7 = vld [vmem:[#allocation7 + $0xa0] ss:$8 sps:$4 sm:$0xff]   ;;  %v6817_v9 = vcombine.high %v3349_v5, %v3353_v6  ;;  %v6816_v14 = vcombine.low %v3349_v5, %v3353_v6  ;;  %v3382_v6 = vld [vmem:[#allocation6 + $0x718] sm:$0xff] }
 0x32c   :  { %4960 = vmatprep.subr.bf16.mxu1 %v6761_v8  ;;  %v7454_v8 = vld [vmem:[#allocation7 + $0x94] ss:$8 sps:$4 sm:$0xff]  }
 0x32d   :  { %5892 = vmatpush1.bf16.msra.mxu0 %v7425_v10  ;;  %v3342_v10 = vld [vmem:[#allocation6 + $0x5d8] sm:$0xff] }
 0x32e   :  { %5893 = vmatprep.subr.bf16.mxu0 %v7430_v11  ;;  %v3346_v11 = vld [vmem:[#allocation6 + $0x5f8] sm:$0xff] }
 0x32f   :  { %4961 = vmatpush1.bf16.msra.mxu1 %v6760_v12  ;;  %v7452_v12 = vld [vmem:[#allocation7 + $0x90] ss:$8 sps:$4 sm:$0xff]   ;;  %v6811_v59 = vcombine.high %v3342_v10, %v3346_v11 }
 0x330   :  { %4962 = vmatprep.subr.bf16.mxu1 %v6753_v55  ;;  %v7457_v55 = vld [vmem:[#allocation7 + $0x84] ss:$8 sps:$4 sm:$0xff]  }
 0x331   :  { %5894 = vmatpush1.bf16.msra.mxu0 %v7428_v16  ;;  %v3334_v16 = vld [vmem:[#allocation6 + $0x598] sm:$0xff] }
 0x332   :  { %5895 = vmatprep.subr.bf16.mxu0 %v7433_v17  ;;  %v3338_v17 = vld [vmem:[#allocation6 + $0x5b8] sm:$0xff] }
 0x333   :  { %4963 = vmatpush1.bf16.msra.mxu1 %v6752_v43  ;;  %v7455_v43 = vld [vmem:[#allocation7 + $0x80] ss:$8 sps:$4 sm:$0xff]   ;;  %v6803_v20 = vcombine.high %v3334_v16, %v3338_v17 }
 0x334   :  { %4964 = vmatprep.subr.bf16.mxu1 %v6873_v19  ;;  %v6810_v19 = vcombine.low %v3342_v10, %v3346_v11  ;;  %v3378_v10 = vld [vmem:[#allocation6 + $0x6f8] sm:$0xff] }
 0x335   :  { %5896 = vmatpush1.bf16.msra.mxu0 %v7431_v23  ;;  %v3330_v23 = vld [vmem:[#allocation6 + $0x578] sm:$0xff] }
 0x336   :  { %5897 = vmatprep.subr.bf16.mxu0 %v7436_v61  ;;  %v6802_v61 = vcombine.low %v3334_v16, %v3338_v17  ;;  %v6794_v2 = vcombine.low %v3326_v21, %v3330_v23  ;;  %v3358_v17 = vld [vmem:[#allocation6 + $0x658] sm:$0xff] }
 0x337   :  { %4965 = vmatpush2.bf16.msra.mxu1 %v6872_v28  ;;  %v6795_v28 = vcombine.high %v3326_v21, %v3330_v23  ;;  %v3350_v21 = vld [vmem:[#allocation6 + $0x618] sm:$0xff] }
 0x338   :  { %4966 = vmatprep.subr.bf16.mxu1 %v6865_v22  ;;  %v3318_v22 = vld [vmem:[#allocation6 + $0x518] sm:$0xff] }
 0x339   :  { %5898 = vmatpush2.bf16.msra.mxu0 %v7434_v29  ;;  %v6787_v29 = vcombine.high %v3318_v22, %v3322_v15  ;;  %v3354_v23 = vld [vmem:[#allocation6 + $0x638] sm:$0xff] }
 0x33a   :  { %5899 = vmatprep.subr.bf16.mxu0 %v7439_v30  ;;  %v3310_v30 = vld [vmem:[#allocation6 + $0x4d8] sm:$0xff] }
 0x33b   :  { %4967 = vmatpush2.bf16.msra.mxu1 %v6864_v31  ;;  %v3314_v31 = vld [vmem:[#allocation6 + $0x4f8] sm:$0xff] }
 0x33c   :  { %4968 = vmatprep.subr.bf16.mxu1 %v6857_v40  ;;  %v6786_v40 = vcombine.low %v3318_v22, %v3322_v15  ;;  %v6779_v42 = vcombine.high %v3310_v30, %v3314_v31  ;;  %v6819_v22 = vcombine.high %v3350_v21, %v3354_v23  ;;  %v6818_v15 = vcombine.low %v3350_v21, %v3354_v23  ;;  %v7484_v21 = vld [vmem:[#allocation7 + $0x1f4] ss:$8 sps:$4 sm:$0xff]   ;;  %v7518_v23 = vld [vmem:[#allocation7 + $0x230] ss:$8 sps:$4 sm:$0xff]  }
 0x33d   :  { %5900 = vmatpush2.bf16.msra.mxu0 %v7437_v32  ;;  %v3306_v32 = vld [vmem:[#allocation6 + $0x4b8] sm:$0xff] }
 0x33e   :  { %5901 = vmatprep.subr.bf16.mxu0 %v7442_v34  ;;  %v6778_v34 = vcombine.low %v3310_v30, %v3314_v31  ;;  %v6770_v37 = vcombine.low %v3302_v45, %v3306_v32  ;;  %v7970_v30 = vld [vmem:[%s8008_s6] sm:$0xff]  ;;  %v7458_v31 = vld [vmem:[#allocation7 + $0x170] ss:$8 sps:$4 sm:$0xff]  }
 0x33f   :  { %4969 = vmatpush2.bf16.msra.mxu1 %v6856_v35  ;;  %v6771_v35 = vcombine.high %v3302_v45, %v3306_v32  ;;  %v3420_v45 = vrot.slane %v7970_v30, %v7829_v24  ;;  %v3416_v32 = vrot.slane %v7970_v30, %v7832_v26 }
 0x340   :  { %4970 = vmatprep.subr.bf16.mxu1 %v6849_v25  ;;  %v3294_v25 = vld [vmem:[#allocation6 + $0x458] sm:$0xff] }
 0x341   :  { %5902 = vmatpush2.bf16.msra.mxu0 %v7440_v38  ;;  %v6763_v38 = vcombine.high %v3294_v25, %v3298_v36 }
 0x342   :  { %5903 = vmatprep.subr.bf16.mxu0 %v7445_v39  ;;  %v3286_v39 = vld [vmem:[#allocation6 + $0x418] sm:$0xff] }
 0x343   :  { %4971 = vmatpush2.bf16.msra.mxu1 %v6848_v41  ;;  %v3290_v41 = vld [vmem:[#allocation6 + $0x438] sm:$0xff] }
 0x344   :  { %4972 = vmatprep.subr.bf16.mxu1 %v6841_v44  ;;  %v6762_v44 = vcombine.low %v3294_v25, %v3298_v36  ;;  %v6755_v46 = vcombine.high %v3286_v39, %v3290_v41  ;;  %v7466_v36 = vld [vmem:[#allocation7 + $0x154] ss:$8 sps:$4 sm:$0xff]  }
 0x345   :  { %5904 = vmatpush2.bf16.msra.mxu0 %v7443_v63  ;;  %v3410_v63 = vld [vmem:[#allocation6 + $0x7f8] sm:$0xff] }
 0x346   :  { %5905 = vmatprep.subr.bf16.mxu0 %v7448_v48  ;;  %v6754_v48 = vcombine.low %v3286_v39, %v3290_v41  ;;  %v6874_v60 = vcombine.low %v3406_v47, %v3410_v63 }
 0x347   :  { %4973 = vmatpush2.bf16.msra.mxu1 %v6840_v50  ;;  %v6875_v50 = vcombine.high %v3406_v47, %v3410_v63  ;;  %v7464_v63 = vld [vmem:[#allocation7 + $0x150] ss:$8 sps:$4 sm:$0xff]  }
 0x348   :  { %4974 = vmatprep.subr.bf16.mxu1 %v6833_v51  ;;  %v3398_v51 = vld [vmem:[#allocation6 + $0x798] sm:$0xff] }
 0x349   :  { %5906 = vmatpush2.bf16.msra.mxu0 %v7446_v0  ;;  %v6867_v0 = vcombine.high %v3398_v51, %v3402_v58 }
 0x34a   :  { %5907 = vmatprep.subr.bf16.mxu0 %v7451_v1  ;;  %v3390_v1 = vld [vmem:[#allocation6 + $0x758] sm:$0xff] }
 0x34b   :  { %4975 = vmatpush2.bf16.msra.mxu1 %v6832_v3  ;;  %v3394_v3 = vld [vmem:[#allocation6 + $0x778] sm:$0xff] }
 0x34c   :  { %4976 = vmatprep.subr.bf16.mxu1 %v6825_v4  ;;  %v6866_v4 = vcombine.low %v3398_v51, %v3402_v58  ;;  %v6859_v5 = vcombine.high %v3390_v1, %v3394_v3 }
 0x34d   :  { %5908 = vmatpush2.bf16.msra.mxu0 %v7449_v7  ;;  %v3386_v7 = vld [vmem:[#allocation6 + $0x738] sm:$0xff] }
 0x34e   :  { %5909 = vmatprep.subr.bf16.mxu0 %v7454_v8  ;;  %v6858_v8 = vcombine.low %v3390_v1, %v3394_v3  ;;  %v6850_v11 = vcombine.low %v3382_v6, %v3386_v7  ;;  %v7467_v1 = vld [vmem:[#allocation7 + $0x140] ss:$8 sps:$4 sm:$0xff]  }
 0x34f   :  { %4977 = vmatpush2.bf16.msra.mxu1 %v6824_v13  ;;  %v6851_v13 = vcombine.high %v3382_v6, %v3386_v7  ;;  %v7506_v6 = vld [vmem:[#allocation7 + $0x270] ss:$8 sps:$4 sm:$0xff]  }
 0x350   :  { %4978 = vmatprep.subr.bf16.mxu1 %v6817_v9  ;;  %v3374_v9 = vld [vmem:[#allocation6 + $0x6d8] sm:$0xff] }
 0x351   :  { %5910 = vmatpush2.bf16.msra.mxu0 %v7452_v12  ;;  %v6843_v12 = vcombine.high %v3374_v9, %v3378_v10 }
 0x352   :  { %5911 = vmatprep.subr.bf16.mxu0 %v7457_v55  ;;  %v3366_v55 = vld [vmem:[#allocation6 + $0x698] sm:$0xff] }
 0x353   :  { %4979 = vmatpush2.bf16.msra.mxu1 %v6816_v14  ;;  %v3370_v14 = vld [vmem:[#allocation6 + $0x6b8] sm:$0xff] }
 0x354   :  { %5034 = vmatprep.subr.bf16.mxu1 %v6811_v59  ;;  %v6842_v59 = vcombine.low %v3374_v9, %v3378_v10  ;;  %v6835_v16 = vcombine.high %v3366_v55, %v3370_v14  ;;  %v7475_v9 = vld [vmem:[#allocation7 + $0x124] ss:$8 sps:$4 sm:$0xff]   ;;  %v7509_v10 = vld [vmem:[#allocation7 + $0x260] ss:$8 sps:$4 sm:$0xff]  }
 0x355   :  { %5912 = vmatpush2.bf16.msra.mxu0 %v7455_v43  ;;  %v3362_v43 = vld [vmem:[#allocation6 + $0x678] sm:$0xff] }
 0x356   :  { %4981 = vmatmul.mubr.bf16.vlgmr.msra.gmra.mxu1 %v7949_v56 }
 0x357   :  { %5035 = vmatpush1.bf16.msra.mxu1 %v6810_v19  ;;  %5066 = vmatprep.mubr.bf16.mxu1 %v7947_v53  ;;  %v7508_v53 = vld [vmem:[#allocation7 + $0x274] ss:$8 sps:$4 sm:$0xff]   ;;  %v6834_v19 = vcombine.low %v3366_v55, %v3370_v14  ;;  %v7512_v14 = vld [vmem:[#allocation7 + $0x250] ss:$8 sps:$4 sm:$0xff]  }
 0x358   :  { %5036 = vmatprep.subr.bf16.mxu1 %v6803_v20  ;;  %5967 = vmatprep.subr.bf16.mxu0 %v7508_v53  ;;  %v6827_v20 = vcombine.high %v3358_v17, %v3362_v43  ;;  %v7461_v53 = vld [vmem:[#allocation7 + $0x160] ss:$8 sps:$4 sm:$0xff]   ;;  %v7478_v55 = vld [vmem:[#allocation7 + $0x114] ss:$8 sps:$4 sm:$0xff]  }
 0x35b   :  { %5037 = vmatpush1.bf16.msra.mxu1 %v6802_v61  ;;  %v6826_v61 = vcombine.low %v3358_v17, %v3362_v43  ;;  %v7481_v17 = vld [vmem:[#allocation7 + $0x104] ss:$8 sps:$4 sm:$0xff]   ;;  %v7515_v43 = vld [vmem:[#allocation7 + $0x240] ss:$8 sps:$4 sm:$0xff]  }
 0x35c   :  { %5038 = vmatprep.subr.bf16.mxu1 %v6795_v28  ;;  %v4767_v28 = vpop.f32.mrf.mxu0 }
 0x35d   :  { %v4768_v39 = vadd.f32 %v4767_v28, %v3416_v32  ;;  %v7482_v28 = vld [vmem:[#allocation7 + $0x1f0] ss:$8 sps:$4 sm:$0xff]  }
 0x35f   :  { %5039 = vmatpush1.bf16.msra.mxu1 %v6794_v2  ;;  %v4769_v2 = vpop.f32.mrf.mxu0 }
 0x360   :  { %5040 = vmatprep.subr.bf16.mxu1 %v6787_v29  ;;  %v7460_v29 = vld [vmem:[#allocation7 + $0x174] ss:$8 sps:$4 sm:$0xff]  }
 0x363   :  { %5041 = vmatpush1.bf16.msra.mxu1 %v6786_v40  ;;  %v4771_v40 = vpop.f32.mrf.mxu0 }
 0x364   :  { %5042 = vmatprep.subr.bf16.mxu1 %v6779_v42  ;;  %v7463_v42 = vld [vmem:[#allocation7 + $0x164] ss:$8 sps:$4 sm:$0xff]  }
 0x367   :  { %5043 = vmatpush1.bf16.msra.mxu1 %v6778_v34 }
 0x368   :  { %5044 = vmatprep.subr.bf16.mxu1 %v6771_v35  ;;  %v4773_v35 = vpop.f32.mrf.mxu0 }
 0x36b   :  { %5045 = vmatpush1.bf16.msra.mxu1 %v6770_v37  ;;  %v4770_v37 = vadd.f32 %v4769_v2, %v3420_v45  ;;  %v7526_v2 = vld [vmem:[#allocation7 + $0x214] ss:$8 sps:$4 sm:$0xff]  }
 0x36c   :  { %5046 = vmatprep.subr.bf16.mxu1 %v6763_v38  ;;  %v4772_v38 = vadd.f32 %v4771_v40, %v3416_v32  ;;  %v7524_v40 = vld [vmem:[#allocation7 + $0x210] ss:$8 sps:$4 sm:$0xff]   ;;  %v7493_v32 = vld [vmem:[#allocation7 + $0x1c4] ss:$8 sps:$4 sm:$0xff]  }
 0x36f   :  { %5047 = vmatpush1.bf16.msra.mxu1 %v6762_v44  ;;  %v4774_v44 = vadd.f32 %v4773_v35, %v3420_v45  ;;  %v7488_v45 = vld [vmem:[#allocation7 + $0x1d0] ss:$8 sps:$4 sm:$0xff]   ;;  %v7491_v35 = vld [vmem:[#allocation7 + $0x1c0] ss:$8 sps:$4 sm:$0xff]  }
 0x370   :  { %5048 = vmatprep.subr.bf16.mxu1 %v6755_v46 }
 0x373   :  { %5049 = vmatpush1.bf16.msra.mxu1 %v6754_v48 }
 0x374   :  { %5050 = vmatprep.subr.bf16.mxu1 %v6875_v50 }
 0x377   :  { %5051 = vmatpush2.bf16.msra.mxu1 %v6874_v60 }
 0x378   :  { %5052 = vmatprep.subr.bf16.mxu1 %v6867_v0 }
 0x37b   :  { %5053 = vmatpush2.bf16.msra.mxu1 %v6866_v4  ;;  %v7472_v4 = vld [vmem:[#allocation7 + $0x134] ss:$8 sps:$4 sm:$0xff]  }
 0x37c   :  { %5054 = vmatprep.subr.bf16.mxu1 %v6859_v5 }
 0x37f   :  { %5055 = vmatpush2.bf16.msra.mxu1 %v6858_v8  ;;  %v7511_v8 = vld [vmem:[#allocation7 + $0x264] ss:$8 sps:$4 sm:$0xff]  }
 0x380   :  { %5056 = vmatprep.subr.bf16.mxu1 %v6851_v13  ;;  %v7470_v13 = vld [vmem:[#allocation7 + $0x130] ss:$8 sps:$4 sm:$0xff]  }
 0x383   :  { %5057 = vmatpush2.bf16.msra.mxu1 %v6850_v11  ;;  %v7514_v11 = vld [vmem:[#allocation7 + $0x254] ss:$8 sps:$4 sm:$0xff]  }
 0x384   :  { %5058 = vmatprep.subr.bf16.mxu1 %v6843_v12  ;;  %v7473_v12 = vld [vmem:[#allocation7 + $0x120] ss:$8 sps:$4 sm:$0xff]  }
 0x387   :  { %5059 = vmatpush2.bf16.msra.mxu1 %v6842_v59  ;;  %v7517_v59 = vld [vmem:[#allocation7 + $0x244] ss:$8 sps:$4 sm:$0xff]  }
 0x388   :  { %5060 = vmatprep.subr.bf16.mxu1 %v6835_v16  ;;  %v7476_v16 = vld [vmem:[#allocation7 + $0x110] ss:$8 sps:$4 sm:$0xff]  }
 0x38b   :  { %5061 = vmatpush2.bf16.msra.mxu1 %v6834_v19  ;;  %v7520_v19 = vld [vmem:[#allocation7 + $0x234] ss:$8 sps:$4 sm:$0xff]  }
 0x38c   :  { %5062 = vmatprep.subr.bf16.mxu1 %v6827_v20  ;;  %v7479_v20 = vld [vmem:[#allocation7 + $0x100] ss:$8 sps:$4 sm:$0xff]  }
 0x38f   :  { %5063 = vmatpush2.bf16.msra.mxu1 %v6826_v61  ;;  %v7523_v61 = vld [vmem:[#allocation7 + $0x224] ss:$8 sps:$4 sm:$0xff]  }
 0x390   :  { %5064 = vmatprep.subr.bf16.mxu1 %v6819_v22  ;;  %v7487_v22 = vld [vmem:[#allocation7 + $0x1e4] ss:$8 sps:$4 sm:$0xff]  }
 0x393   :  { %5065 = vmatpush2.bf16.msra.mxu1 %v6818_v15  ;;  %v7521_v15 = vld [vmem:[#allocation7 + $0x220] ss:$8 sps:$4 sm:$0xff]  }
 0x394   :  { %5924 = vmatprep.subr.bf16.mxu1 %v7460_v29  ;;  %v7485_v29 = vld [vmem:[#allocation7 + $0x1e0] ss:$8 sps:$4 sm:$0xff]  }
 0x396   :  { %5067 = vmatmul.mubr.bf16.vlgmr.msra.gmra.mxu1 %v7949_v56  ;;  %v4810_v34 = vpop.f32.mrf.mxu1  ;;  %v7469_v56 = vld [vmem:[#allocation7 + $0x144] ss:$8 sps:$4 sm:$0xff]  }
 0x397   :  { %5925 = vmatpush1.bf16.msra.mxu1 %v7458_v31  ;;  %v4811_v48 = vadd.f32 %v4810_v34, %v4768_v39  ;;  %v7490_v31 = vld [vmem:[#allocation7 + $0x1d4] ss:$8 sps:$4 sm:$0xff]   ;;  %v7527_v34 = vld [vmem:[#allocation7 + $0x200] ss:$8 sps:$4 sm:$0xff]   ;;  %v7499_v39 = vld [vmem:[#allocation7 + $0x1a4] ss:$8 sps:$4 sm:$0xff]  }
 0x398   :  { %v4812_v25 = vpop.f32.mrf.mxu1  ;;  %5926 = vmatprep.subr.bf16.mxu1 %v7463_v42  ;;  %v7529_v42 = vld [vmem:[#allocation7 + $0x204] ss:$8 sps:$4 sm:$0xff]  }
 0x399   :  { %v4813_v46 = vadd.f32 %v4812_v25, %v4770_v37  ;;  %v5077_v3 = vmax.f32 %v4811_v48, 0.0  ;;  %v7496_v25 = vld [vmem:[#allocation7 + $0x1b4] ss:$8 sps:$4 sm:$0xff]   ;;  %v7535_v37 = vld [vmem:[#allocation7 + $0x2e4] ss:$8 sps:$4 sm:$0xff]  }
 0x39a   :  { %v4814_v41 = vpop.f32.mrf.mxu1  ;;  %v7541_v48 = vld [vmem:[#allocation7 + $0x2c4] ss:$8 sps:$4 sm:$0xff]  }
 0x39b   :  { %v4815_v47 = vadd.f32 %v4814_v41, %v4772_v38  ;;  %5927 = vmatpush1.bf16.msra.mxu1 %v7461_v53  ;;  %v5078_v60 = vmax.f32 %v4813_v46, 0.0  ;;  %v7532_v53 = vld [vmem:[#allocation7 + $0x2f4] ss:$8 sps:$4 sm:$0xff]   ;;  %v7494_v38 = vld [vmem:[#allocation7 + $0x1b0] ss:$8 sps:$4 sm:$0xff]  }
 0x39c   :  { %v4816_v50 = vpop.f32.mrf.mxu1  ;;  %5928 = vmatprep.subr.bf16.mxu1 %v7466_v36  ;;  %v7530_v36 = vld [vmem:[#allocation7 + $0x2f0] ss:$8 sps:$4 sm:$0xff]   ;;  %v7533_v41 = vld [vmem:[#allocation7 + $0x2e0] ss:$8 sps:$4 sm:$0xff]  }
 0x39d   :  { %v4817_v51 = vadd.f32 %v4816_v50, %v4774_v44  ;;  %v5085_v58 = vmax.f32 %v4815_v47, 0.0  ;;  %v7538_v44 = vld [vmem:[#allocation7 + $0x2d4] ss:$8 sps:$4 sm:$0xff]   ;;  %v7497_v46 = vld [vmem:[#allocation7 + $0x1a0] ss:$8 sps:$4 sm:$0xff]  }
 0x39e   :  { %v7502_v47 = vld [vmem:[#allocation7 + $0x194] ss:$8 sps:$4 sm:$0xff]   ;;  %v7500_v50 = vld [vmem:[#allocation7 + $0x190] ss:$8 sps:$4 sm:$0xff]  }
 0x39f   :  { %v5086_v0 = vmax.f32 %v4817_v51, 0.0  ;;  %5929 = vmatpush1.bf16.msra.mxu1 %v7464_v63  ;;  %v5093_v7 = vpack.c.bf16 %v5085_v58, %v5077_v3  ;;  %v7536_v63 = vld [vmem:[#allocation7 + $0x2d0] ss:$8 sps:$4 sm:$0xff]   ;;  %v7505_v51 = vld [vmem:[#allocation7 + $0x184] ss:$8 sps:$4 sm:$0xff]  }
 0x3a0   :  { %5930 = vmatprep.subr.bf16.mxu1 %v7469_v56  ;;  %v4853_v56 = vpop.f32.mrf.mxu0  ;;  %v7539_v58 = vld [vmem:[#allocation7 + $0x2c0] ss:$8 sps:$4 sm:$0xff]   ;;  %v7556_v3 = vld [vmem:[#allocation7 + $0x374] ss:$8 sps:$4 sm:$0xff]  }
 0x3a1   :  { %v5094_v5 = vpack.c.bf16 %v5086_v0, %v5078_v60  ;;  %v7544_v60 = vld [vmem:[#allocation7 + $0x2b4] ss:$8 sps:$4 sm:$0xff]   ;;  %v7503_v0 = vld [vmem:[#allocation7 + $0x180] ss:$8 sps:$4 sm:$0xff]  }
 0x3a3   :  { %5913 = vmatprep.mubr.bf16.mxu0 %v5094_v5  ;;  %5931 = vmatpush1.bf16.msra.mxu1 %v7467_v1  ;;  %v4855_v1 = vpop.f32.mrf.mxu0  ;;  %v7547_v5 = vld [vmem:[#allocation7 + $0x2a4] ss:$8 sps:$4 sm:$0xff]  }
 0x3a4   :  { %5914 = vmatmul.mubr.bf16.vlgmr.msra.gmra.mxu0 %v5093_v7  ;;  %5932 = vmatprep.subr.bf16.mxu1 %v7472_v4  ;;  %v7542_v4 = vld [vmem:[#allocation7 + $0x2b0] ss:$8 sps:$4 sm:$0xff]   ;;  %v3428_v7 = vrot.slane %v7970_v30, %v7835_v27 }
 0x3a5   :  { %5968 = vmatpush1.bf16.msra.mxu0 %v7506_v6  ;;  %v4857_v6 = vpop.f32.mrf.mxu0 }
 0x3a6   :  { %5969 = vmatprep.subr.bf16.mxu0 %v7511_v8  ;;  %v7545_v8 = vld [vmem:[#allocation7 + $0x2a0] ss:$8 sps:$4 sm:$0xff]  }
 0x3a7   :  { %5933 = vmatpush1.bf16.msra.mxu1 %v7470_v13  ;;  %v3424_v13 = vrot.slane %v7970_v30, %v7843_v62  ;;  %v7551_v62 = vld [vmem:[#allocation7 + $0x280] ss:$8 sps:$4 sm:$0xff]  }
 0x3a8   :  { %5934 = vmatprep.subr.bf16.mxu1 %v7475_v9 }
 0x3a9   :  { %5970 = vmatpush1.bf16.msra.mxu0 %v7509_v10  ;;  %v7550_v10 = vld [vmem:[#allocation7 + $0x294] ss:$8 sps:$4 sm:$0xff]  }
 0x3aa   :  { %5971 = vmatprep.subr.bf16.mxu0 %v7514_v11  ;;  %v4859_v11 = vpop.f32.mrf.mxu0 }
 0x3ab   :  { %5935 = vmatpush1.bf16.msra.mxu1 %v7473_v12 }
 0x3ac   :  { %5936 = vmatprep.subr.bf16.mxu1 %v7478_v55  ;;  %v4856_v55 = vadd.f32 %v4855_v1, %v3428_v7  ;;  %v7592_v1 = vld [vmem:[#allocation7 + $0x3b4] ss:$8 sps:$4 sm:$0xff]  }
 0x3ad   :  { %5972 = vmatpush1.bf16.msra.mxu0 %v7512_v14  ;;  %v4858_v14 = vadd.f32 %v4857_v6, %v3424_v13 }
 0x3ae   :  { %5973 = vmatprep.subr.bf16.mxu0 %v7517_v59  ;;  %v7548_v59 = vld [vmem:[#allocation7 + $0x290] ss:$8 sps:$4 sm:$0xff]  }
 0x3af   :  { %5937 = vmatpush1.bf16.msra.mxu1 %v7476_v16  ;;  %v4854_v16 = vadd.f32 %v4853_v56, %v3424_v13  ;;  %v7586_v56 = vld [vmem:[#allocation7 + $0x3d4] ss:$8 sps:$4 sm:$0xff]   ;;  %v3432_v13 = vrot.slane %v7970_v30, %v295_v52  ;;  %v7599_v52 = vld [vmem:[#allocation7 + $0x380] ss:$8 sps:$4 sm:$0xff]  }
 0x3b0   :  { %5938 = vmatprep.subr.bf16.mxu1 %v7481_v17 }
 0x3b1   :  { %5974 = vmatpush1.bf16.msra.mxu0 %v7515_v43  ;;  %v7553_v43 = vld [vmem:[#allocation7 + $0x284] ss:$8 sps:$4 sm:$0xff]  }
 0x3b2   :  { %5975 = vmatprep.subr.bf16.mxu0 %v7520_v19  ;;  %v4860_v19 = vadd.f32 %v4859_v11, %v3428_v7  ;;  %v3436_v7 = vrot.slane %v7970_v30, %v299_v18 }
 0x3b3   :  { %5939 = vmatpush1.bf16.msra.mxu1 %v7479_v20 }
 0x3b4   :  { %5940 = vmatprep.subr.bf16.mxu1 %v7484_v21 }
 0x3b5   :  { %5976 = vmatpush1.bf16.msra.mxu0 %v7518_v23 }
 0x3b6   :  { %5977 = vmatprep.subr.bf16.mxu0 %v7523_v61 }
 0x3b7   :  { %5941 = vmatpush2.bf16.msra.mxu1 %v7482_v28 }
 0x3b8   :  { %5942 = vmatprep.subr.bf16.mxu1 %v7487_v22 }
 0x3b9   :  { %5978 = vmatpush1.bf16.msra.mxu0 %v7521_v15 }
 0x3ba   :  { %5979 = vmatprep.subr.bf16.mxu0 %v7526_v2 }
 0x3bb   :  { %5943 = vmatpush2.bf16.msra.mxu1 %v7485_v29 }
 0x3bc   :  { %5944 = vmatprep.subr.bf16.mxu1 %v7490_v31  ;;  %v7554_v31 = vld [vmem:[#allocation7 + $0x370] ss:$8 sps:$4 sm:$0xff]  }
 0x3bd   :  { %5980 = vmatpush1.bf16.msra.mxu0 %v7524_v40 }
 0x3be   :  { %5981 = vmatprep.subr.bf16.mxu0 %v7529_v42  ;;  %v7559_v42 = vld [vmem:[#allocation7 + $0x364] ss:$8 sps:$4 sm:$0xff]  }
 0x3bf   :  { %5945 = vmatpush2.bf16.msra.mxu1 %v7488_v45  ;;  %v7557_v45 = vld [vmem:[#allocation7 + $0x360] ss:$8 sps:$4 sm:$0xff]  }
 0x3c0   :  { %5946 = vmatprep.subr.bf16.mxu1 %v7493_v32  ;;  %v7562_v32 = vld [vmem:[#allocation7 + $0x354] ss:$8 sps:$4 sm:$0xff]  }
 0x3c1   :  { %5982 = vmatpush1.bf16.msra.mxu0 %v7527_v34  ;;  %v7560_v34 = vld [vmem:[#allocation7 + $0x350] ss:$8 sps:$4 sm:$0xff]  }
 0x3c2   :  { %5983 = vmatprep.subr.bf16.mxu0 %v7532_v53  ;;  %v7565_v53 = vld [vmem:[#allocation7 + $0x344] ss:$8 sps:$4 sm:$0xff]  }
 0x3c3   :  { %5947 = vmatpush2.bf16.msra.mxu1 %v7491_v35  ;;  %v7563_v35 = vld [vmem:[#allocation7 + $0x340] ss:$8 sps:$4 sm:$0xff]  }
 0x3c4   :  { %5948 = vmatprep.subr.bf16.mxu1 %v7496_v25  ;;  %v7568_v25 = vld [vmem:[#allocation7 + $0x334] ss:$8 sps:$4 sm:$0xff]  }
 0x3c5   :  { %5984 = vmatpush2.bf16.msra.mxu0 %v7530_v36  ;;  %v7566_v36 = vld [vmem:[#allocation7 + $0x330] ss:$8 sps:$4 sm:$0xff]  }
 0x3c6   :  { %5985 = vmatprep.subr.bf16.mxu0 %v7535_v37  ;;  %v7571_v37 = vld [vmem:[#allocation7 + $0x324] ss:$8 sps:$4 sm:$0xff]  }
 0x3c7   :  { %5949 = vmatpush2.bf16.msra.mxu1 %v7494_v38  ;;  %v7569_v38 = vld [vmem:[#allocation7 + $0x320] ss:$8 sps:$4 sm:$0xff]  }
 0x3c8   :  { %5950 = vmatprep.subr.bf16.mxu1 %v7499_v39  ;;  %v7574_v39 = vld [vmem:[#allocation7 + $0x314] ss:$8 sps:$4 sm:$0xff]  }
 0x3c9   :  { %5986 = vmatpush2.bf16.msra.mxu0 %v7533_v41  ;;  %v7572_v41 = vld [vmem:[#allocation7 + $0x310] ss:$8 sps:$4 sm:$0xff]  }
 0x3ca   :  { %5987 = vmatprep.subr.bf16.mxu0 %v7538_v44  ;;  %v7577_v44 = vld [vmem:[#allocation7 + $0x304] ss:$8 sps:$4 sm:$0xff]  }
 0x3cb   :  { %5951 = vmatpush2.bf16.msra.mxu1 %v7497_v46  ;;  %v7575_v46 = vld [vmem:[#allocation7 + $0x300] ss:$8 sps:$4 sm:$0xff]  }
 0x3cc   :  { %5952 = vmatprep.subr.bf16.mxu1 %v7502_v47  ;;  %v7580_v47 = vld [vmem:[#allocation7 + $0x3f4] ss:$8 sps:$4 sm:$0xff]  }
 0x3cd   :  { %5988 = vmatpush2.bf16.msra.mxu0 %v7536_v63  ;;  %v7578_v63 = vld [vmem:[#allocation7 + $0x3f0] ss:$8 sps:$4 sm:$0xff]  }
 0x3ce   :  { %5989 = vmatprep.subr.bf16.mxu0 %v7541_v48  ;;  %v7583_v48 = vld [vmem:[#allocation7 + $0x3e4] ss:$8 sps:$4 sm:$0xff]  }
 0x3cf   :  { %5953 = vmatpush2.bf16.msra.mxu1 %v7500_v50  ;;  %v7581_v50 = vld [vmem:[#allocation7 + $0x3e0] ss:$8 sps:$4 sm:$0xff]  }
 0x3d0   :  { %5954 = vmatprep.subr.bf16.mxu1 %v7505_v51  ;;  %v7584_v51 = vld [vmem:[#allocation7 + $0x3d0] ss:$8 sps:$4 sm:$0xff]  }
 0x3d1   :  { %5990 = vmatpush2.bf16.msra.mxu0 %v7539_v58  ;;  %v7589_v58 = vld [vmem:[#allocation7 + $0x3c4] ss:$8 sps:$4 sm:$0xff]  }
 0x3d2   :  { %5991 = vmatprep.subr.bf16.mxu0 %v7544_v60  ;;  %v4939_v60 = vpop.f32.mrf.mxu0 }
 0x3d3   :  { %5955 = vmatpush2.bf16.msra.mxu1 %v7503_v0  ;;  %v7587_v0 = vld [vmem:[#allocation7 + $0x3c0] ss:$8 sps:$4 sm:$0xff]  }
 0x3d4   :  { %6010 = vmatprep.subr.bf16.mxu1 %v7556_v3  ;;  %v4941_v3 = vpop.f32.mrf.mxu0 }
 0x3d5   :  { %5992 = vmatpush2.bf16.msra.mxu0 %v7542_v4  ;;  %v7590_v4 = vld [vmem:[#allocation7 + $0x3b0] ss:$8 sps:$4 sm:$0xff]  }
 0x3d6   :  { %v4896_v9 = vpop.f32.mrf.mxu1  ;;  %5993 = vmatprep.subr.bf16.mxu0 %v7547_v5  ;;  %v7595_v5 = vld [vmem:[#allocation7 + $0x3a4] ss:$8 sps:$4 sm:$0xff]   ;;  %v4943_v6 = vpop.f32.mrf.mxu0 }
 0x3d7   :  { %v4897_v21 = vadd.f32 %v4896_v9, %v4854_v16  ;;  %v4940_v16 = vadd.f32 %v4939_v60, %v3432_v13  ;;  %v5229_v60 = vld [vmem:[%s8010_s8] sm:$0x3] }
 0x3d8   :  { %v4898_v12 = vpop.f32.mrf.mxu1  ;;  %v4945_v11 = vpop.f32.mrf.mxu0 }
 0x3d9   :  { %5994 = vmatpush2.bf16.msra.mxu0 %v7545_v8  ;;  %v4899_v27 = vadd.f32 %v4898_v12, %v4856_v55  ;;  %v5079_v2 = vmax.f32 %v4897_v21, 0.0  ;;  %v7593_v8 = vld [vmem:[#allocation7 + $0x3a0] ss:$8 sps:$4 sm:$0xff]   ;;  %v4942_v55 = vadd.f32 %v4941_v3, %v3436_v7  ;;  %v4946_v18 = vadd.f32 %v4945_v11, %v3436_v7 }
 0x3da   :  { %v4900_v17 = vpop.f32.mrf.mxu1  ;;  %5995 = vmatprep.subr.bf16.mxu0 %v7550_v10  ;;  %v7598_v10 = vld [vmem:[#allocation7 + $0x394] ss:$8 sps:$4 sm:$0xff]  }
 0x3db   :  { %v4901_v20 = vadd.f32 %v4900_v17, %v4858_v14  ;;  %v5080_v22 = vmax.f32 %v4899_v27, 0.0  ;;  %v4944_v14 = vadd.f32 %v4943_v6, %v3432_v13 }
 0x3dc   :  { %v4902_v23 = vpop.f32.mrf.mxu1 }
 0x3dd   :  { %v4903_v61 = vadd.f32 %v4902_v23, %v4860_v19  ;;  %5996 = vmatpush2.bf16.msra.mxu0 %v7548_v59  ;;  %v5087_v28 = vmax.f32 %v4901_v20, 0.0  ;;  %v7596_v59 = vld [vmem:[#allocation7 + $0x390] ss:$8 sps:$4 sm:$0xff]  }
 0x3de   :  { %5997 = vmatprep.subr.bf16.mxu0 %v7553_v43  ;;  %v7601_v43 = vld [vmem:[#allocation7 + $0x384] ss:$8 sps:$4 sm:$0xff]  }
 0x3df   :  { %v5088_v15 = vmax.f32 %v4903_v61, 0.0  ;;  %v5095_v40 = vpack.c.bf16 %v5087_v28, %v5079_v2 }
 0x3e1   :  { %v5096_v29 = vpack.c.bf16 %v5088_v15, %v5080_v22  ;;  %5998 = vmatpush2.bf16.msra.mxu0 %v7551_v62 }
 0x3e3   :  { %5956 = vmatprep.mubr.bf16.mxu1 %v5096_v29  ;;  %v5025_v29 = vpop.f32.mrf.mxu0 }
 0x3e4   :  { %5957 = vmatmul.mubr.bf16.vlgmr.msra.gmra.mxu1 %v5095_v40 }
 0x3e5   :  { %6011 = vmatpush1.bf16.msra.mxu1 %v7554_v31  ;;  %v5027_v31 = vpop.f32.mrf.mxu0 }
 0x3e6   :  { %6012 = vmatprep.subr.bf16.mxu1 %v7559_v42  ;;  %v3444_v42 = vrot.slane %v7970_v30, %v307_v54 }
 0x3e7   :  { %v5029_v40 = vpop.f32.mrf.mxu0 }
 0x3e9   :  { %6013 = vmatpush1.bf16.msra.mxu1 %v7557_v45  ;;  %v3440_v45 = vrot.slane %v7970_v30, %v303_v57 }
 0x3ea   :  { %6014 = vmatprep.subr.bf16.mxu1 %v7562_v32 }
 0x3ed   :  { %6015 = vmatpush1.bf16.msra.mxu1 %v7560_v34  ;;  %v5031_v34 = vpop.f32.mrf.mxu0 }
 0x3ee   :  { %6016 = vmatprep.subr.bf16.mxu1 %v7565_v53 }
 0x3f1   :  { %6017 = vmatpush1.bf16.msra.mxu1 %v7563_v35  ;;  %v5028_v35 = vadd.f32 %v5027_v31, %v3444_v42 }
 0x3f2   :  { %6018 = vmatprep.subr.bf16.mxu1 %v7568_v25  ;;  %v5030_v25 = vadd.f32 %v5029_v40, %v3440_v45 }
 0x3f5   :  { %6019 = vmatpush1.bf16.msra.mxu1 %v7566_v36  ;;  %v5026_v36 = vadd.f32 %v5025_v29, %v3440_v45 }
 0x3f6   :  { %6020 = vmatprep.subr.bf16.mxu1 %v7571_v37 }
 0x3f9   :  { %6021 = vmatpush1.bf16.msra.mxu1 %v7569_v38  ;;  %v5032_v38 = vadd.f32 %v5031_v34, %v3444_v42 }
 0x3fa   :  { %6022 = vmatprep.subr.bf16.mxu1 %v7574_v39 }
 0x3fd   :  { %6023 = vmatpush1.bf16.msra.mxu1 %v7572_v41 }
 0x3fe   :  { %6024 = vmatprep.subr.bf16.mxu1 %v7577_v44 }
 0x401   :  { %6025 = vmatpush1.bf16.msra.mxu1 %v7575_v46 }
 0x402   :  { %6026 = vmatprep.subr.bf16.mxu1 %v7580_v47 }
 0x405   :  { %6027 = vmatpush2.bf16.msra.mxu1 %v7578_v63 }
 0x406   :  { %6028 = vmatprep.subr.bf16.mxu1 %v7583_v48 }
 0x409   :  { %6029 = vmatpush2.bf16.msra.mxu1 %v7581_v50 }
 0x40a   :  { %6030 = vmatprep.subr.bf16.mxu1 %v7586_v56 }
 0x40d   :  { %6031 = vmatpush2.bf16.msra.mxu1 %v7584_v51 }
 0x40e   :  { %6032 = vmatprep.subr.bf16.mxu1 %v7589_v58 }
 0x411   :  { %6033 = vmatpush2.bf16.msra.mxu1 %v7587_v0 }
 0x412   :  { %6034 = vmatprep.subr.bf16.mxu1 %v7592_v1 }
 0x415   :  { %6035 = vmatpush2.bf16.msra.mxu1 %v7590_v4  ;;  %v5234_v4 = vrot.slane %v5229_v60, %v7832_v26 }
 0x416   :  { %v4982_v9 = vpop.f32.mrf.mxu1  ;;  %6036 = vmatprep.subr.bf16.mxu1 %v7595_v5  ;;  %v5238_v5 = vrot.slane %v5229_v60, %v7829_v24 }
 0x417   :  { %v4983_v20 = vadd.f32 %v4982_v9, %v4940_v16 }
 0x418   :  { %v4984_v12 = vpop.f32.mrf.mxu1 }
 0x419   :  { %6037 = vmatpush2.bf16.msra.mxu1 %v7593_v8  ;;  %v4985_v19 = vadd.f32 %v4984_v12, %v4942_v55  ;;  %v5081_v22 = vmax.f32 %v4983_v20, 0.0 }
 0x41a   :  { %v4986_v17 = vpop.f32.mrf.mxu1  ;;  %6038 = vmatprep.subr.bf16.mxu1 %v7598_v10 }
 0x41b   :  { %v4987_v27 = vadd.f32 %v4986_v17, %v4944_v14  ;;  %v5082_v62 = vmax.f32 %v4985_v19, 0.0 }
 0x41c   :  { %v4988_v21 = vpop.f32.mrf.mxu1 }
 0x41d   :  { %v4989_v23 = vadd.f32 %v4988_v21, %v4946_v18  ;;  %6039 = vmatpush2.bf16.msra.mxu1 %v7596_v59  ;;  %v5089_v61 = vmax.f32 %v4987_v27, 0.0 }
 0x41e   :  { %6040 = vmatprep.subr.bf16.mxu1 %v7601_v43 }
 0x41f   :  { %v5090_v28 = vmax.f32 %v4989_v23, 0.0  ;;  %v5097_v2 = vpack.c.bf16 %v5089_v61, %v5081_v22 }
 0x421   :  { %v5098_v15 = vpack.c.bf16 %v5090_v28, %v5082_v62  ;;  %6041 = vmatpush2.bf16.msra.mxu1 %v7599_v52 }
 0x423   :  { %5999 = vmatprep.mubr.bf16.mxu0 %v5098_v15 }
 0x424   :  { %6000 = vmatmul.mubr.bf16.vlgmr.msra.gmra.mxu0 %v5097_v2 }
 0x456   :  { %v5068_v32 = vpop.f32.mrf.mxu1 }
 0x457   :  { %v5069_v44 = vadd.f32 %v5068_v32, %v5026_v36 }
 0x458   :  { %v5070_v53 = vpop.f32.mrf.mxu1 }
 0x459   :  { %v5071_v39 = vadd.f32 %v5070_v53, %v5028_v35  ;;  %v5083_v50 = vmax.f32 %v5069_v44, 0.0 }
 0x45a   :  { %v5072_v37 = vpop.f32.mrf.mxu1 }
 0x45b   :  { %v5073_v41 = vadd.f32 %v5072_v37, %v5030_v25  ;;  %v5084_v48 = vmax.f32 %v5071_v39, 0.0 }
 0x45c   :  { %v5074_v46 = vpop.f32.mrf.mxu1 }
 0x45d   :  { %v5075_v47 = vadd.f32 %v5074_v46, %v5032_v38  ;;  %v5091_v63 = vmax.f32 %v5073_v41, 0.0 }
 0x45f   :  { %v5092_v54 = vmax.f32 %v5075_v47, 0.0  ;;  %v5099_v56 = vpack.c.bf16 %v5091_v63, %v5083_v50 }
 0x461   :  { %v5100_v49 = vpack.c.bf16 %v5092_v54, %v5084_v48 }
 0x463   :  { %6042 = vmatprep.mubr.bf16.mxu1 %v5100_v49 }
 0x464   :  { %6043 = vmatmul.mubr.bf16.vlgmr.msra.gmra.mxu1 %v5099_v56  ;;  %v5915_v57 = vpop.f32.mrf.mxu0 }
 0x465   :  { %v5916_v8 = vadd.f32 %v5915_v57, %v5234_v4 }
 0x466   :  { %v5917_v30 = vpop.f32.mrf.mxu0 }
 0x467   :  { %v5918_v13 = vadd.f32 %v5917_v30, %v5238_v5 }
 0x468   :  { %v5919_v51 = vpop.f32.mrf.mxu0 }
 0x469   :  { %v5920_v12 = vadd.f32 %v5919_v51, %v5234_v4 }
 0x46a   :  { %v5921_v0 = vpop.f32.mrf.mxu0 }
 0x46b   :  { %v5922_v16 = vadd.f32 %v5921_v0, %v5238_v5 }
 0x4a4   :  { %v5958_v58 = vpop.f32.mrf.mxu1 }
 0x4a5   :  { %v5959_v9 = vadd.f32 %v5958_v58, %v5916_v8 }
 0x4a6   :  { %v5960_v1 = vpop.f32.mrf.mxu1 }
 0x4a7   :  { %v5961_v55 = vadd.f32 %v5960_v1, %v5918_v13 }
 0x4a8   :  { %v5962_v6 = vpop.f32.mrf.mxu1 }
 0x4a9   :  { %v5963_v17 = vadd.f32 %v5962_v6, %v5920_v12 }
 0x4aa   :  { %v5964_v10 = vpop.f32.mrf.mxu1 }
 0x4ab   :  { %v5965_v26 = vadd.f32 %v5964_v10, %v5922_v16 }
 0x4e4   :  { %v6001_v3 = vpop.f32.mrf.mxu0 }
 0x4e5   :  { %v6002_v14 = vadd.f32 %v6001_v3, %v5959_v9 }
 0x4e6   :  { %v6003_v7 = vpop.f32.mrf.mxu0 }
 0x4e7   :  { %v6004_v43 = vadd.f32 %v6003_v7, %v5961_v55 }
 0x4e8   :  { %v6005_v11 = vpop.f32.mrf.mxu0 }
 0x4e9   :  { %v6006_v20 = vadd.f32 %v6005_v11, %v5963_v17 }
 0x4ea   :  { %v6007_v19 = vpop.f32.mrf.mxu0 }
 0x4eb   :  { %v6008_v52 = vadd.f32 %v6007_v19, %v5965_v26 }
 0x524   :  { %v6044_v59 = vpop.f32.mrf.mxu1 }
 0x525   :  { %v6045_v18 = vadd.f32 %v6044_v59, %v6002_v14 }
 0x526   :  { %v6046_v27 = vpop.f32.mrf.mxu1 }
 0x527   :  { %v6053_v24 = vsub.f32 0.0, %v6045_v18  ;;  %v6047_v21 = vadd.f32 %v6046_v27, %v6004_v43 }
 0x528   :  { %v6048_v23 = vpop.f32.mrf.mxu1 }
 0x529   :  { %v6057_v61 = vmul.f32 1.442695, %v6053_v24  ;;  %v6054_v62 = vsub.f32 0.0, %v6047_v21  ;;  %v6049_v28 = vadd.f32 %v6048_v23, %v6006_v20 }
 0x52a   :  { %v6050_v22 = vpop.f32.mrf.mxu1 }
 0x52b   :  { %7602 = vpow2.f32 %v6057_v61  ;;  %v6059_v15 = vmul.f32 1.442695, %v6054_v62  ;;  %v6055_v2 = vsub.f32 0.0, %v6049_v28  ;;  %v6051_v29 = vadd.f32 %v6050_v22, %v6008_v52 }
 0x52d   :  { %7604 = vpow2.f32 %v6059_v15  ;;  %v6061_v31 = vmul.f32 1.442695, %v6055_v2  ;;  %v6056_v40 = vsub.f32 0.0, %v6051_v29 }
 0x52f   :  { %7606 = vpow2.f32 %v6061_v31  ;;  %v6063_v42 = vmul.f32 1.442695, %v6056_v40 }
 0x531   :  { %7608 = vpow2.f32 %v6063_v42 }
 0x538   :  { %v7603_v45 = vpop.eup %7602 }
 0x539   :  { %v6065_v32 = vadd.f32 1.0, %v7603_v45 }
 0x53a   :  { %v7605_v34 = vpop.eup %7604 }
 0x53b   :  { %v6066_v53 = vadd.f32 1.0, %v7605_v34  ;;  %7610 = vrcp.f32 %v6065_v32 }
 0x53c   :  { %v7607_v35 = vpop.eup %7606 }
 0x53d   :  { %7612 = vrcp.f32 %v6066_v53  ;;  %v6067_v25 = vadd.f32 1.0, %v7607_v35 }
 0x53e   :  { %v7609_v36 = vpop.eup %7608 }
 0x53f   :  { %v6068_v37 = vadd.f32 1.0, %v7609_v36  ;;  %7614 = vrcp.f32 %v6067_v25 }
 0x541   :  { %7616 = vrcp.f32 %v6068_v37 }
 0x548   :  { %v7611_v38 = vpop.eup %7610 }
 0x54a   :  { %v7613_v39 = vpop.eup %7612 }
 0x54b   :  { %v7004_v41 = vpack.c.bf16 %v7613_v39, %v7611_v38 }
 0x54c   :  { %v7615_v44 = vpop.eup %7614 }
 0x54d   :  { %v6085_v46 = vrot.slane %v7004_v41, %v7942_v33 }
 0x54e   :  { %v7617_v47 = vpop.eup %7616 }
 0x54f   :  { %7006 = vst.sshfl [vmem:[#allocation9] sm:$0x5 pattern:$0x73625140] %v6085_v46 }
 0x556   :  { %v6161_v63 = vld [vmem:[#allocation9] sm:$0x3] }
 0x557   :  { %6162 = vst [vmem:[%s8011_s9] sm:$0x3] %v6161_v63 }
 0x558   :  { %6217 = vsyncpa [#allocation3], 1 }
 0x559   :  { %6218 = vsyncpa [#allocation5], 1 }
 0x55a   :  { %6219 = vsyncpa [#allocation8], 1 }

</bundles_post_ra>
